<compile_context>
chip_gen: v7x
topology: tpu7x:2x2x1
jax: 0.10.0
libtpu: 0.0.40
codegen_flags: <defaults>
</compile_context>

<pallas_src>
import numpy as np
import jax
import jax.numpy as jnp
from jax import lax
from jax.experimental import pallas as pl
from jax.experimental.pallas import tpu as pltpu


def _prompt_encoder_kernel(len_ref, midx_ref, emb_ref,
                           w0_ref, b0_ref, whh0_ref,
                           w1_ref, b1_ref, whh1_ref,
                           mw_ref, mb_ref,
                           out_ref,
                           gx_ref):
    T, BT, H = emb_ref.shape
    Hh = H // 2
    G = 4 * Hh
    fused = len(whh0_ref.shape) == 2          # block-diag fused recurrent dot (H <= 128)

    # valid-length masks (t < length), computed once outside the recurrence
    lens = len_ref[...]                                            # (BT, 1) int32
    t_pos = lax.broadcasted_iota(jnp.int32, (T, BT, 1), 0)
    valid = t_pos < lens                                           # (T, BT, 1) bool

    def bulk_gates(x_2d, w_ref_, b_ref_):
        # Hoisted input->hidden projection for BOTH directions of a layer:
        # one lane-dense (T*BT, H) x (H, 8*Hh) bf16 matmul, f32 accumulation,
        # combined (b_ih + b_hh) bias folded in. Stored bf16 (halves scratch).
        g = (jnp.dot(x_2d.astype(jnp.bfloat16), w_ref_[...],
                     preferred_element_type=jnp.float32)
             + b_ref_[...]).reshape(T, BT, 2 * G)
        gx_ref[...] = g.astype(gx_ref.dtype)

    def lstm_update(g, c):
        # gate layout (i, f, o, g): sigmoid over one contiguous slice, tanh over the rest
        s = jax.nn.sigmoid(g[:, 0:3 * Hh])
        gg = jnp.tanh(g[:, 3 * Hh:4 * Hh])
        c_n = s[:, Hh:2 * Hh] * c + s[:, 0:Hh] * gg
        h_n = s[:, 2 * Hh:3 * Hh] * jnp.tanh(c_n)
        return h_n, c_n

    def run_layer(whh_ref):
        # Packed-sequence bidirectional layer: fwd + bwd handled in the same
        # fully unrolled step (T is small & static). Only the recurrent
        # h @ W_hh dot stays on the serial critical path (bf16 MXU operands).
        if fused:
            whh = whh_ref[...]                                     # (2Hh, 2G) block-diag bf16
        else:
            whh_f = whh_ref[0]                                     # (Hh, G) bf16
            whh_b = whh_ref[1]
        zero = jnp.zeros((BT, Hh), jnp.float32)
        h_f, c_f, h_b, c_b = zero, zero, zero, zero
        hs_f = [None] * T
        hs_b = [None] * T
        for i in range(T):                                         # static unroll
            t_f, t_b = i, T - 1 - i
            if fused:
                # one MXU launch / result pop per step for both directions
                h_cat = jnp.concatenate([h_f, h_b], axis=1).astype(jnp.bfloat16)
                g_rec = jnp.dot(h_cat, whh, preferred_element_type=jnp.float32)
                gf = gx_ref[t_f, :, 0:G] + g_rec[:, 0:G]
                gb = gx_ref[t_b, :, G:2 * G] + g_rec[:, G:2 * G]
            else:
                gf = gx_ref[t_f, :, 0:G] + jnp.dot(
                    h_f.astype(jnp.bfloat16), whh_f, preferred_element_type=jnp.float32)
                gb = gx_ref[t_b, :, G:2 * G] + jnp.dot(
                    h_b.astype(jnp.bfloat16), whh_b, preferred_element_type=jnp.float32)
            h_f_n, c_f_n = lstm_update(gf, c_f)
            h_b_n, c_b_n = lstm_update(gb, c_b)
            m_f = valid[t_f]                                       # (BT, 1) bool
            m_b = valid[t_b]
            h_f = jnp.where(m_f, h_f_n, h_f)     # packed-seq: state frozen past
            c_f = jnp.where(m_f, c_f_n, c_f)     # the sequence's valid length
            h_b = jnp.where(m_b, h_b_n, h_b)
            c_b = jnp.where(m_b, c_b_n, c_b)
            hs_f[t_f] = h_f
            hs_b[t_b] = h_b
        # one lane-dense stacked result [fwd | bwd] instead of 2T per-step
        # masked sub-lane stores into a scratch buffer
        return jnp.concatenate(
            [jnp.stack(hs_f, axis=0), jnp.stack(hs_b, axis=0)], axis=-1)  # (T, BT, H) f32

    # ---- layer 0 (input: embeddings) ----
    bulk_gates(emb_ref[...].reshape(T * BT, H), w0_ref, b0_ref)
    l0 = run_layer(whh0_ref)
    # ---- layer 1 (input: lane-concat layer-0 output); gx scratch reused ----
    bulk_gates(l0.reshape(T * BT, H), w1_ref, b1_ref)
    l1 = run_layer(whh1_ref)
    # TODO(synk): nn.LSTM inter-layer dropout is train-only; eval-mode forward omits it.

    # pad_packed_sequence zero-fill (single bulk multiply), then mlp_head
    l1 = l1 * valid.astype(jnp.float32)
    y = (jnp.dot(l1.reshape(T * BT, H).astype(jnp.bfloat16), mw_ref[...],
                 preferred_element_type=jnp.float32)
         + mb_ref[...]).reshape(T, BT, H)

    # lstm_output[mask_idx] = embeddings[mask_idx]  (bit-exact passthrough)
    out_ref[...] = jnp.where(midx_ref[...] != 0, emb_ref[...], y.astype(out_ref.dtype))


def prompt_encoder_forward(tokens, embeddings, params,
                           pad_token_id=0, mask_token_id=103, b_tile=128):
    """tokens: (B, T) int; embeddings: (B, T, H). Returns (B, T, H) in embeddings.dtype.

    b_tile: batch rows per grid step. Per review, use 128 (v5e/v7x) or 256
    (v6e, VMEM permitting); it is clamped so tiny batches don't pad up to 128.
    """
    B, T, H = embeddings.shape
    assert H % 2 == 0, "hidden_size must be even (bidirectional LSTM uses H//2 per dir)"
    bt = max(8, min(b_tile, -(-B // 8) * 8))
    bt = -(-bt // 8) * 8                          # multiple of 8 sublanes
    Bp = -(-B // bt) * bt

    # lengths / mask-token positions computed wrapper-side (cheap scalar prep)
    lengths = jnp.sum((tokens != pad_token_id).astype(jnp.int32), axis=1)     # (B,)
    mask_idx = (tokens == mask_token_id).astype(jnp.int32)                    # (B, T)

    # time-major, batch padded to a multiple of 8 sublanes: makes the in-kernel
    # (T, BT, H) <-> (T*BT, H) reshapes layout-preserving. Dtype is preserved
    # (bf16 transport halves activation DMA if the surrounding model is bf16).
    emb_tm = jnp.pad(jnp.transpose(embeddings, (1, 0, 2)),
                     ((0, 0), (0, Bp - B), (0, 0)))                           # (T, Bp, H)
    midx_tm = jnp.pad(jnp.transpose(mask_idx, (1, 0))[:, :, None],
                      ((0, 0), (0, Bp - B), (0, 0)))                          # (T, Bp, 1)
    len_col = jnp.pad(lengths, (0, Bp - B))[:, None]                          # (Bp, 1)

    def full(a):   # weights: constant block index -> fetched once, never re-DMA'd
        return pl.BlockSpec(a.shape, lambda i, _nd=a.ndim: (0,) * _nd)

    w0, b0, whh0 = params["w0"], params["b0"], params["whh0"]
    w1, b1, whh1 = params["w1"], params["b1"], params["whh1"]
    mlpw, mlpb = params["mlpw"], params["mlpb"]

    out_tm = pl.pallas_call(
        _prompt_encoder_kernel,
        out_shape=jax.ShapeDtypeStruct((T, Bp, H), embeddings.dtype),
        grid_spec=pltpu.PrefetchScalarGridSpec(
            num_scalar_prefetch=0,
            grid=(Bp // bt,),
            in_specs=[
                pl.BlockSpec((bt, 1), lambda i: (i, 0)),          # lengths
                pl.BlockSpec((T, bt, 1), lambda i: (0, i, 0)),    # mask-token positions
                pl.BlockSpec((T, bt, H), lambda i: (0, i, 0)),    # embeddings
                full(w0), full(b0), full(whh0),
                full(w1), full(b1), full(whh1),
                full(mlpw), full(mlpb),
            ],
            out_specs=pl.BlockSpec((T, bt, H), lambda i: (0, i, 0)),
            # single scratch: hoisted gate contributions, bf16 (largest activation buffer)
            scratch_shapes=[pltpu.VMEM((T, bt, 4 * H), jnp.bfloat16)],
        ),
        compiler_params=pltpu.CompilerParams(
            dimension_semantics=("parallel",),          # batch tiles -> both TCs on v7x
            vmem_limit_bytes=48 * 1024 * 1024,          # > 16/32 MiB defaults, < v7x 64 MiB
        ),
    )(len_col, midx_tm, emb_tm, w0, b0, whh0, w1, b1, whh1, mlpw, mlpb)

    return jnp.transpose(out_tm[:, :B, :], (1, 0, 2))


def init_params(key, hidden_size):
    """Synthetic parameters in the PyTorch nn.LSTM / nn.Linear layout & init range."""
    H = hidden_size
    Hh = H // 2
    k_lstm = 1.0 / np.sqrt(Hh)
    k_lin = 1.0 / np.sqrt(H)
    keys = iter(jax.random.split(key, 18))

    def u(shape, k):
        return jax.random.uniform(next(keys), shape, jnp.float32, -k, k)

    raw = {}
    for layer in (0, 1):
        in_dim = H                           # layer 0: H ; layer 1: 2*(H//2) = H
        for suf in ("", "_reverse"):
            raw[f"weight_ih_l{layer}{suf}"] = u((4 * Hh, in_dim), k_lstm)
            raw[f"weight_hh_l{layer}{suf}"] = u((4 * Hh, Hh), k_lstm)
            raw[f"bias_ih_l{layer}{suf}"] = u((4 * Hh,), k_lstm)
            raw[f"bias_hh_l{layer}{suf}"] = u((4 * Hh,), k_lstm)
    raw["mlp_weight"] = u((H, H), k_lin)     # torch Linear weight: (out, in)
    raw["mlp_bias"] = u((H,), k_lin)
    return raw


def pack_params(raw):
    """Re-layout PyTorch-convention weights for the kernel (wrapper-side plumbing).

    - gate rows reordered (i,f,g,o) -> (i,f,o,g) so sigmoid/tanh hit contiguous lanes
    - feed-forward & recurrent weights pre-cast to bf16 (MXU operand dtype)
    - for H <= 128 the two directions' W_hh are packed into one block-diagonal
      (2Hh, 8Hh) matrix so the per-step recurrent dot is a single MXU launch
    """
    H = raw["mlp_weight"].shape[0]
    Hh = H // 2
    fuse_recurrent = H <= 128

    def reorder(w):   # (4Hh, ...) or (4Hh,): torch (i,f,g,o) -> (i,f,o,g)
        i, f, g, o = w[0:Hh], w[Hh:2 * Hh], w[2 * Hh:3 * Hh], w[3 * Hh:4 * Hh]
        return jnp.concatenate([i, f, o, g], axis=0)

    def wcat(l):   # (in, 8Hh) bf16: cols [0:4Hh] = forward gates, [4Hh:8Hh] = reverse
        return jnp.concatenate([reorder(raw[f"weight_ih_l{l}"]).T,
                                reorder(raw[f"weight_ih_l{l}_reverse"]).T],
                               axis=1).astype(jnp.bfloat16)

    def bcat(l):   # combined b_ih + b_hh for both directions, (1, 8Hh) f32
        bf = reorder(raw[f"bias_ih_l{l}"] + raw[f"bias_hh_l{l}"])
        bb = reorder(raw[f"bias_ih_l{l}_reverse"] + raw[f"bias_hh_l{l}_reverse"])
        return jnp.concatenate([bf, bb])[None, :]

    def whh(l):
        wf = reorder(raw[f"weight_hh_l{l}"]).T                     # (Hh, 4Hh)
        wb = reorder(raw[f"weight_hh_l{l}_reverse"]).T
        if fuse_recurrent:
            top = jnp.concatenate([wf, jnp.zeros_like(wf)], axis=1)
            bot = jnp.concatenate([jnp.zeros_like(wb), wb], axis=1)
            return jnp.concatenate([top, bot], axis=0).astype(jnp.bfloat16)   # (2Hh, 8Hh)
        return jnp.stack([wf, wb]).astype(jnp.bfloat16)            # (2, Hh, 4Hh)

    return dict(w0=wcat(0), b0=bcat(0), whh0=whh(0),
                w1=wcat(1), b1=bcat(1), whh1=whh(1),
                mlpw=raw["mlp_weight"].T.astype(jnp.bfloat16),
                mlpb=raw["mlp_bias"][None, :])


if __name__ == "__main__":
    B, T, H = 2, 8, 32
    PAD_ID, MASK_ID = 0, 103

    key = jax.random.PRNGKey(0)
    k_emb, k_par = jax.random.split(key)

    embeddings = jax.random.normal(k_emb, (B, T, H), dtype=jnp.float32)
    # one full-length sequence, one padded sequence; MASK_ID marks [MASK] tokens
    tokens = jnp.array([[5, 6, MASK_ID, 8, 9, 10, MASK_ID, 12],
                        [3, MASK_ID, 5, 6, 7, PAD_ID, PAD_ID, PAD_ID]],
                       dtype=jnp.int32)

    params = pack_params(init_params(k_par, H))
    out = prompt_encoder_forward(tokens, embeddings, params,
                                 pad_token_id=PAD_ID, mask_token_id=MASK_ID)
    out = jax.block_until_ready(out)
    assert out.shape == (B, T, H)
    assert out.dtype == embeddings.dtype
    assert bool(jnp.all(jnp.isfinite(out)))
    # [MASK] positions must pass the input embeddings through unchanged (bit-exact)
    m = (tokens == MASK_ID)[:, :, None]
    assert bool(jnp.all(jnp.where(m, out == embeddings, True)))
    print("KERNEL_OK")
</pallas_src>

<mosaic_0001>
module attributes {stable_mosaic.version = 11 : i64} {
  func.func @_prompt_encoder_kernel(%arg0: i32, %arg1: memref<8x1xi32, #tpu.memory_space<vmem>>, %arg2: memref<8x8x1xi32, #tpu.memory_space<vmem>>, %arg3: memref<8x8x32xf32, #tpu.memory_space<vmem>>, %arg4: memref<32x128xbf16, #tpu.memory_space<vmem>>, %arg5: memref<1x128xf32, #tpu.memory_space<vmem>>, %arg6: memref<32x128xbf16, #tpu.memory_space<vmem>>, %arg7: memref<32x128xbf16, #tpu.memory_space<vmem>>, %arg8: memref<1x128xf32, #tpu.memory_space<vmem>>, %arg9: memref<32x128xbf16, #tpu.memory_space<vmem>>, %arg10: memref<32x32xbf16, #tpu.memory_space<vmem>>, %arg11: memref<1x32xf32, #tpu.memory_space<vmem>>, %arg12: memref<8x8x32xf32, #tpu.memory_space<vmem>>, %arg13: memref<8x8x128xbf16, #tpu.memory_space<vmem>>) attributes {dimension_semantics = [#tpu.dimension_semantics<parallel>], iteration_bounds = array<i64: 1>, scalar_prefetch = 0 : i64, scratch_operands = 1 : i64, tpu.core_type = #tpu.core_type<tc>, window_params = [{transform_indices = @transform_0, window_bounds = array<i64: 8, 1>}, {transform_indices = @transform_1, window_bounds = array<i64: 8, 8, 1>}, {transform_indices = @transform_2, window_bounds = array<i64: 8, 8, 32>}, {pipeline_mode = #tpu.pipeline_mode<synchronous>, transform_indices = @transform_3, window_bounds = array<i64: 32, 128>}, {pipeline_mode = #tpu.pipeline_mode<synchronous>, transform_indices = @transform_4, window_bounds = array<i64: 1, 128>}, {pipeline_mode = #tpu.pipeline_mode<synchronous>, transform_indices = @transform_5, window_bounds = array<i64: 32, 128>}, {pipeline_mode = #tpu.pipeline_mode<synchronous>, transform_indices = @transform_6, window_bounds = array<i64: 32, 128>}, {pipeline_mode = #tpu.pipeline_mode<synchronous>, transform_indices = @transform_7, window_bounds = array<i64: 1, 128>}, {pipeline_mode = #tpu.pipeline_mode<synchronous>, transform_indices = @transform_8, window_bounds = array<i64: 32, 128>}, {pipeline_mode = #tpu.pipeline_mode<synchronous>, transform_indices = @transform_9, window_bounds = array<i64: 32, 32>}, {pipeline_mode = #tpu.pipeline_mode<synchronous>, transform_indices = @transform_10, window_bounds = array<i64: 1, 32>}, {transform_indices = @transform_11, window_bounds = array<i64: 8, 8, 32>}]} {
    %c0 = arith.constant 0 : index
    %c0_0 = arith.constant 0 : index
    %0 = vector.load %arg1[%c0, %c0_0] : memref<8x1xi32, #tpu.memory_space<vmem>>, vector<8x1xi32>
    %1 = tpu.iota {dimensions = array<i32: 0>} : vector<8x8x1xi32>
    %2 = vector.shape_cast %0 : vector<8x1xi32> to vector<1x8x1xi32>
    %3 = vector.broadcast %2 : vector<1x8x1xi32> to vector<8x8x1xi32>
    %4 = arith.cmpi slt, %1, %3 : vector<8x8x1xi32>
    %c0_1 = arith.constant 0 : index
    %c0_2 = arith.constant 0 : index
    %c0_3 = arith.constant 0 : index
    %5 = vector.load %arg3[%c0_1, %c0_2, %c0_3] : memref<8x8x32xf32, #tpu.memory_space<vmem>>, vector<8x8x32xf32>
    %6 = vector.shape_cast %5 : vector<8x8x32xf32> to vector<64x32xf32>
    %7 = arith.truncf %6 : vector<64x32xf32> to vector<64x32xbf16>
    %c0_4 = arith.constant 0 : index
    %c0_5 = arith.constant 0 : index
    %8 = vector.load %arg4[%c0_4, %c0_5] : memref<32x128xbf16, #tpu.memory_space<vmem>>, vector<32x128xbf16>
    %cst = arith.constant dense<0.000000e+00> : vector<64x128xf32>
    %9 = tpu.matmul %7, %8, %cst {dimension_numbers = #tpu.dot_dimension_numbers<[1], [0], [0], [1], [0, 0, 1, 1], [], []>} : vector<64x32xbf16>, vector<32x128xbf16>, vector<64x128xf32> -> vector<64x128xf32>
    %c0_6 = arith.constant 0 : index
    %c0_7 = arith.constant 0 : index
    %10 = vector.load %arg5[%c0_6, %c0_7] : memref<1x128xf32, #tpu.memory_space<vmem>>, vector<1x128xf32>
    %11 = vector.broadcast %10 : vector<1x128xf32> to vector<64x128xf32>
    %12 = arith.addf %9, %11 : vector<64x128xf32>
    %13 = vector.shape_cast %12 : vector<64x128xf32> to vector<8x8x128xf32>
    %14 = arith.truncf %13 : vector<8x8x128xf32> to vector<8x8x128xbf16>
    %c0_8 = arith.constant 0 : index
    %c0_9 = arith.constant 0 : index
    %c0_10 = arith.constant 0 : index
    %15 = vector.load %arg13[%c0_8, %c0_9, %c0_10] : memref<8x8x128xbf16, #tpu.memory_space<vmem>>, vector<8x8x128xbf16>
    tpu.vector_store %arg13[%c0_8, %c0_9, %c0_10], %14 {strides = array<i32>} : memref<8x8x128xbf16, #tpu.memory_space<vmem>>, vector<8x8x128xbf16>,
    %c0_11 = arith.constant 0 : index
    %c0_12 = arith.constant 0 : index
    %16 = vector.load %arg6[%c0_11, %c0_12] : memref<32x128xbf16, #tpu.memory_space<vmem>>, vector<32x128xbf16>
    %cst_13 = arith.constant 0.000000e+00 : f32
    %17 = vector.broadcast %cst_13 : f32 to vector<8x16xf32>
    %18 = tpu.concatenate %17, %17 in 1 : vector<8x16xf32>, vector<8x16xf32> -> vector<8x32xf32>
    %19 = arith.truncf %18 : vector<8x32xf32> to vector<8x32xbf16>
    %cst_14 = arith.constant dense<0.000000e+00> : vector<8x128xf32>
    %20 = tpu.matmul %19, %16, %cst_14 {dimension_numbers = #tpu.dot_dimension_numbers<[1], [0], [0], [1], [0, 0, 1, 1], [], []>} : vector<8x32xbf16>, vector<32x128xbf16>, vector<8x128xf32> -> vector<8x128xf32>
    %c0_15 = arith.constant 0 : index
    %c0_16 = arith.constant 0 : index
    %c0_17 = arith.constant 0 : index
    %21 = vector.load %arg13[%c0_15, %c0_16, %c0_17] : memref<8x8x128xbf16, #tpu.memory_space<vmem>>, vector<1x8x64xbf16>
    %22 = vector.shape_cast %21 : vector<1x8x64xbf16> to vector<8x64xbf16>
    %23 = vector.extract_strided_slice %20 {offsets = [0, 0], sizes = [8, 64], strides = [1, 1]} : vector<8x128xf32> to vector<8x64xf32>
    %24 = arith.extf %22 : vector<8x64xbf16> to vector<8x64xf32>
    %25 = arith.addf %24, %23 : vector<8x64xf32>
    %c7 = arith.constant 7 : index
    %c0_18 = arith.constant 0 : index
    %c64 = arith.constant 64 : index
    %26 = vector.load %arg13[%c7, %c0_18, %c64] : memref<8x8x128xbf16, #tpu.memory_space<vmem>>, vector<1x8x64xbf16>
    %27 = vector.shape_cast %26 : vector<1x8x64xbf16> to vector<8x64xbf16>
    %28 = vector.extract_strided_slice %20 {offsets = [0, 64], sizes = [8, 64], strides = [1, 1]} : vector<8x128xf32> to vector<8x64xf32>
    %29 = arith.extf %27 : vector<8x64xbf16> to vector<8x64xf32>
    %30 = arith.addf %29, %28 : vector<8x64xf32>
    %31 = vector.extract_strided_slice %25 {offsets = [0, 0], sizes = [8, 48], strides = [1, 1]} : vector<8x64xf32> to vector<8x48xf32>
    %32 = arith.negf %31 : vector<8x48xf32>
    %33 = math.exp %32 : vector<8x48xf32>
    %cst_19 = arith.constant 1.000000e+00 : f32
    %34 = vector.broadcast %cst_19 : f32 to vector<8x48xf32>
    %35 = arith.addf %34, %33 : vector<8x48xf32>
    %36 = arith.divf %34, %35 : vector<8x48xf32>
    %37 = vector.extract_strided_slice %25 {offsets = [0, 48], sizes = [8, 16], strides = [1, 1]} : vector<8x64xf32> to vector<8x16xf32>
    %38 = math.tanh %37 : vector<8x16xf32>
    %39 = vector.extract_strided_slice %36 {offsets = [0, 16], sizes = [8, 16], strides = [1, 1]} : vector<8x48xf32> to vector<8x16xf32>
    %40 = arith.mulf %39, %17 : vector<8x16xf32>
    %41 = vector.extract_strided_slice %36 {offsets = [0, 0], sizes = [8, 16], strides = [1, 1]} : vector<8x48xf32> to vector<8x16xf32>
    %42 = arith.mulf %41, %38 : vector<8x16xf32>
    %43 = arith.addf %40, %42 : vector<8x16xf32>
    %44 = vector.extract_strided_slice %36 {offsets = [0, 32], sizes = [8, 16], strides = [1, 1]} : vector<8x48xf32> to vector<8x16xf32>
    %45 = math.tanh %43 : vector<8x16xf32>
    %46 = arith.mulf %44, %45 : vector<8x16xf32>
    %47 = vector.extract_strided_slice %30 {offsets = [0, 0], sizes = [8, 48], strides = [1, 1]} : vector<8x64xf32> to vector<8x48xf32>
    %48 = arith.negf %47 : vector<8x48xf32>
    %49 = math.exp %48 : vector<8x48xf32>
    %cst_20 = arith.constant 1.000000e+00 : f32
    %50 = vector.broadcast %cst_20 : f32 to vector<8x48xf32>
    %51 = arith.addf %50, %49 : vector<8x48xf32>
    %52 = arith.divf %50, %51 : vector<8x48xf32>
    %53 = vector.extract_strided_slice %30 {offsets = [0, 48], sizes = [8, 16], strides = [1, 1]} : vector<8x64xf32> to vector<8x16xf32>
    %54 = math.tanh %53 : vector<8x16xf32>
    %55 = vector.extract_strided_slice %52 {offsets = [0, 16], sizes = [8, 16], strides = [1, 1]} : vector<8x48xf32> to vector<8x16xf32>
    %56 = arith.mulf %55, %17 : vector<8x16xf32>
    %57 = vector.extract_strided_slice %52 {offsets = [0, 0], sizes = [8, 16], strides = [1, 1]} : vector<8x48xf32> to vector<8x16xf32>
    %58 = arith.mulf %57, %54 : vector<8x16xf32>
    %59 = arith.addf %56, %58 : vector<8x16xf32>
    %60 = vector.extract_strided_slice %52 {offsets = [0, 32], sizes = [8, 16], strides = [1, 1]} : vector<8x48xf32> to vector<8x16xf32>
    %61 = math.tanh %59 : vector<8x16xf32>
    %62 = arith.mulf %60, %61 : vector<8x16xf32>
    %63 = vector.extract_strided_slice %4 {offsets = [0, 0, 0], sizes = [1, 8, 1], strides = [1, 1, 1]} : vector<8x8x1xi1> to vector<1x8x1xi1>
    %64 = vector.shape_cast %63 : vector<1x8x1xi1> to vector<8x1xi1>
    %65 = vector.extract_strided_slice %4 {offsets = [7, 0, 0], sizes = [1, 8, 1], strides = [1, 1, 1]} : vector<8x8x1xi1> to vector<1x8x1xi1>
    %66 = vector.shape_cast %65 : vector<1x8x1xi1> to vector<8x1xi1>
    %67 = vector.shape_cast %64 : vector<8x1xi1> to vector<8x1xi1>
    %68 = vector.broadcast %67 : vector<8x1xi1> to vector<8x16xi1>
    %69 = arith.select %68, %46, %17 : vector<8x16xi1>, vector<8x16xf32>
    %70 = vector.shape_cast %64 : vector<8x1xi1> to vector<8x1xi1>
    %71 = vector.broadcast %70 : vector<8x1xi1> to vector<8x16xi1>
    %72 = arith.select %71, %43, %17 : vector<8x16xi1>, vector<8x16xf32>
    %73 = vector.shape_cast %66 : vector<8x1xi1> to vector<8x1xi1>
    %74 = vector.broadcast %73 : vector<8x1xi1> to vector<8x16xi1>
    %75 = arith.select %74, %62, %17 : vector<8x16xi1>, vector<8x16xf32>
    %76 = vector.shape_cast %66 : vector<8x1xi1> to vector<8x1xi1>
    %77 = vector.broadcast %76 : vector<8x1xi1> to vector<8x16xi1>
    %78 = arith.select %77, %59, %17 : vector<8x16xi1>, vector<8x16xf32>
    %79 = tpu.concatenate %69, %75 in 1 : vector<8x16xf32>, vector<8x16xf32> -> vector<8x32xf32>
    %80 = arith.truncf %79 : vector<8x32xf32> to vector<8x32xbf16>
    %cst_21 = arith.constant dense<0.000000e+00> : vector<8x128xf32>
    %81 = tpu.matmul %80, %16, %cst_21 {dimension_numbers = #tpu.dot_dimension_numbers<[1], [0], [0], [1], [0, 0, 1, 1], [], []>} : vector<8x32xbf16>, vector<32x128xbf16>, vector<8x128xf32> -> vector<8x128xf32>
    %c1 = arith.constant 1 : index
    %c0_22 = arith.constant 0 : index
    %c0_23 = arith.constant 0 : index
    %82 = vector.load %arg13[%c1, %c0_22, %c0_23] : memref<8x8x128xbf16, #tpu.memory_space<vmem>>, vector<1x8x64xbf16>
    %83 = vector.shape_cast %82 : vector<1x8x64xbf16> to vector<8x64xbf16>
    %84 = vector.extract_strided_slice %81 {offsets = [0, 0], sizes = [8, 64], strides = [1, 1]} : vector<8x128xf32> to vector<8x64xf32>
    %85 = arith.extf %83 : vector<8x64xbf16> to vector<8x64xf32>
    %86 = arith.addf %85, %84 : vector<8x64xf32>
    %c6 = arith.constant 6 : index
    %c0_24 = arith.constant 0 : index
    %c64_25 = arith.constant 64 : index
    %87 = vector.load %arg13[%c6, %c0_24, %c64_25] : memref<8x8x128xbf16, #tpu.memory_space<vmem>>, vector<1x8x64xbf16>
    %88 = vector.shape_cast %87 : vector<1x8x64xbf16> to vector<8x64xbf16>
    %89 = vector.extract_strided_slice %81 {offsets = [0, 64], sizes = [8, 64], strides = [1, 1]} : vector<8x128xf32> to vector<8x64xf32>
    %90 = arith.extf %88 : vector<8x64xbf16> to vector<8x64xf32>
    %91 = arith.addf %90, %89 : vector<8x64xf32>
    %92 = vector.extract_strided_slice %86 {offsets = [0, 0], sizes = [8, 48], strides = [1, 1]} : vector<8x64xf32> to vector<8x48xf32>
    %93 = arith.negf %92 : vector<8x48xf32>
    %94 = math.exp %93 : vector<8x48xf32>
    %cst_26 = arith.constant 1.000000e+00 : f32
    %95 = vector.broadcast %cst_26 : f32 to vector<8x48xf32>
    %96 = arith.addf %95, %94 : vector<8x48xf32>
    %97 = arith.divf %95, %96 : vector<8x48xf32>
    %98 = vector.extract_strided_slice %86 {offsets = [0, 48], sizes = [8, 16], strides = [1, 1]} : vector<8x64xf32> to vector<8x16xf32>
    %99 = math.tanh %98 : vector<8x16xf32>
    %100 = vector.extract_strided_slice %97 {offsets = [0, 16], sizes = [8, 16], strides = [1, 1]} : vector<8x48xf32> to vector<8x16xf32>
    %101 = arith.mulf %100, %72 : vector<8x16xf32>
    %102 = vector.extract_strided_slice %97 {offsets = [0, 0], sizes = [8, 16], strides = [1, 1]} : vector<8x48xf32> to vector<8x16xf32>
    %103 = arith.mulf %102, %99 : vector<8x16xf32>
    %104 = arith.addf %101, %103 : vector<8x16xf32>
    %105 = vector.extract_strided_slice %97 {offsets = [0, 32], sizes = [8, 16], strides = [1, 1]} : vector<8x48xf32> to vector<8x16xf32>
    %106 = math.tanh %104 : vector<8x16xf32>
    %107 = arith.mulf %105, %106 : vector<8x16xf32>
    %108 = vector.extract_strided_slice %91 {offsets = [0, 0], sizes = [8, 48], strides = [1, 1]} : vector<8x64xf32> to vector<8x48xf32>
    %109 = arith.negf %108 : vector<8x48xf32>
    %110 = math.exp %109 : vector<8x48xf32>
    %cst_27 = arith.constant 1.000000e+00 : f32
    %111 = vector.broadcast %cst_27 : f32 to vector<8x48xf32>
    %112 = arith.addf %111, %110 : vector<8x48xf32>
    %113 = arith.divf %111, %112 : vector<8x48xf32>
    %114 = vector.extract_strided_slice %91 {offsets = [0, 48], sizes = [8, 16], strides = [1, 1]} : vector<8x64xf32> to vector<8x16xf32>
    %115 = math.tanh %114 : vector<8x16xf32>
    %116 = vector.extract_strided_slice %113 {offsets = [0, 16], sizes = [8, 16], strides = [1, 1]} : vector<8x48xf32> to vector<8x16xf32>
    %117 = arith.mulf %116, %78 : vector<8x16xf32>
    %118 = vector.extract_strided_slice %113 {offsets = [0, 0], sizes = [8, 16], strides = [1, 1]} : vector<8x48xf32> to vector<8x16xf32>
    %119 = arith.mulf %118, %115 : vector<8x16xf32>
    %120 = arith.addf %117, %119 : vector<8x16xf32>
    %121 = vector.extract_strided_slice %113 {offsets = [0, 32], sizes = [8, 16], strides = [1, 1]} : vector<8x48xf32> to vector<8x16xf32>
    %122 = math.tanh %120 : vector<8x16xf32>
    %123 = arith.mulf %121, %122 : vector<8x16xf32>
    %124 = vector.extract_strided_slice %4 {offsets = [1, 0, 0], sizes = [1, 8, 1], strides = [1, 1, 1]} : vector<8x8x1xi1> to vector<1x8x1xi1>
    %125 = vector.shape_cast %124 : vector<1x8x1xi1> to vector<8x1xi1>
    %126 = vector.extract_strided_slice %4 {offsets = [6, 0, 0], sizes = [1, 8, 1], strides = [1, 1, 1]} : vector<8x8x1xi1> to vector<1x8x1xi1>
    %127 = vector.shape_cast %126 : vector<1x8x1xi1> to vector<8x1xi1>
    %128 = vector.shape_cast %125 : vector<8x1xi1> to vector<8x1xi1>
    %129 = vector.broadcast %128 : vector<8x1xi1> to vector<8x16xi1>
    %130 = arith.select %129, %107, %69 : vector<8x16xi1>, vector<8x16xf32>
    %131 = vector.shape_cast %125 : vector<8x1xi1> to vector<8x1xi1>
    %132 = vector.broadcast %131 : vector<8x1xi1> to vector<8x16xi1>
    %133 = arith.select %132, %104, %72 : vector<8x16xi1>, vector<8x16xf32>
    %134 = vector.shape_cast %127 : vector<8x1xi1> to vector<8x1xi1>
    %135 = vector.broadcast %134 : vector<8x1xi1> to vector<8x16xi1>
    %136 = arith.select %135, %123, %75 : vector<8x16xi1>, vector<8x16xf32>
    %137 = vector.shape_cast %127 : vector<8x1xi1> to vector<8x1xi1>
    %138 = vector.broadcast %137 : vector<8x1xi1> to vector<8x16xi1>
    %139 = arith.select %138, %120, %78 : vector<8x16xi1>, vector<8x16xf32>
    %140 = tpu.concatenate %130, %136 in 1 : vector<8x16xf32>, vector<8x16xf32> -> vector<8x32xf32>
    %141 = arith.truncf %140 : vector<8x32xf32> to vector<8x32xbf16>
    %cst_28 = arith.constant dense<0.000000e+00> : vector<8x128xf32>
    %142 = tpu.matmul %141, %16, %cst_28 {dimension_numbers = #tpu.dot_dimension_numbers<[1], [0], [0], [1], [0, 0, 1, 1], [], []>} : vector<8x32xbf16>, vector<32x128xbf16>, vector<8x128xf32> -> vector<8x128xf32>
    %c2 = arith.constant 2 : index
    %c0_29 = arith.constant 0 : index
    %c0_30 = arith.constant 0 : index
    %143 = vector.load %arg13[%c2, %c0_29, %c0_30] : memref<8x8x128xbf16, #tpu.memory_space<vmem>>, vector<1x8x64xbf16>
    %144 = vector.shape_cast %143 : vector<1x8x64xbf16> to vector<8x64xbf16>
    %145 = vector.extract_strided_slice %142 {offsets = [0, 0], sizes = [8, 64], strides = [1, 1]} : vector<8x128xf32> to vector<8x64xf32>
    %146 = arith.extf %144 : vector<8x64xbf16> to vector<8x64xf32>
    %147 = arith.addf %146, %145 : vector<8x64xf32>
    %c5 = arith.constant 5 : index
    %c0_31 = arith.constant 0 : index
    %c64_32 = arith.constant 64 : index
    %148 = vector.load %arg13[%c5, %c0_31, %c64_32] : memref<8x8x128xbf16, #tpu.memory_space<vmem>>, vector<1x8x64xbf16>
    %149 = vector.shape_cast %148 : vector<1x8x64xbf16> to vector<8x64xbf16>
    %150 = vector.extract_strided_slice %142 {offsets = [0, 64], sizes = [8, 64], strides = [1, 1]} : vector<8x128xf32> to vector<8x64xf32>
    %151 = arith.extf %149 : vector<8x64xbf16> to vector<8x64xf32>
    %152 = arith.addf %151, %150 : vector<8x64xf32>
    %153 = vector.extract_strided_slice %147 {offsets = [0, 0], sizes = [8, 48], strides = [1, 1]} : vector<8x64xf32> to vector<8x48xf32>
    %154 = arith.negf %153 : vector<8x48xf32>
    %155 = math.exp %154 : vector<8x48xf32>
    %cst_33 = arith.constant 1.000000e+00 : f32
    %156 = vector.broadcast %cst_33 : f32 to vector<8x48xf32>
    %157 = arith.addf %156, %155 : vector<8x48xf32>
    %158 = arith.divf %156, %157 : vector<8x48xf32>
    %159 = vector.extract_strided_slice %147 {offsets = [0, 48], sizes = [8, 16], strides = [1, 1]} : vector<8x64xf32> to vector<8x16xf32>
    %160 = math.tanh %159 : vector<8x16xf32>
    %161 = vector.extract_strided_slice %158 {offsets = [0, 16], sizes = [8, 16], strides = [1, 1]} : vector<8x48xf32> to vector<8x16xf32>
    %162 = arith.mulf %161, %133 : vector<8x16xf32>
    %163 = vector.extract_strided_slice %158 {offsets = [0, 0], sizes = [8, 16], strides = [1, 1]} : vector<8x48xf32> to vector<8x16xf32>
    %164 = arith.mulf %163, %160 : vector<8x16xf32>
    %165 = arith.addf %162, %164 : vector<8x16xf32>
    %166 = vector.extract_strided_slice %158 {offsets = [0, 32], sizes = [8, 16], strides = [1, 1]} : vector<8x48xf32> to vector<8x16xf32>
    %167 = math.tanh %165 : vector<8x16xf32>
    %168 = arith.mulf %166, %167 : vector<8x16xf32>
    %169 = vector.extract_strided_slice %152 {offsets = [0, 0], sizes = [8, 48], strides = [1, 1]} : vector<8x64xf32> to vector<8x48xf32>
    %170 = arith.negf %169 : vector<8x48xf32>
    %171 = math.exp %170 : vector<8x48xf32>
    %cst_34 = arith.constant 1.000000e+00 : f32
    %172 = vector.broadcast %cst_34 : f32 to vector<8x48xf32>
    %173 = arith.addf %172, %171 : vector<8x48xf32>
    %174 = arith.divf %172, %173 : vector<8x48xf32>
    %175 = vector.extract_strided_slice %152 {offsets = [0, 48], sizes = [8, 16], strides = [1, 1]} : vector<8x64xf32> to vector<8x16xf32>
    %176 = math.tanh %175 : vector<8x16xf32>
    %177 = vector.extract_strided_slice %174 {offsets = [0, 16], sizes = [8, 16], strides = [1, 1]} : vector<8x48xf32> to vector<8x16xf32>
    %178 = arith.mulf %177, %139 : vector<8x16xf32>
    %179 = vector.extract_strided_slice %174 {offsets = [0, 0], sizes = [8, 16], strides = [1, 1]} : vector<8x48xf32> to vector<8x16xf32>
    %180 = arith.mulf %179, %176 : vector<8x16xf32>
    %181 = arith.addf %178, %180 : vector<8x16xf32>
    %182 = vector.extract_strided_slice %174 {offsets = [0, 32], sizes = [8, 16], strides = [1, 1]} : vector<8x48xf32> to vector<8x16xf32>
    %183 = math.tanh %181 : vector<8x16xf32>
    %184 = arith.mulf %182, %183 : vector<8x16xf32>
    %185 = vector.extract_strided_slice %4 {offsets = [2, 0, 0], sizes = [1, 8, 1], strides = [1, 1, 1]} : vector<8x8x1xi1> to vector<1x8x1xi1>
    %186 = vector.shape_cast %185 : vector<1x8x1xi1> to vector<8x1xi1>
    %187 = vector.extract_strided_slice %4 {offsets = [5, 0, 0], sizes = [1, 8, 1], strides = [1, 1, 1]} : vector<8x8x1xi1> to vector<1x8x1xi1>
    %188 = vector.shape_cast %187 : vector<1x8x1xi1> to vector<8x1xi1>
    %189 = vector.shape_cast %186 : vector<8x1xi1> to vector<8x1xi1>
    %190 = vector.broadcast %189 : vector<8x1xi1> to vector<8x16xi1>
    %191 = arith.select %190, %168, %130 : vector<8x16xi1>, vector<8x16xf32>
    %192 = vector.shape_cast %186 : vector<8x1xi1> to vector<8x1xi1>
    %193 = vector.broadcast %192 : vector<8x1xi1> to vector<8x16xi1>
    %194 = arith.select %193, %165, %133 : vector<8x16xi1>, vector<8x16xf32>
    %195 = vector.shape_cast %188 : vector<8x1xi1> to vector<8x1xi1>
    %196 = vector.broadcast %195 : vector<8x1xi1> to vector<8x16xi1>
    %197 = arith.select %196, %184, %136 : vector<8x16xi1>, vector<8x16xf32>
    %198 = vector.shape_cast %188 : vector<8x1xi1> to vector<8x1xi1>
    %199 = vector.broadcast %198 : vector<8x1xi1> to vector<8x16xi1>
    %200 = arith.select %199, %181, %139 : vector<8x16xi1>, vector<8x16xf32>
    %201 = tpu.concatenate %191, %197 in 1 : vector<8x16xf32>, vector<8x16xf32> -> vector<8x32xf32>
    %202 = arith.truncf %201 : vector<8x32xf32> to vector<8x32xbf16>
    %cst_35 = arith.constant dense<0.000000e+00> : vector<8x128xf32>
    %203 = tpu.matmul %202, %16, %cst_35 {dimension_numbers = #tpu.dot_dimension_numbers<[1], [0], [0], [1], [0, 0, 1, 1], [], []>} : vector<8x32xbf16>, vector<32x128xbf16>, vector<8x128xf32> -> vector<8x128xf32>
    %c3 = arith.constant 3 : index
    %c0_36 = arith.constant 0 : index
    %c0_37 = arith.constant 0 : index
    %204 = vector.load %arg13[%c3, %c0_36, %c0_37] : memref<8x8x128xbf16, #tpu.memory_space<vmem>>, vector<1x8x64xbf16>
    %205 = vector.shape_cast %204 : vector<1x8x64xbf16> to vector<8x64xbf16>
    %206 = vector.extract_strided_slice %203 {offsets = [0, 0], sizes = [8, 64], strides = [1, 1]} : vector<8x128xf32> to vector<8x64xf32>
    %207 = arith.extf %205 : vector<8x64xbf16> to vector<8x64xf32>
    %208 = arith.addf %207, %206 : vector<8x64xf32>
    %c4 = arith.constant 4 : index
    %c0_38 = arith.constant 0 : index
    %c64_39 = arith.constant 64 : index
    %209 = vector.load %arg13[%c4, %c0_38, %c64_39] : memref<8x8x128xbf16, #tpu.memory_space<vmem>>, vector<1x8x64xbf16>
    %210 = vector.shape_cast %209 : vector<1x8x64xbf16> to vector<8x64xbf16>
    %211 = vector.extract_strided_slice %203 {offsets = [0, 64], sizes = [8, 64], strides = [1, 1]} : vector<8x128xf32> to vector<8x64xf32>
    %212 = arith.extf %210 : vector<8x64xbf16> to vector<8x64xf32>
    %213 = arith.addf %212, %211 : vector<8x64xf32>
    %214 = vector.extract_strided_slice %208 {offsets = [0, 0], sizes = [8, 48], strides = [1, 1]} : vector<8x64xf32> to vector<8x48xf32>
    %215 = arith.negf %214 : vector<8x48xf32>
    %216 = math.exp %215 : vector<8x48xf32>
    %cst_40 = arith.constant 1.000000e+00 : f32
    %217 = vector.broadcast %cst_40 : f32 to vector<8x48xf32>
    %218 = arith.addf %217, %216 : vector<8x48xf32>
    %219 = arith.divf %217, %218 : vector<8x48xf32>
    %220 = vector.extract_strided_slice %208 {offsets = [0, 48], sizes = [8, 16], strides = [1, 1]} : vector<8x64xf32> to vector<8x16xf32>
    %221 = math.tanh %220 : vector<8x16xf32>
    %222 = vector.extract_strided_slice %219 {offsets = [0, 16], sizes = [8, 16], strides = [1, 1]} : vector<8x48xf32> to vector<8x16xf32>
    %223 = arith.mulf %222, %194 : vector<8x16xf32>
    %224 = vector.extract_strided_slice %219 {offsets = [0, 0], sizes = [8, 16], strides = [1, 1]} : vector<8x48xf32> to vector<8x16xf32>
    %225 = arith.mulf %224, %221 : vector<8x16xf32>
    %226 = arith.addf %223, %225 : vector<8x16xf32>
    %227 = vector.extract_strided_slice %219 {offsets = [0, 32], sizes = [8, 16], strides = [1, 1]} : vector<8x48xf32> to vector<8x16xf32>
    %228 = math.tanh %226 : vector<8x16xf32>
    %229 = arith.mulf %227, %228 : vector<8x16xf32>
    %230 = vector.extract_strided_slice %213 {offsets = [0, 0], sizes = [8, 48], strides = [1, 1]} : vector<8x64xf32> to vector<8x48xf32>
    %231 = arith.negf %230 : vector<8x48xf32>
    %232 = math.exp %231 : vector<8x48xf32>
    %cst_41 = arith.constant 1.000000e+00 : f32
    %233 = vector.broadcast %cst_41 : f32 to vector<8x48xf32>
    %234 = arith.addf %233, %232 : vector<8x48xf32>
    %235 = arith.divf %233, %234 : vector<8x48xf32>
    %236 = vector.extract_strided_slice %213 {offsets = [0, 48], sizes = [8, 16], strides = [1, 1]} : vector<8x64xf32> to vector<8x16xf32>
    %237 = math.tanh %236 : vector<8x16xf32>
    %238 = vector.extract_strided_slice %235 {offsets = [0, 16], sizes = [8, 16], strides = [1, 1]} : vector<8x48xf32> to vector<8x16xf32>
    %239 = arith.mulf %238, %200 : vector<8x16xf32>
    %240 = vector.extract_strided_slice %235 {offsets = [0, 0], sizes = [8, 16], strides = [1, 1]} : vector<8x48xf32> to vector<8x16xf32>
    %241 = arith.mulf %240, %237 : vector<8x16xf32>
    %242 = arith.addf %239, %241 : vector<8x16xf32>
    %243 = vector.extract_strided_slice %235 {offsets = [0, 32], sizes = [8, 16], strides = [1, 1]} : vector<8x48xf32> to vector<8x16xf32>
    %244 = math.tanh %242 : vector<8x16xf32>
    %245 = arith.mulf %243, %244 : vector<8x16xf32>
    %246 = vector.extract_strided_slice %4 {offsets = [3, 0, 0], sizes = [1, 8, 1], strides = [1, 1, 1]} : vector<8x8x1xi1> to vector<1x8x1xi1>
    %247 = vector.shape_cast %246 : vector<1x8x1xi1> to vector<8x1xi1>
    %248 = vector.extract_strided_slice %4 {offsets = [4, 0, 0], sizes = [1, 8, 1], strides = [1, 1, 1]} : vector<8x8x1xi1> to vector<1x8x1xi1>
    %249 = vector.shape_cast %248 : vector<1x8x1xi1> to vector<8x1xi1>
    %250 = vector.shape_cast %247 : vector<8x1xi1> to vector<8x1xi1>
    %251 = vector.broadcast %250 : vector<8x1xi1> to vector<8x16xi1>
    %252 = arith.select %251, %229, %191 : vector<8x16xi1>, vector<8x16xf32>
    %253 = vector.shape_cast %247 : vector<8x1xi1> to vector<8x1xi1>
    %254 = vector.broadcast %253 : vector<8x1xi1> to vector<8x16xi1>
    %255 = arith.select %254, %226, %194 : vector<8x16xi1>, vector<8x16xf32>
    %256 = vector.shape_cast %249 : vector<8x1xi1> to vector<8x1xi1>
    %257 = vector.broadcast %256 : vector<8x1xi1> to vector<8x16xi1>
    %258 = arith.select %257, %245, %197 : vector<8x16xi1>, vector<8x16xf32>
    %259 = vector.shape_cast %249 : vector<8x1xi1> to vector<8x1xi1>
    %260 = vector.broadcast %259 : vector<8x1xi1> to vector<8x16xi1>
    %261 = arith.select %260, %242, %200 : vector<8x16xi1>, vector<8x16xf32>
    %262 = tpu.concatenate %252, %258 in 1 : vector<8x16xf32>, vector<8x16xf32> -> vector<8x32xf32>
    %263 = arith.truncf %262 : vector<8x32xf32> to vector<8x32xbf16>
    %cst_42 = arith.constant dense<0.000000e+00> : vector<8x128xf32>
    %264 = tpu.matmul %263, %16, %cst_42 {dimension_numbers = #tpu.dot_dimension_numbers<[1], [0], [0], [1], [0, 0, 1, 1], [], []>} : vector<8x32xbf16>, vector<32x128xbf16>, vector<8x128xf32> -> vector<8x128xf32>
    %c4_43 = arith.constant 4 : index
    %c0_44 = arith.constant 0 : index
    %c0_45 = arith.constant 0 : index
    %265 = vector.load %arg13[%c4_43, %c0_44, %c0_45] : memref<8x8x128xbf16, #tpu.memory_space<vmem>>, vector<1x8x64xbf16>
    %266 = vector.shape_cast %265 : vector<1x8x64xbf16> to vector<8x64xbf16>
    %267 = vector.extract_strided_slice %264 {offsets = [0, 0], sizes = [8, 64], strides = [1, 1]} : vector<8x128xf32> to vector<8x64xf32>
    %268 = arith.extf %266 : vector<8x64xbf16> to vector<8x64xf32>
    %269 = arith.addf %268, %267 : vector<8x64xf32>
    %c3_46 = arith.constant 3 : index
    %c0_47 = arith.constant 0 : index
    %c64_48 = arith.constant 64 : index
    %270 = vector.load %arg13[%c3_46, %c0_47, %c64_48] : memref<8x8x128xbf16, #tpu.memory_space<vmem>>, vector<1x8x64xbf16>
    %271 = vector.shape_cast %270 : vector<1x8x64xbf16> to vector<8x64xbf16>
    %272 = vector.extract_strided_slice %264 {offsets = [0, 64], sizes = [8, 64], strides = [1, 1]} : vector<8x128xf32> to vector<8x64xf32>
    %273 = arith.extf %271 : vector<8x64xbf16> to vector<8x64xf32>
    %274 = arith.addf %273, %272 : vector<8x64xf32>
    %275 = vector.extract_strided_slice %269 {offsets = [0, 0], sizes = [8, 48], strides = [1, 1]} : vector<8x64xf32> to vector<8x48xf32>
    %276 = arith.negf %275 : vector<8x48xf32>
    %277 = math.exp %276 : vector<8x48xf32>
    %cst_49 = arith.constant 1.000000e+00 : f32
    %278 = vector.broadcast %cst_49 : f32 to vector<8x48xf32>
    %279 = arith.addf %278, %277 : vector<8x48xf32>
    %280 = arith.divf %278, %279 : vector<8x48xf32>
    %281 = vector.extract_strided_slice %269 {offsets = [0, 48], sizes = [8, 16], strides = [1, 1]} : vector<8x64xf32> to vector<8x16xf32>
    %282 = math.tanh %281 : vector<8x16xf32>
    %283 = vector.extract_strided_slice %280 {offsets = [0, 16], sizes = [8, 16], strides = [1, 1]} : vector<8x48xf32> to vector<8x16xf32>
    %284 = arith.mulf %283, %255 : vector<8x16xf32>
    %285 = vector.extract_strided_slice %280 {offsets = [0, 0], sizes = [8, 16], strides = [1, 1]} : vector<8x48xf32> to vector<8x16xf32>
    %286 = arith.mulf %285, %282 : vector<8x16xf32>
    %287 = arith.addf %284, %286 : vector<8x16xf32>
    %288 = vector.extract_strided_slice %280 {offsets = [0, 32], sizes = [8, 16], strides = [1, 1]} : vector<8x48xf32> to vector<8x16xf32>
    %289 = math.tanh %287 : vector<8x16xf32>
    %290 = arith.mulf %288, %289 : vector<8x16xf32>
    %291 = vector.extract_strided_slice %274 {offsets = [0, 0], sizes = [8, 48], strides = [1, 1]} : vector<8x64xf32> to vector<8x48xf32>
    %292 = arith.negf %291 : vector<8x48xf32>
    %293 = math.exp %292 : vector<8x48xf32>
    %cst_50 = arith.constant 1.000000e+00 : f32
    %294 = vector.broadcast %cst_50 : f32 to vector<8x48xf32>
    %295 = arith.addf %294, %293 : vector<8x48xf32>
    %296 = arith.divf %294, %295 : vector<8x48xf32>
    %297 = vector.extract_strided_slice %274 {offsets = [0, 48], sizes = [8, 16], strides = [1, 1]} : vector<8x64xf32> to vector<8x16xf32>
    %298 = math.tanh %297 : vector<8x16xf32>
    %299 = vector.extract_strided_slice %296 {offsets = [0, 16], sizes = [8, 16], strides = [1, 1]} : vector<8x48xf32> to vector<8x16xf32>
    %300 = arith.mulf %299, %261 : vector<8x16xf32>
    %301 = vector.extract_strided_slice %296 {offsets = [0, 0], sizes = [8, 16], strides = [1, 1]} : vector<8x48xf32> to vector<8x16xf32>
    %302 = arith.mulf %301, %298 : vector<8x16xf32>
    %303 = arith.addf %300, %302 : vector<8x16xf32>
    %304 = vector.extract_strided_slice %296 {offsets = [0, 32], sizes = [8, 16], strides = [1, 1]} : vector<8x48xf32> to vector<8x16xf32>
    %305 = math.tanh %303 : vector<8x16xf32>
    %306 = arith.mulf %304, %305 : vector<8x16xf32>
    %307 = vector.extract_strided_slice %4 {offsets = [4, 0, 0], sizes = [1, 8, 1], strides = [1, 1, 1]} : vector<8x8x1xi1> to vector<1x8x1xi1>
    %308 = vector.shape_cast %307 : vector<1x8x1xi1> to vector<8x1xi1>
    %309 = vector.extract_strided_slice %4 {offsets = [3, 0, 0], sizes = [1, 8, 1], strides = [1, 1, 1]} : vector<8x8x1xi1> to vector<1x8x1xi1>
    %310 = vector.shape_cast %309 : vector<1x8x1xi1> to vector<8x1xi1>
    %311 = vector.shape_cast %308 : vector<8x1xi1> to vector<8x1xi1>
    %312 = vector.broadcast %311 : vector<8x1xi1> to vector<8x16xi1>
    %313 = arith.select %312, %290, %252 : vector<8x16xi1>, vector<8x16xf32>
    %314 = vector.shape_cast %308 : vector<8x1xi1> to vector<8x1xi1>
    %315 = vector.broadcast %314 : vector<8x1xi1> to vector<8x16xi1>
    %316 = arith.select %315, %287, %255 : vector<8x16xi1>, vector<8x16xf32>
    %317 = vector.shape_cast %310 : vector<8x1xi1> to vector<8x1xi1>
    %318 = vector.broadcast %317 : vector<8x1xi1> to vector<8x16xi1>
    %319 = arith.select %318, %306, %258 : vector<8x16xi1>, vector<8x16xf32>
    %320 = vector.shape_cast %310 : vector<8x1xi1> to vector<8x1xi1>
    %321 = vector.broadcast %320 : vector<8x1xi1> to vector<8x16xi1>
    %322 = arith.select %321, %303, %261 : vector<8x16xi1>, vector<8x16xf32>
    %323 = tpu.concatenate %313, %319 in 1 : vector<8x16xf32>, vector<8x16xf32> -> vector<8x32xf32>
    %324 = arith.truncf %323 : vector<8x32xf32> to vector<8x32xbf16>
    %cst_51 = arith.constant dense<0.000000e+00> : vector<8x128xf32>
    %325 = tpu.matmul %324, %16, %cst_51 {dimension_numbers = #tpu.dot_dimension_numbers<[1], [0], [0], [1], [0, 0, 1, 1], [], []>} : vector<8x32xbf16>, vector<32x128xbf16>, vector<8x128xf32> -> vector<8x128xf32>
    %c5_52 = arith.constant 5 : index
    %c0_53 = arith.constant 0 : index
    %c0_54 = arith.constant 0 : index
    %326 = vector.load %arg13[%c5_52, %c0_53, %c0_54] : memref<8x8x128xbf16, #tpu.memory_space<vmem>>, vector<1x8x64xbf16>
    %327 = vector.shape_cast %326 : vector<1x8x64xbf16> to vector<8x64xbf16>
    %328 = vector.extract_strided_slice %325 {offsets = [0, 0], sizes = [8, 64], strides = [1, 1]} : vector<8x128xf32> to vector<8x64xf32>
    %329 = arith.extf %327 : vector<8x64xbf16> to vector<8x64xf32>
    %330 = arith.addf %329, %328 : vector<8x64xf32>
    %c2_55 = arith.constant 2 : index
    %c0_56 = arith.constant 0 : index
    %c64_57 = arith.constant 64 : index
    %331 = vector.load %arg13[%c2_55, %c0_56, %c64_57] : memref<8x8x128xbf16, #tpu.memory_space<vmem>>, vector<1x8x64xbf16>
    %332 = vector.shape_cast %331 : vector<1x8x64xbf16> to vector<8x64xbf16>
    %333 = vector.extract_strided_slice %325 {offsets = [0, 64], sizes = [8, 64], strides = [1, 1]} : vector<8x128xf32> to vector<8x64xf32>
    %334 = arith.extf %332 : vector<8x64xbf16> to vector<8x64xf32>
    %335 = arith.addf %334, %333 : vector<8x64xf32>
    %336 = vector.extract_strided_slice %330 {offsets = [0, 0], sizes = [8, 48], strides = [1, 1]} : vector<8x64xf32> to vector<8x48xf32>
    %337 = arith.negf %336 : vector<8x48xf32>
    %338 = math.exp %337 : vector<8x48xf32>
    %cst_58 = arith.constant 1.000000e+00 : f32
    %339 = vector.broadcast %cst_58 : f32 to vector<8x48xf32>
    %340 = arith.addf %339, %338 : vector<8x48xf32>
    %341 = arith.divf %339, %340 : vector<8x48xf32>
    %342 = vector.extract_strided_slice %330 {offsets = [0, 48], sizes = [8, 16], strides = [1, 1]} : vector<8x64xf32> to vector<8x16xf32>
    %343 = math.tanh %342 : vector<8x16xf32>
    %344 = vector.extract_strided_slice %341 {offsets = [0, 16], sizes = [8, 16], strides = [1, 1]} : vector<8x48xf32> to vector<8x16xf32>
    %345 = arith.mulf %344, %316 : vector<8x16xf32>
    %346 = vector.extract_strided_slice %341 {offsets = [0, 0], sizes = [8, 16], strides = [1, 1]} : vector<8x48xf32> to vector<8x16xf32>
    %347 = arith.mulf %346, %343 : vector<8x16xf32>
    %348 = arith.addf %345, %347 : vector<8x16xf32>
    %349 = vector.extract_strided_slice %341 {offsets = [0, 32], sizes = [8, 16], strides = [1, 1]} : vector<8x48xf32> to vector<8x16xf32>
    %350 = math.tanh %348 : vector<8x16xf32>
    %351 = arith.mulf %349, %350 : vector<8x16xf32>
    %352 = vector.extract_strided_slice %335 {offsets = [0, 0], sizes = [8, 48], strides = [1, 1]} : vector<8x64xf32> to vector<8x48xf32>
    %353 = arith.negf %352 : vector<8x48xf32>
    %354 = math.exp %353 : vector<8x48xf32>
    %cst_59 = arith.constant 1.000000e+00 : f32
    %355 = vector.broadcast %cst_59 : f32 to vector<8x48xf32>
    %356 = arith.addf %355, %354 : vector<8x48xf32>
    %357 = arith.divf %355, %356 : vector<8x48xf32>
    %358 = vector.extract_strided_slice %335 {offsets = [0, 48], sizes = [8, 16], strides = [1, 1]} : vector<8x64xf32> to vector<8x16xf32>
    %359 = math.tanh %358 : vector<8x16xf32>
    %360 = vector.extract_strided_slice %357 {offsets = [0, 16], sizes = [8, 16], strides = [1, 1]} : vector<8x48xf32> to vector<8x16xf32>
    %361 = arith.mulf %360, %322 : vector<8x16xf32>
    %362 = vector.extract_strided_slice %357 {offsets = [0, 0], sizes = [8, 16], strides = [1, 1]} : vector<8x48xf32> to vector<8x16xf32>
    %363 = arith.mulf %362, %359 : vector<8x16xf32>
    %364 = arith.addf %361, %363 : vector<8x16xf32>
    %365 = vector.extract_strided_slice %357 {offsets = [0, 32], sizes = [8, 16], strides = [1, 1]} : vector<8x48xf32> to vector<8x16xf32>
    %366 = math.tanh %364 : vector<8x16xf32>
    %367 = arith.mulf %365, %366 : vector<8x16xf32>
    %368 = vector.extract_strided_slice %4 {offsets = [5, 0, 0], sizes = [1, 8, 1], strides = [1, 1, 1]} : vector<8x8x1xi1> to vector<1x8x1xi1>
    %369 = vector.shape_cast %368 : vector<1x8x1xi1> to vector<8x1xi1>
    %370 = vector.extract_strided_slice %4 {offsets = [2, 0, 0], sizes = [1, 8, 1], strides = [1, 1, 1]} : vector<8x8x1xi1> to vector<1x8x1xi1>
    %371 = vector.shape_cast %370 : vector<1x8x1xi1> to vector<8x1xi1>
    %372 = vector.shape_cast %369 : vector<8x1xi1> to vector<8x1xi1>
    %373 = vector.broadcast %372 : vector<8x1xi1> to vector<8x16xi1>
    %374 = arith.select %373, %351, %313 : vector<8x16xi1>, vector<8x16xf32>
    %375 = vector.shape_cast %369 : vector<8x1xi1> to vector<8x1xi1>
    %376 = vector.broadcast %375 : vector<8x1xi1> to vector<8x16xi1>
    %377 = arith.select %376, %348, %316 : vector<8x16xi1>, vector<8x16xf32>
    %378 = vector.shape_cast %371 : vector<8x1xi1> to vector<8x1xi1>
    %379 = vector.broadcast %378 : vector<8x1xi1> to vector<8x16xi1>
    %380 = arith.select %379, %367, %319 : vector<8x16xi1>, vector<8x16xf32>
    %381 = vector.shape_cast %371 : vector<8x1xi1> to vector<8x1xi1>
    %382 = vector.broadcast %381 : vector<8x1xi1> to vector<8x16xi1>
    %383 = arith.select %382, %364, %322 : vector<8x16xi1>, vector<8x16xf32>
    %384 = tpu.concatenate %374, %380 in 1 : vector<8x16xf32>, vector<8x16xf32> -> vector<8x32xf32>
    %385 = arith.truncf %384 : vector<8x32xf32> to vector<8x32xbf16>
    %cst_60 = arith.constant dense<0.000000e+00> : vector<8x128xf32>
    %386 = tpu.matmul %385, %16, %cst_60 {dimension_numbers = #tpu.dot_dimension_numbers<[1], [0], [0], [1], [0, 0, 1, 1], [], []>} : vector<8x32xbf16>, vector<32x128xbf16>, vector<8x128xf32> -> vector<8x128xf32>
    %c6_61 = arith.constant 6 : index
    %c0_62 = arith.constant 0 : index
    %c0_63 = arith.constant 0 : index
    %387 = vector.load %arg13[%c6_61, %c0_62, %c0_63] : memref<8x8x128xbf16, #tpu.memory_space<vmem>>, vector<1x8x64xbf16>
    %388 = vector.shape_cast %387 : vector<1x8x64xbf16> to vector<8x64xbf16>
    %389 = vector.extract_strided_slice %386 {offsets = [0, 0], sizes = [8, 64], strides = [1, 1]} : vector<8x128xf32> to vector<8x64xf32>
    %390 = arith.extf %388 : vector<8x64xbf16> to vector<8x64xf32>
    %391 = arith.addf %390, %389 : vector<8x64xf32>
    %c1_64 = arith.constant 1 : index
    %c0_65 = arith.constant 0 : index
    %c64_66 = arith.constant 64 : index
    %392 = vector.load %arg13[%c1_64, %c0_65, %c64_66] : memref<8x8x128xbf16, #tpu.memory_space<vmem>>, vector<1x8x64xbf16>
    %393 = vector.shape_cast %392 : vector<1x8x64xbf16> to vector<8x64xbf16>
    %394 = vector.extract_strided_slice %386 {offsets = [0, 64], sizes = [8, 64], strides = [1, 1]} : vector<8x128xf32> to vector<8x64xf32>
    %395 = arith.extf %393 : vector<8x64xbf16> to vector<8x64xf32>
    %396 = arith.addf %395, %394 : vector<8x64xf32>
    %397 = vector.extract_strided_slice %391 {offsets = [0, 0], sizes = [8, 48], strides = [1, 1]} : vector<8x64xf32> to vector<8x48xf32>
    %398 = arith.negf %397 : vector<8x48xf32>
    %399 = math.exp %398 : vector<8x48xf32>
    %cst_67 = arith.constant 1.000000e+00 : f32
    %400 = vector.broadcast %cst_67 : f32 to vector<8x48xf32>
    %401 = arith.addf %400, %399 : vector<8x48xf32>
    %402 = arith.divf %400, %401 : vector<8x48xf32>
    %403 = vector.extract_strided_slice %391 {offsets = [0, 48], sizes = [8, 16], strides = [1, 1]} : vector<8x64xf32> to vector<8x16xf32>
    %404 = math.tanh %403 : vector<8x16xf32>
    %405 = vector.extract_strided_slice %402 {offsets = [0, 16], sizes = [8, 16], strides = [1, 1]} : vector<8x48xf32> to vector<8x16xf32>
    %406 = arith.mulf %405, %377 : vector<8x16xf32>
    %407 = vector.extract_strided_slice %402 {offsets = [0, 0], sizes = [8, 16], strides = [1, 1]} : vector<8x48xf32> to vector<8x16xf32>
    %408 = arith.mulf %407, %404 : vector<8x16xf32>
    %409 = arith.addf %406, %408 : vector<8x16xf32>
    %410 = vector.extract_strided_slice %402 {offsets = [0, 32], sizes = [8, 16], strides = [1, 1]} : vector<8x48xf32> to vector<8x16xf32>
    %411 = math.tanh %409 : vector<8x16xf32>
    %412 = arith.mulf %410, %411 : vector<8x16xf32>
    %413 = vector.extract_strided_slice %396 {offsets = [0, 0], sizes = [8, 48], strides = [1, 1]} : vector<8x64xf32> to vector<8x48xf32>
    %414 = arith.negf %413 : vector<8x48xf32>
    %415 = math.exp %414 : vector<8x48xf32>
    %cst_68 = arith.constant 1.000000e+00 : f32
    %416 = vector.broadcast %cst_68 : f32 to vector<8x48xf32>
    %417 = arith.addf %416, %415 : vector<8x48xf32>
    %418 = arith.divf %416, %417 : vector<8x48xf32>
    %419 = vector.extract_strided_slice %396 {offsets = [0, 48], sizes = [8, 16], strides = [1, 1]} : vector<8x64xf32> to vector<8x16xf32>
    %420 = math.tanh %419 : vector<8x16xf32>
    %421 = vector.extract_strided_slice %418 {offsets = [0, 16], sizes = [8, 16], strides = [1, 1]} : vector<8x48xf32> to vector<8x16xf32>
    %422 = arith.mulf %421, %383 : vector<8x16xf32>
    %423 = vector.extract_strided_slice %418 {offsets = [0, 0], sizes = [8, 16], strides = [1, 1]} : vector<8x48xf32> to vector<8x16xf32>
    %424 = arith.mulf %423, %420 : vector<8x16xf32>
    %425 = arith.addf %422, %424 : vector<8x16xf32>
    %426 = vector.extract_strided_slice %418 {offsets = [0, 32], sizes = [8, 16], strides = [1, 1]} : vector<8x48xf32> to vector<8x16xf32>
    %427 = math.tanh %425 : vector<8x16xf32>
    %428 = arith.mulf %426, %427 : vector<8x16xf32>
    %429 = vector.extract_strided_slice %4 {offsets = [6, 0, 0], sizes = [1, 8, 1], strides = [1, 1, 1]} : vector<8x8x1xi1> to vector<1x8x1xi1>
    %430 = vector.shape_cast %429 : vector<1x8x1xi1> to vector<8x1xi1>
    %431 = vector.extract_strided_slice %4 {offsets = [1, 0, 0], sizes = [1, 8, 1], strides = [1, 1, 1]} : vector<8x8x1xi1> to vector<1x8x1xi1>
    %432 = vector.shape_cast %431 : vector<1x8x1xi1> to vector<8x1xi1>
    %433 = vector.shape_cast %430 : vector<8x1xi1> to vector<8x1xi1>
    %434 = vector.broadcast %433 : vector<8x1xi1> to vector<8x16xi1>
    %435 = arith.select %434, %412, %374 : vector<8x16xi1>, vector<8x16xf32>
    %436 = vector.shape_cast %430 : vector<8x1xi1> to vector<8x1xi1>
    %437 = vector.broadcast %436 : vector<8x1xi1> to vector<8x16xi1>
    %438 = arith.select %437, %409, %377 : vector<8x16xi1>, vector<8x16xf32>
    %439 = vector.shape_cast %432 : vector<8x1xi1> to vector<8x1xi1>
    %440 = vector.broadcast %439 : vector<8x1xi1> to vector<8x16xi1>
    %441 = arith.select %440, %428, %380 : vector<8x16xi1>, vector<8x16xf32>
    %442 = vector.shape_cast %432 : vector<8x1xi1> to vector<8x1xi1>
    %443 = vector.broadcast %442 : vector<8x1xi1> to vector<8x16xi1>
    %444 = arith.select %443, %425, %383 : vector<8x16xi1>, vector<8x16xf32>
    %445 = tpu.concatenate %435, %441 in 1 : vector<8x16xf32>, vector<8x16xf32> -> vector<8x32xf32>
    %446 = arith.truncf %445 : vector<8x32xf32> to vector<8x32xbf16>
    %cst_69 = arith.constant dense<0.000000e+00> : vector<8x128xf32>
    %447 = tpu.matmul %446, %16, %cst_69 {dimension_numbers = #tpu.dot_dimension_numbers<[1], [0], [0], [1], [0, 0, 1, 1], [], []>} : vector<8x32xbf16>, vector<32x128xbf16>, vector<8x128xf32> -> vector<8x128xf32>
    %c7_70 = arith.constant 7 : index
    %c0_71 = arith.constant 0 : index
    %c0_72 = arith.constant 0 : index
    %448 = vector.load %arg13[%c7_70, %c0_71, %c0_72] : memref<8x8x128xbf16, #tpu.memory_space<vmem>>, vector<1x8x64xbf16>
    %449 = vector.shape_cast %448 : vector<1x8x64xbf16> to vector<8x64xbf16>
    %450 = vector.extract_strided_slice %447 {offsets = [0, 0], sizes = [8, 64], strides = [1, 1]} : vector<8x128xf32> to vector<8x64xf32>
    %451 = arith.extf %449 : vector<8x64xbf16> to vector<8x64xf32>
    %452 = arith.addf %451, %450 : vector<8x64xf32>
    %c0_73 = arith.constant 0 : index
    %c0_74 = arith.constant 0 : index
    %c64_75 = arith.constant 64 : index
    %453 = vector.load %arg13[%c0_73, %c0_74, %c64_75] : memref<8x8x128xbf16, #tpu.memory_space<vmem>>, vector<1x8x64xbf16>
    %454 = vector.shape_cast %453 : vector<1x8x64xbf16> to vector<8x64xbf16>
    %455 = vector.extract_strided_slice %447 {offsets = [0, 64], sizes = [8, 64], strides = [1, 1]} : vector<8x128xf32> to vector<8x64xf32>
    %456 = arith.extf %454 : vector<8x64xbf16> to vector<8x64xf32>
    %457 = arith.addf %456, %455 : vector<8x64xf32>
    %458 = vector.extract_strided_slice %452 {offsets = [0, 0], sizes = [8, 48], strides = [1, 1]} : vector<8x64xf32> to vector<8x48xf32>
    %459 = arith.negf %458 : vector<8x48xf32>
    %460 = math.exp %459 : vector<8x48xf32>
    %cst_76 = arith.constant 1.000000e+00 : f32
    %461 = vector.broadcast %cst_76 : f32 to vector<8x48xf32>
    %462 = arith.addf %461, %460 : vector<8x48xf32>
    %463 = arith.divf %461, %462 : vector<8x48xf32>
    %464 = vector.extract_strided_slice %452 {offsets = [0, 48], sizes = [8, 16], strides = [1, 1]} : vector<8x64xf32> to vector<8x16xf32>
    %465 = math.tanh %464 : vector<8x16xf32>
    %466 = vector.extract_strided_slice %463 {offsets = [0, 16], sizes = [8, 16], strides = [1, 1]} : vector<8x48xf32> to vector<8x16xf32>
    %467 = arith.mulf %466, %438 : vector<8x16xf32>
    %468 = vector.extract_strided_slice %463 {offsets = [0, 0], sizes = [8, 16], strides = [1, 1]} : vector<8x48xf32> to vector<8x16xf32>
    %469 = arith.mulf %468, %465 : vector<8x16xf32>
    %470 = arith.addf %467, %469 : vector<8x16xf32>
    %471 = vector.extract_strided_slice %463 {offsets = [0, 32], sizes = [8, 16], strides = [1, 1]} : vector<8x48xf32> to vector<8x16xf32>
    %472 = math.tanh %470 : vector<8x16xf32>
    %473 = arith.mulf %471, %472 : vector<8x16xf32>
    %474 = vector.extract_strided_slice %457 {offsets = [0, 0], sizes = [8, 48], strides = [1, 1]} : vector<8x64xf32> to vector<8x48xf32>
    %475 = arith.negf %474 : vector<8x48xf32>
    %476 = math.exp %475 : vector<8x48xf32>
    %cst_77 = arith.constant 1.000000e+00 : f32
    %477 = vector.broadcast %cst_77 : f32 to vector<8x48xf32>
    %478 = arith.addf %477, %476 : vector<8x48xf32>
    %479 = arith.divf %477, %478 : vector<8x48xf32>
    %480 = vector.extract_strided_slice %457 {offsets = [0, 48], sizes = [8, 16], strides = [1, 1]} : vector<8x64xf32> to vector<8x16xf32>
    %481 = math.tanh %480 : vector<8x16xf32>
    %482 = vector.extract_strided_slice %479 {offsets = [0, 16], sizes = [8, 16], strides = [1, 1]} : vector<8x48xf32> to vector<8x16xf32>
    %483 = arith.mulf %482, %444 : vector<8x16xf32>
    %484 = vector.extract_strided_slice %479 {offsets = [0, 0], sizes = [8, 16], strides = [1, 1]} : vector<8x48xf32> to vector<8x16xf32>
    %485 = arith.mulf %484, %481 : vector<8x16xf32>
    %486 = arith.addf %483, %485 : vector<8x16xf32>
    %487 = vector.extract_strided_slice %479 {offsets = [0, 32], sizes = [8, 16], strides = [1, 1]} : vector<8x48xf32> to vector<8x16xf32>
    %488 = math.tanh %486 : vector<8x16xf32>
    %489 = arith.mulf %487, %488 : vector<8x16xf32>
    %490 = vector.extract_strided_slice %4 {offsets = [7, 0, 0], sizes = [1, 8, 1], strides = [1, 1, 1]} : vector<8x8x1xi1> to vector<1x8x1xi1>
    %491 = vector.shape_cast %490 : vector<1x8x1xi1> to vector<8x1xi1>
    %492 = vector.extract_strided_slice %4 {offsets = [0, 0, 0], sizes = [1, 8, 1], strides = [1, 1, 1]} : vector<8x8x1xi1> to vector<1x8x1xi1>
    %493 = vector.shape_cast %492 : vector<1x8x1xi1> to vector<8x1xi1>
    %494 = vector.shape_cast %491 : vector<8x1xi1> to vector<8x1xi1>
    %495 = vector.broadcast %494 : vector<8x1xi1> to vector<8x16xi1>
    %496 = arith.select %495, %473, %435 : vector<8x16xi1>, vector<8x16xf32>
    %497 = vector.shape_cast %493 : vector<8x1xi1> to vector<8x1xi1>
    %498 = vector.broadcast %497 : vector<8x1xi1> to vector<8x16xi1>
    %499 = arith.select %498, %489, %441 : vector<8x16xi1>, vector<8x16xf32>
    %500 = vector.shape_cast %69 : vector<8x16xf32> to vector<1x8x16xf32>
    %501 = vector.shape_cast %130 : vector<8x16xf32> to vector<1x8x16xf32>
    %502 = vector.shape_cast %191 : vector<8x16xf32> to vector<1x8x16xf32>
    %503 = vector.shape_cast %252 : vector<8x16xf32> to vector<1x8x16xf32>
    %504 = vector.shape_cast %313 : vector<8x16xf32> to vector<1x8x16xf32>
    %505 = vector.shape_cast %374 : vector<8x16xf32> to vector<1x8x16xf32>
    %506 = vector.shape_cast %435 : vector<8x16xf32> to vector<1x8x16xf32>
    %507 = vector.shape_cast %496 : vector<8x16xf32> to vector<1x8x16xf32>
    %508 = tpu.concatenate %500, %501, %502, %503, %504, %505, %506, %507 in 0 : vector<1x8x16xf32>, vector<1x8x16xf32>, vector<1x8x16xf32>, vector<1x8x16xf32>, vector<1x8x16xf32>, vector<1x8x16xf32>, vector<1x8x16xf32>, vector<1x8x16xf32> -> vector<8x8x16xf32>
    %509 = vector.shape_cast %499 : vector<8x16xf32> to vector<1x8x16xf32>
    %510 = vector.shape_cast %441 : vector<8x16xf32> to vector<1x8x16xf32>
    %511 = vector.shape_cast %380 : vector<8x16xf32> to vector<1x8x16xf32>
    %512 = vector.shape_cast %319 : vector<8x16xf32> to vector<1x8x16xf32>
    %513 = vector.shape_cast %258 : vector<8x16xf32> to vector<1x8x16xf32>
    %514 = vector.shape_cast %197 : vector<8x16xf32> to vector<1x8x16xf32>
    %515 = vector.shape_cast %136 : vector<8x16xf32> to vector<1x8x16xf32>
    %516 = vector.shape_cast %75 : vector<8x16xf32> to vector<1x8x16xf32>
    %517 = tpu.concatenate %509, %510, %511, %512, %513, %514, %515, %516 in 0 : vector<1x8x16xf32>, vector<1x8x16xf32>, vector<1x8x16xf32>, vector<1x8x16xf32>, vector<1x8x16xf32>, vector<1x8x16xf32>, vector<1x8x16xf32>, vector<1x8x16xf32> -> vector<8x8x16xf32>
    %518 = tpu.concatenate %508, %517 in 2 : vector<8x8x16xf32>, vector<8x8x16xf32> -> vector<8x8x32xf32>
    %519 = vector.shape_cast %518 : vector<8x8x32xf32> to vector<64x32xf32>
    %520 = arith.truncf %519 : vector<64x32xf32> to vector<64x32xbf16>
    %c0_78 = arith.constant 0 : index
    %c0_79 = arith.constant 0 : index
    %521 = vector.load %arg7[%c0_78, %c0_79] : memref<32x128xbf16, #tpu.memory_space<vmem>>, vector<32x128xbf16>
    %cst_80 = arith.constant dense<0.000000e+00> : vector<64x128xf32>
    %522 = tpu.matmul %520, %521, %cst_80 {dimension_numbers = #tpu.dot_dimension_numbers<[1], [0], [0], [1], [0, 0, 1, 1], [], []>} : vector<64x32xbf16>, vector<32x128xbf16>, vector<64x128xf32> -> vector<64x128xf32>
    %c0_81 = arith.constant 0 : index
    %c0_82 = arith.constant 0 : index
    %523 = vector.load %arg8[%c0_81, %c0_82] : memref<1x128xf32, #tpu.memory_space<vmem>>, vector<1x128xf32>
    %524 = vector.broadcast %523 : vector<1x128xf32> to vector<64x128xf32>
    %525 = arith.addf %522, %524 : vector<64x128xf32>
    %526 = vector.shape_cast %525 : vector<64x128xf32> to vector<8x8x128xf32>
    %527 = arith.truncf %526 : vector<8x8x128xf32> to vector<8x8x128xbf16>
    %c0_83 = arith.constant 0 : index
    %c0_84 = arith.constant 0 : index
    %c0_85 = arith.constant 0 : index
    %528 = vector.load %arg13[%c0_83, %c0_84, %c0_85] : memref<8x8x128xbf16, #tpu.memory_space<vmem>>, vector<8x8x128xbf16>
    tpu.vector_store %arg13[%c0_83, %c0_84, %c0_85], %527 {strides = array<i32>} : memref<8x8x128xbf16, #tpu.memory_space<vmem>>, vector<8x8x128xbf16>,
    %c0_86 = arith.constant 0 : index
    %c0_87 = arith.constant 0 : index
    %529 = vector.load %arg9[%c0_86, %c0_87] : memref<32x128xbf16, #tpu.memory_space<vmem>>, vector<32x128xbf16>
    %cst_88 = arith.constant 0.000000e+00 : f32
    %530 = vector.broadcast %cst_88 : f32 to vector<8x16xf32>
    %531 = tpu.concatenate %530, %530 in 1 : vector<8x16xf32>, vector<8x16xf32> -> vector<8x32xf32>
    %532 = arith.truncf %531 : vector<8x32xf32> to vector<8x32xbf16>
    %cst_89 = arith.constant dense<0.000000e+00> : vector<8x128xf32>
    %533 = tpu.matmul %532, %529, %cst_89 {dimension_numbers = #tpu.dot_dimension_numbers<[1], [0], [0], [1], [0, 0, 1, 1], [], []>} : vector<8x32xbf16>, vector<32x128xbf16>, vector<8x128xf32> -> vector<8x128xf32>
    %c0_90 = arith.constant 0 : index
    %c0_91 = arith.constant 0 : index
    %c0_92 = arith.constant 0 : index
    %534 = vector.load %arg13[%c0_90, %c0_91, %c0_92] : memref<8x8x128xbf16, #tpu.memory_space<vmem>>, vector<1x8x64xbf16>
    %535 = vector.shape_cast %534 : vector<1x8x64xbf16> to vector<8x64xbf16>
    %536 = vector.extract_strided_slice %533 {offsets = [0, 0], sizes = [8, 64], strides = [1, 1]} : vector<8x128xf32> to vector<8x64xf32>
    %537 = arith.extf %535 : vector<8x64xbf16> to vector<8x64xf32>
    %538 = arith.addf %537, %536 : vector<8x64xf32>
    %c7_93 = arith.constant 7 : index
    %c0_94 = arith.constant 0 : index
    %c64_95 = arith.constant 64 : index
    %539 = vector.load %arg13[%c7_93, %c0_94, %c64_95] : memref<8x8x128xbf16, #tpu.memory_space<vmem>>, vector<1x8x64xbf16>
    %540 = vector.shape_cast %539 : vector<1x8x64xbf16> to vector<8x64xbf16>
    %541 = vector.extract_strided_slice %533 {offsets = [0, 64], sizes = [8, 64], strides = [1, 1]} : vector<8x128xf32> to vector<8x64xf32>
    %542 = arith.extf %540 : vector<8x64xbf16> to vector<8x64xf32>
    %543 = arith.addf %542, %541 : vector<8x64xf32>
    %544 = vector.extract_strided_slice %538 {offsets = [0, 0], sizes = [8, 48], strides = [1, 1]} : vector<8x64xf32> to vector<8x48xf32>
    %545 = arith.negf %544 : vector<8x48xf32>
    %546 = math.exp %545 : vector<8x48xf32>
    %cst_96 = arith.constant 1.000000e+00 : f32
    %547 = vector.broadcast %cst_96 : f32 to vector<8x48xf32>
    %548 = arith.addf %547, %546 : vector<8x48xf32>
    %549 = arith.divf %547, %548 : vector<8x48xf32>
    %550 = vector.extract_strided_slice %538 {offsets = [0, 48], sizes = [8, 16], strides = [1, 1]} : vector<8x64xf32> to vector<8x16xf32>
    %551 = math.tanh %550 : vector<8x16xf32>
    %552 = vector.extract_strided_slice %549 {offsets = [0, 16], sizes = [8, 16], strides = [1, 1]} : vector<8x48xf32> to vector<8x16xf32>
    %553 = arith.mulf %552, %530 : vector<8x16xf32>
    %554 = vector.extract_strided_slice %549 {offsets = [0, 0], sizes = [8, 16], strides = [1, 1]} : vector<8x48xf32> to vector<8x16xf32>
    %555 = arith.mulf %554, %551 : vector<8x16xf32>
    %556 = arith.addf %553, %555 : vector<8x16xf32>
    %557 = vector.extract_strided_slice %549 {offsets = [0, 32], sizes = [8, 16], strides = [1, 1]} : vector<8x48xf32> to vector<8x16xf32>
    %558 = math.tanh %556 : vector<8x16xf32>
    %559 = arith.mulf %557, %558 : vector<8x16xf32>
    %560 = vector.extract_strided_slice %543 {offsets = [0, 0], sizes = [8, 48], strides = [1, 1]} : vector<8x64xf32> to vector<8x48xf32>
    %561 = arith.negf %560 : vector<8x48xf32>
    %562 = math.exp %561 : vector<8x48xf32>
    %cst_97 = arith.constant 1.000000e+00 : f32
    %563 = vector.broadcast %cst_97 : f32 to vector<8x48xf32>
    %564 = arith.addf %563, %562 : vector<8x48xf32>
    %565 = arith.divf %563, %564 : vector<8x48xf32>
    %566 = vector.extract_strided_slice %543 {offsets = [0, 48], sizes = [8, 16], strides = [1, 1]} : vector<8x64xf32> to vector<8x16xf32>
    %567 = math.tanh %566 : vector<8x16xf32>
    %568 = vector.extract_strided_slice %565 {offsets = [0, 16], sizes = [8, 16], strides = [1, 1]} : vector<8x48xf32> to vector<8x16xf32>
    %569 = arith.mulf %568, %530 : vector<8x16xf32>
    %570 = vector.extract_strided_slice %565 {offsets = [0, 0], sizes = [8, 16], strides = [1, 1]} : vector<8x48xf32> to vector<8x16xf32>
    %571 = arith.mulf %570, %567 : vector<8x16xf32>
    %572 = arith.addf %569, %571 : vector<8x16xf32>
    %573 = vector.extract_strided_slice %565 {offsets = [0, 32], sizes = [8, 16], strides = [1, 1]} : vector<8x48xf32> to vector<8x16xf32>
    %574 = math.tanh %572 : vector<8x16xf32>
    %575 = arith.mulf %573, %574 : vector<8x16xf32>
    %576 = vector.extract_strided_slice %4 {offsets = [0, 0, 0], sizes = [1, 8, 1], strides = [1, 1, 1]} : vector<8x8x1xi1> to vector<1x8x1xi1>
    %577 = vector.shape_cast %576 : vector<1x8x1xi1> to vector<8x1xi1>
    %578 = vector.extract_strided_slice %4 {offsets = [7, 0, 0], sizes = [1, 8, 1], strides = [1, 1, 1]} : vector<8x8x1xi1> to vector<1x8x1xi1>
    %579 = vector.shape_cast %578 : vector<1x8x1xi1> to vector<8x1xi1>
    %580 = vector.shape_cast %577 : vector<8x1xi1> to vector<8x1xi1>
    %581 = vector.broadcast %580 : vector<8x1xi1> to vector<8x16xi1>
    %582 = arith.select %581, %559, %530 : vector<8x16xi1>, vector<8x16xf32>
    %583 = vector.shape_cast %577 : vector<8x1xi1> to vector<8x1xi1>
    %584 = vector.broadcast %583 : vector<8x1xi1> to vector<8x16xi1>
    %585 = arith.select %584, %556, %530 : vector<8x16xi1>, vector<8x16xf32>
    %586 = vector.shape_cast %579 : vector<8x1xi1> to vector<8x1xi1>
    %587 = vector.broadcast %586 : vector<8x1xi1> to vector<8x16xi1>
    %588 = arith.select %587, %575, %530 : vector<8x16xi1>, vector<8x16xf32>
    %589 = vector.shape_cast %579 : vector<8x1xi1> to vector<8x1xi1>
    %590 = vector.broadcast %589 : vector<8x1xi1> to vector<8x16xi1>
    %591 = arith.select %590, %572, %530 : vector<8x16xi1>, vector<8x16xf32>
    %592 = tpu.concatenate %582, %588 in 1 : vector<8x16xf32>, vector<8x16xf32> -> vector<8x32xf32>
    %593 = arith.truncf %592 : vector<8x32xf32> to vector<8x32xbf16>
    %cst_98 = arith.constant dense<0.000000e+00> : vector<8x128xf32>
    %594 = tpu.matmul %593, %529, %cst_98 {dimension_numbers = #tpu.dot_dimension_numbers<[1], [0], [0], [1], [0, 0, 1, 1], [], []>} : vector<8x32xbf16>, vector<32x128xbf16>, vector<8x128xf32> -> vector<8x128xf32>
    %c1_99 = arith.constant 1 : index
    %c0_100 = arith.constant 0 : index
    %c0_101 = arith.constant 0 : index
    %595 = vector.load %arg13[%c1_99, %c0_100, %c0_101] : memref<8x8x128xbf16, #tpu.memory_space<vmem>>, vector<1x8x64xbf16>
    %596 = vector.shape_cast %595 : vector<1x8x64xbf16> to vector<8x64xbf16>
    %597 = vector.extract_strided_slice %594 {offsets = [0, 0], sizes = [8, 64], strides = [1, 1]} : vector<8x128xf32> to vector<8x64xf32>
    %598 = arith.extf %596 : vector<8x64xbf16> to vector<8x64xf32>
    %599 = arith.addf %598, %597 : vector<8x64xf32>
    %c6_102 = arith.constant 6 : index
    %c0_103 = arith.constant 0 : index
    %c64_104 = arith.constant 64 : index
    %600 = vector.load %arg13[%c6_102, %c0_103, %c64_104] : memref<8x8x128xbf16, #tpu.memory_space<vmem>>, vector<1x8x64xbf16>
    %601 = vector.shape_cast %600 : vector<1x8x64xbf16> to vector<8x64xbf16>
    %602 = vector.extract_strided_slice %594 {offsets = [0, 64], sizes = [8, 64], strides = [1, 1]} : vector<8x128xf32> to vector<8x64xf32>
    %603 = arith.extf %601 : vector<8x64xbf16> to vector<8x64xf32>
    %604 = arith.addf %603, %602 : vector<8x64xf32>
    %605 = vector.extract_strided_slice %599 {offsets = [0, 0], sizes = [8, 48], strides = [1, 1]} : vector<8x64xf32> to vector<8x48xf32>
    %606 = arith.negf %605 : vector<8x48xf32>
    %607 = math.exp %606 : vector<8x48xf32>
    %cst_105 = arith.constant 1.000000e+00 : f32
    %608 = vector.broadcast %cst_105 : f32 to vector<8x48xf32>
    %609 = arith.addf %608, %607 : vector<8x48xf32>
    %610 = arith.divf %608, %609 : vector<8x48xf32>
    %611 = vector.extract_strided_slice %599 {offsets = [0, 48], sizes = [8, 16], strides = [1, 1]} : vector<8x64xf32> to vector<8x16xf32>
    %612 = math.tanh %611 : vector<8x16xf32>
    %613 = vector.extract_strided_slice %610 {offsets = [0, 16], sizes = [8, 16], strides = [1, 1]} : vector<8x48xf32> to vector<8x16xf32>
    %614 = arith.mulf %613, %585 : vector<8x16xf32>
    %615 = vector.extract_strided_slice %610 {offsets = [0, 0], sizes = [8, 16], strides = [1, 1]} : vector<8x48xf32> to vector<8x16xf32>
    %616 = arith.mulf %615, %612 : vector<8x16xf32>
    %617 = arith.addf %614, %616 : vector<8x16xf32>
    %618 = vector.extract_strided_slice %610 {offsets = [0, 32], sizes = [8, 16], strides = [1, 1]} : vector<8x48xf32> to vector<8x16xf32>
    %619 = math.tanh %617 : vector<8x16xf32>
    %620 = arith.mulf %618, %619 : vector<8x16xf32>
    %621 = vector.extract_strided_slice %604 {offsets = [0, 0], sizes = [8, 48], strides = [1, 1]} : vector<8x64xf32> to vector<8x48xf32>
    %622 = arith.negf %621 : vector<8x48xf32>
    %623 = math.exp %622 : vector<8x48xf32>
    %cst_106 = arith.constant 1.000000e+00 : f32
    %624 = vector.broadcast %cst_106 : f32 to vector<8x48xf32>
    %625 = arith.addf %624, %623 : vector<8x48xf32>
    %626 = arith.divf %624, %625 : vector<8x48xf32>
    %627 = vector.extract_strided_slice %604 {offsets = [0, 48], sizes = [8, 16], strides = [1, 1]} : vector<8x64xf32> to vector<8x16xf32>
    %628 = math.tanh %627 : vector<8x16xf32>
    %629 = vector.extract_strided_slice %626 {offsets = [0, 16], sizes = [8, 16], strides = [1, 1]} : vector<8x48xf32> to vector<8x16xf32>
    %630 = arith.mulf %629, %591 : vector<8x16xf32>
    %631 = vector.extract_strided_slice %626 {offsets = [0, 0], sizes = [8, 16], strides = [1, 1]} : vector<8x48xf32> to vector<8x16xf32>
    %632 = arith.mulf %631, %628 : vector<8x16xf32>
    %633 = arith.addf %630, %632 : vector<8x16xf32>
    %634 = vector.extract_strided_slice %626 {offsets = [0, 32], sizes = [8, 16], strides = [1, 1]} : vector<8x48xf32> to vector<8x16xf32>
    %635 = math.tanh %633 : vector<8x16xf32>
    %636 = arith.mulf %634, %635 : vector<8x16xf32>
    %637 = vector.extract_strided_slice %4 {offsets = [1, 0, 0], sizes = [1, 8, 1], strides = [1, 1, 1]} : vector<8x8x1xi1> to vector<1x8x1xi1>
    %638 = vector.shape_cast %637 : vector<1x8x1xi1> to vector<8x1xi1>
    %639 = vector.extract_strided_slice %4 {offsets = [6, 0, 0], sizes = [1, 8, 1], strides = [1, 1, 1]} : vector<8x8x1xi1> to vector<1x8x1xi1>
    %640 = vector.shape_cast %639 : vector<1x8x1xi1> to vector<8x1xi1>
    %641 = vector.shape_cast %638 : vector<8x1xi1> to vector<8x1xi1>
    %642 = vector.broadcast %641 : vector<8x1xi1> to vector<8x16xi1>
    %643 = arith.select %642, %620, %582 : vector<8x16xi1>, vector<8x16xf32>
    %644 = vector.shape_cast %638 : vector<8x1xi1> to vector<8x1xi1>
    %645 = vector.broadcast %644 : vector<8x1xi1> to vector<8x16xi1>
    %646 = arith.select %645, %617, %585 : vector<8x16xi1>, vector<8x16xf32>
    %647 = vector.shape_cast %640 : vector<8x1xi1> to vector<8x1xi1>
    %648 = vector.broadcast %647 : vector<8x1xi1> to vector<8x16xi1>
    %649 = arith.select %648, %636, %588 : vector<8x16xi1>, vector<8x16xf32>
    %650 = vector.shape_cast %640 : vector<8x1xi1> to vector<8x1xi1>
    %651 = vector.broadcast %650 : vector<8x1xi1> to vector<8x16xi1>
    %652 = arith.select %651, %633, %591 : vector<8x16xi1>, vector<8x16xf32>
    %653 = tpu.concatenate %643, %649 in 1 : vector<8x16xf32>, vector<8x16xf32> -> vector<8x32xf32>
    %654 = arith.truncf %653 : vector<8x32xf32> to vector<8x32xbf16>
    %cst_107 = arith.constant dense<0.000000e+00> : vector<8x128xf32>
    %655 = tpu.matmul %654, %529, %cst_107 {dimension_numbers = #tpu.dot_dimension_numbers<[1], [0], [0], [1], [0, 0, 1, 1], [], []>} : vector<8x32xbf16>, vector<32x128xbf16>, vector<8x128xf32> -> vector<8x128xf32>
    %c2_108 = arith.constant 2 : index
    %c0_109 = arith.constant 0 : index
    %c0_110 = arith.constant 0 : index
    %656 = vector.load %arg13[%c2_108, %c0_109, %c0_110] : memref<8x8x128xbf16, #tpu.memory_space<vmem>>, vector<1x8x64xbf16>
    %657 = vector.shape_cast %656 : vector<1x8x64xbf16> to vector<8x64xbf16>
    %658 = vector.extract_strided_slice %655 {offsets = [0, 0], sizes = [8, 64], strides = [1, 1]} : vector<8x128xf32> to vector<8x64xf32>
    %659 = arith.extf %657 : vector<8x64xbf16> to vector<8x64xf32>
    %660 = arith.addf %659, %658 : vector<8x64xf32>
    %c5_111 = arith.constant 5 : index
    %c0_112 = arith.constant 0 : index
    %c64_113 = arith.constant 64 : index
    %661 = vector.load %arg13[%c5_111, %c0_112, %c64_113] : memref<8x8x128xbf16, #tpu.memory_space<vmem>>, vector<1x8x64xbf16>
    %662 = vector.shape_cast %661 : vector<1x8x64xbf16> to vector<8x64xbf16>
    %663 = vector.extract_strided_slice %655 {offsets = [0, 64], sizes = [8, 64], strides = [1, 1]} : vector<8x128xf32> to vector<8x64xf32>
    %664 = arith.extf %662 : vector<8x64xbf16> to vector<8x64xf32>
    %665 = arith.addf %664, %663 : vector<8x64xf32>
    %666 = vector.extract_strided_slice %660 {offsets = [0, 0], sizes = [8, 48], strides = [1, 1]} : vector<8x64xf32> to vector<8x48xf32>
    %667 = arith.negf %666 : vector<8x48xf32>
    %668 = math.exp %667 : vector<8x48xf32>
    %cst_114 = arith.constant 1.000000e+00 : f32
    %669 = vector.broadcast %cst_114 : f32 to vector<8x48xf32>
    %670 = arith.addf %669, %668 : vector<8x48xf32>
    %671 = arith.divf %669, %670 : vector<8x48xf32>
    %672 = vector.extract_strided_slice %660 {offsets = [0, 48], sizes = [8, 16], strides = [1, 1]} : vector<8x64xf32> to vector<8x16xf32>
    %673 = math.tanh %672 : vector<8x16xf32>
    %674 = vector.extract_strided_slice %671 {offsets = [0, 16], sizes = [8, 16], strides = [1, 1]} : vector<8x48xf32> to vector<8x16xf32>
    %675 = arith.mulf %674, %646 : vector<8x16xf32>
    %676 = vector.extract_strided_slice %671 {offsets = [0, 0], sizes = [8, 16], strides = [1, 1]} : vector<8x48xf32> to vector<8x16xf32>
    %677 = arith.mulf %676, %673 : vector<8x16xf32>
    %678 = arith.addf %675, %677 : vector<8x16xf32>
    %679 = vector.extract_strided_slice %671 {offsets = [0, 32], sizes = [8, 16], strides = [1, 1]} : vector<8x48xf32> to vector<8x16xf32>
    %680 = math.tanh %678 : vector<8x16xf32>
    %681 = arith.mulf %679, %680 : vector<8x16xf32>
    %682 = vector.extract_strided_slice %665 {offsets = [0, 0], sizes = [8, 48], strides = [1, 1]} : vector<8x64xf32> to vector<8x48xf32>
    %683 = arith.negf %682 : vector<8x48xf32>
    %684 = math.exp %683 : vector<8x48xf32>
    %cst_115 = arith.constant 1.000000e+00 : f32
    %685 = vector.broadcast %cst_115 : f32 to vector<8x48xf32>
    %686 = arith.addf %685, %684 : vector<8x48xf32>
    %687 = arith.divf %685, %686 : vector<8x48xf32>
    %688 = vector.extract_strided_slice %665 {offsets = [0, 48], sizes = [8, 16], strides = [1, 1]} : vector<8x64xf32> to vector<8x16xf32>
    %689 = math.tanh %688 : vector<8x16xf32>
    %690 = vector.extract_strided_slice %687 {offsets = [0, 16], sizes = [8, 16], strides = [1, 1]} : vector<8x48xf32> to vector<8x16xf32>
    %691 = arith.mulf %690, %652 : vector<8x16xf32>
    %692 = vector.extract_strided_slice %687 {offsets = [0, 0], sizes = [8, 16], strides = [1, 1]} : vector<8x48xf32> to vector<8x16xf32>
    %693 = arith.mulf %692, %689 : vector<8x16xf32>
    %694 = arith.addf %691, %693 : vector<8x16xf32>
    %695 = vector.extract_strided_slice %687 {offsets = [0, 32], sizes = [8, 16], strides = [1, 1]} : vector<8x48xf32> to vector<8x16xf32>
    %696 = math.tanh %694 : vector<8x16xf32>
    %697 = arith.mulf %695, %696 : vector<8x16xf32>
    %698 = vector.extract_strided_slice %4 {offsets = [2, 0, 0], sizes = [1, 8, 1], strides = [1, 1, 1]} : vector<8x8x1xi1> to vector<1x8x1xi1>
    %699 = vector.shape_cast %698 : vector<1x8x1xi1> to vector<8x1xi1>
    %700 = vector.extract_strided_slice %4 {offsets = [5, 0, 0], sizes = [1, 8, 1], strides = [1, 1, 1]} : vector<8x8x1xi1> to vector<1x8x1xi1>
    %701 = vector.shape_cast %700 : vector<1x8x1xi1> to vector<8x1xi1>
    %702 = vector.shape_cast %699 : vector<8x1xi1> to vector<8x1xi1>
    %703 = vector.broadcast %702 : vector<8x1xi1> to vector<8x16xi1>
    %704 = arith.select %703, %681, %643 : vector<8x16xi1>, vector<8x16xf32>
    %705 = vector.shape_cast %699 : vector<8x1xi1> to vector<8x1xi1>
    %706 = vector.broadcast %705 : vector<8x1xi1> to vector<8x16xi1>
    %707 = arith.select %706, %678, %646 : vector<8x16xi1>, vector<8x16xf32>
    %708 = vector.shape_cast %701 : vector<8x1xi1> to vector<8x1xi1>
    %709 = vector.broadcast %708 : vector<8x1xi1> to vector<8x16xi1>
    %710 = arith.select %709, %697, %649 : vector<8x16xi1>, vector<8x16xf32>
    %711 = vector.shape_cast %701 : vector<8x1xi1> to vector<8x1xi1>
    %712 = vector.broadcast %711 : vector<8x1xi1> to vector<8x16xi1>
    %713 = arith.select %712, %694, %652 : vector<8x16xi1>, vector<8x16xf32>
    %714 = tpu.concatenate %704, %710 in 1 : vector<8x16xf32>, vector<8x16xf32> -> vector<8x32xf32>
    %715 = arith.truncf %714 : vector<8x32xf32> to vector<8x32xbf16>
    %cst_116 = arith.constant dense<0.000000e+00> : vector<8x128xf32>
    %716 = tpu.matmul %715, %529, %cst_116 {dimension_numbers = #tpu.dot_dimension_numbers<[1], [0], [0], [1], [0, 0, 1, 1], [], []>} : vector<8x32xbf16>, vector<32x128xbf16>, vector<8x128xf32> -> vector<8x128xf32>
    %c3_117 = arith.constant 3 : index
    %c0_118 = arith.constant 0 : index
    %c0_119 = arith.constant 0 : index
    %717 = vector.load %arg13[%c3_117, %c0_118, %c0_119] : memref<8x8x128xbf16, #tpu.memory_space<vmem>>, vector<1x8x64xbf16>
    %718 = vector.shape_cast %717 : vector<1x8x64xbf16> to vector<8x64xbf16>
    %719 = vector.extract_strided_slice %716 {offsets = [0, 0], sizes = [8, 64], strides = [1, 1]} : vector<8x128xf32> to vector<8x64xf32>
    %720 = arith.extf %718 : vector<8x64xbf16> to vector<8x64xf32>
    %721 = arith.addf %720, %719 : vector<8x64xf32>
    %c4_120 = arith.constant 4 : index
    %c0_121 = arith.constant 0 : index
    %c64_122 = arith.constant 64 : index
    %722 = vector.load %arg13[%c4_120, %c0_121, %c64_122] : memref<8x8x128xbf16, #tpu.memory_space<vmem>>, vector<1x8x64xbf16>
    %723 = vector.shape_cast %722 : vector<1x8x64xbf16> to vector<8x64xbf16>
    %724 = vector.extract_strided_slice %716 {offsets = [0, 64], sizes = [8, 64], strides = [1, 1]} : vector<8x128xf32> to vector<8x64xf32>
    %725 = arith.extf %723 : vector<8x64xbf16> to vector<8x64xf32>
    %726 = arith.addf %725, %724 : vector<8x64xf32>
    %727 = vector.extract_strided_slice %721 {offsets = [0, 0], sizes = [8, 48], strides = [1, 1]} : vector<8x64xf32> to vector<8x48xf32>
    %728 = arith.negf %727 : vector<8x48xf32>
    %729 = math.exp %728 : vector<8x48xf32>
    %cst_123 = arith.constant 1.000000e+00 : f32
    %730 = vector.broadcast %cst_123 : f32 to vector<8x48xf32>
    %731 = arith.addf %730, %729 : vector<8x48xf32>
    %732 = arith.divf %730, %731 : vector<8x48xf32>
    %733 = vector.extract_strided_slice %721 {offsets = [0, 48], sizes = [8, 16], strides = [1, 1]} : vector<8x64xf32> to vector<8x16xf32>
    %734 = math.tanh %733 : vector<8x16xf32>
    %735 = vector.extract_strided_slice %732 {offsets = [0, 16], sizes = [8, 16], strides = [1, 1]} : vector<8x48xf32> to vector<8x16xf32>
    %736 = arith.mulf %735, %707 : vector<8x16xf32>
    %737 = vector.extract_strided_slice %732 {offsets = [0, 0], sizes = [8, 16], strides = [1, 1]} : vector<8x48xf32> to vector<8x16xf32>
    %738 = arith.mulf %737, %734 : vector<8x16xf32>
    %739 = arith.addf %736, %738 : vector<8x16xf32>
    %740 = vector.extract_strided_slice %732 {offsets = [0, 32], sizes = [8, 16], strides = [1, 1]} : vector<8x48xf32> to vector<8x16xf32>
    %741 = math.tanh %739 : vector<8x16xf32>
    %742 = arith.mulf %740, %741 : vector<8x16xf32>
    %743 = vector.extract_strided_slice %726 {offsets = [0, 0], sizes = [8, 48], strides = [1, 1]} : vector<8x64xf32> to vector<8x48xf32>
    %744 = arith.negf %743 : vector<8x48xf32>
    %745 = math.exp %744 : vector<8x48xf32>
    %cst_124 = arith.constant 1.000000e+00 : f32
    %746 = vector.broadcast %cst_124 : f32 to vector<8x48xf32>
    %747 = arith.addf %746, %745 : vector<8x48xf32>
    %748 = arith.divf %746, %747 : vector<8x48xf32>
    %749 = vector.extract_strided_slice %726 {offsets = [0, 48], sizes = [8, 16], strides = [1, 1]} : vector<8x64xf32> to vector<8x16xf32>
    %750 = math.tanh %749 : vector<8x16xf32>
    %751 = vector.extract_strided_slice %748 {offsets = [0, 16], sizes = [8, 16], strides = [1, 1]} : vector<8x48xf32> to vector<8x16xf32>
    %752 = arith.mulf %751, %713 : vector<8x16xf32>
    %753 = vector.extract_strided_slice %748 {offsets = [0, 0], sizes = [8, 16], strides = [1, 1]} : vector<8x48xf32> to vector<8x16xf32>
    %754 = arith.mulf %753, %750 : vector<8x16xf32>
    %755 = arith.addf %752, %754 : vector<8x16xf32>
    %756 = vector.extract_strided_slice %748 {offsets = [0, 32], sizes = [8, 16], strides = [1, 1]} : vector<8x48xf32> to vector<8x16xf32>
    %757 = math.tanh %755 : vector<8x16xf32>
    %758 = arith.mulf %756, %757 : vector<8x16xf32>
    %759 = vector.extract_strided_slice %4 {offsets = [3, 0, 0], sizes = [1, 8, 1], strides = [1, 1, 1]} : vector<8x8x1xi1> to vector<1x8x1xi1>
    %760 = vector.shape_cast %759 : vector<1x8x1xi1> to vector<8x1xi1>
    %761 = vector.extract_strided_slice %4 {offsets = [4, 0, 0], sizes = [1, 8, 1], strides = [1, 1, 1]} : vector<8x8x1xi1> to vector<1x8x1xi1>
    %762 = vector.shape_cast %761 : vector<1x8x1xi1> to vector<8x1xi1>
    %763 = vector.shape_cast %760 : vector<8x1xi1> to vector<8x1xi1>
    %764 = vector.broadcast %763 : vector<8x1xi1> to vector<8x16xi1>
    %765 = arith.select %764, %742, %704 : vector<8x16xi1>, vector<8x16xf32>
    %766 = vector.shape_cast %760 : vector<8x1xi1> to vector<8x1xi1>
    %767 = vector.broadcast %766 : vector<8x1xi1> to vector<8x16xi1>
    %768 = arith.select %767, %739, %707 : vector<8x16xi1>, vector<8x16xf32>
    %769 = vector.shape_cast %762 : vector<8x1xi1> to vector<8x1xi1>
    %770 = vector.broadcast %769 : vector<8x1xi1> to vector<8x16xi1>
    %771 = arith.select %770, %758, %710 : vector<8x16xi1>, vector<8x16xf32>
    %772 = vector.shape_cast %762 : vector<8x1xi1> to vector<8x1xi1>
    %773 = vector.broadcast %772 : vector<8x1xi1> to vector<8x16xi1>
    %774 = arith.select %773, %755, %713 : vector<8x16xi1>, vector<8x16xf32>
    %775 = tpu.concatenate %765, %771 in 1 : vector<8x16xf32>, vector<8x16xf32> -> vector<8x32xf32>
    %776 = arith.truncf %775 : vector<8x32xf32> to vector<8x32xbf16>
    %cst_125 = arith.constant dense<0.000000e+00> : vector<8x128xf32>
    %777 = tpu.matmul %776, %529, %cst_125 {dimension_numbers = #tpu.dot_dimension_numbers<[1], [0], [0], [1], [0, 0, 1, 1], [], []>} : vector<8x32xbf16>, vector<32x128xbf16>, vector<8x128xf32> -> vector<8x128xf32>
    %c4_126 = arith.constant 4 : index
    %c0_127 = arith.constant 0 : index
    %c0_128 = arith.constant 0 : index
    %778 = vector.load %arg13[%c4_126, %c0_127, %c0_128] : memref<8x8x128xbf16, #tpu.memory_space<vmem>>, vector<1x8x64xbf16>
    %779 = vector.shape_cast %778 : vector<1x8x64xbf16> to vector<8x64xbf16>
    %780 = vector.extract_strided_slice %777 {offsets = [0, 0], sizes = [8, 64], strides = [1, 1]} : vector<8x128xf32> to vector<8x64xf32>
    %781 = arith.extf %779 : vector<8x64xbf16> to vector<8x64xf32>
    %782 = arith.addf %781, %780 : vector<8x64xf32>
    %c3_129 = arith.constant 3 : index
    %c0_130 = arith.constant 0 : index
    %c64_131 = arith.constant 64 : index
    %783 = vector.load %arg13[%c3_129, %c0_130, %c64_131] : memref<8x8x128xbf16, #tpu.memory_space<vmem>>, vector<1x8x64xbf16>
    %784 = vector.shape_cast %783 : vector<1x8x64xbf16> to vector<8x64xbf16>
    %785 = vector.extract_strided_slice %777 {offsets = [0, 64], sizes = [8, 64], strides = [1, 1]} : vector<8x128xf32> to vector<8x64xf32>
    %786 = arith.extf %784 : vector<8x64xbf16> to vector<8x64xf32>
    %787 = arith.addf %786, %785 : vector<8x64xf32>
    %788 = vector.extract_strided_slice %782 {offsets = [0, 0], sizes = [8, 48], strides = [1, 1]} : vector<8x64xf32> to vector<8x48xf32>
    %789 = arith.negf %788 : vector<8x48xf32>
    %790 = math.exp %789 : vector<8x48xf32>
    %cst_132 = arith.constant 1.000000e+00 : f32
    %791 = vector.broadcast %cst_132 : f32 to vector<8x48xf32>
    %792 = arith.addf %791, %790 : vector<8x48xf32>
    %793 = arith.divf %791, %792 : vector<8x48xf32>
    %794 = vector.extract_strided_slice %782 {offsets = [0, 48], sizes = [8, 16], strides = [1, 1]} : vector<8x64xf32> to vector<8x16xf32>
    %795 = math.tanh %794 : vector<8x16xf32>
    %796 = vector.extract_strided_slice %793 {offsets = [0, 16], sizes = [8, 16], strides = [1, 1]} : vector<8x48xf32> to vector<8x16xf32>
    %797 = arith.mulf %796, %768 : vector<8x16xf32>
    %798 = vector.extract_strided_slice %793 {offsets = [0, 0], sizes = [8, 16], strides = [1, 1]} : vector<8x48xf32> to vector<8x16xf32>
    %799 = arith.mulf %798, %795 : vector<8x16xf32>
    %800 = arith.addf %797, %799 : vector<8x16xf32>
    %801 = vector.extract_strided_slice %793 {offsets = [0, 32], sizes = [8, 16], strides = [1, 1]} : vector<8x48xf32> to vector<8x16xf32>
    %802 = math.tanh %800 : vector<8x16xf32>
    %803 = arith.mulf %801, %802 : vector<8x16xf32>
    %804 = vector.extract_strided_slice %787 {offsets = [0, 0], sizes = [8, 48], strides = [1, 1]} : vector<8x64xf32> to vector<8x48xf32>
    %805 = arith.negf %804 : vector<8x48xf32>
    %806 = math.exp %805 : vector<8x48xf32>
    %cst_133 = arith.constant 1.000000e+00 : f32
    %807 = vector.broadcast %cst_133 : f32 to vector<8x48xf32>
    %808 = arith.addf %807, %806 : vector<8x48xf32>
    %809 = arith.divf %807, %808 : vector<8x48xf32>
    %810 = vector.extract_strided_slice %787 {offsets = [0, 48], sizes = [8, 16], strides = [1, 1]} : vector<8x64xf32> to vector<8x16xf32>
    %811 = math.tanh %810 : vector<8x16xf32>
    %812 = vector.extract_strided_slice %809 {offsets = [0, 16], sizes = [8, 16], strides = [1, 1]} : vector<8x48xf32> to vector<8x16xf32>
    %813 = arith.mulf %812, %774 : vector<8x16xf32>
    %814 = vector.extract_strided_slice %809 {offsets = [0, 0], sizes = [8, 16], strides = [1, 1]} : vector<8x48xf32> to vector<8x16xf32>
    %815 = arith.mulf %814, %811 : vector<8x16xf32>
    %816 = arith.addf %813, %815 : vector<8x16xf32>
    %817 = vector.extract_strided_slice %809 {offsets = [0, 32], sizes = [8, 16], strides = [1, 1]} : vector<8x48xf32> to vector<8x16xf32>
    %818 = math.tanh %816 : vector<8x16xf32>
    %819 = arith.mulf %817, %818 : vector<8x16xf32>
    %820 = vector.extract_strided_slice %4 {offsets = [4, 0, 0], sizes = [1, 8, 1], strides = [1, 1, 1]} : vector<8x8x1xi1> to vector<1x8x1xi1>
    %821 = vector.shape_cast %820 : vector<1x8x1xi1> to vector<8x1xi1>
    %822 = vector.extract_strided_slice %4 {offsets = [3, 0, 0], sizes = [1, 8, 1], strides = [1, 1, 1]} : vector<8x8x1xi1> to vector<1x8x1xi1>
    %823 = vector.shape_cast %822 : vector<1x8x1xi1> to vector<8x1xi1>
    %824 = vector.shape_cast %821 : vector<8x1xi1> to vector<8x1xi1>
    %825 = vector.broadcast %824 : vector<8x1xi1> to vector<8x16xi1>
    %826 = arith.select %825, %803, %765 : vector<8x16xi1>, vector<8x16xf32>
    %827 = vector.shape_cast %821 : vector<8x1xi1> to vector<8x1xi1>
    %828 = vector.broadcast %827 : vector<8x1xi1> to vector<8x16xi1>
    %829 = arith.select %828, %800, %768 : vector<8x16xi1>, vector<8x16xf32>
    %830 = vector.shape_cast %823 : vector<8x1xi1> to vector<8x1xi1>
    %831 = vector.broadcast %830 : vector<8x1xi1> to vector<8x16xi1>
    %832 = arith.select %831, %819, %771 : vector<8x16xi1>, vector<8x16xf32>
    %833 = vector.shape_cast %823 : vector<8x1xi1> to vector<8x1xi1>
    %834 = vector.broadcast %833 : vector<8x1xi1> to vector<8x16xi1>
    %835 = arith.select %834, %816, %774 : vector<8x16xi1>, vector<8x16xf32>
    %836 = tpu.concatenate %826, %832 in 1 : vector<8x16xf32>, vector<8x16xf32> -> vector<8x32xf32>
    %837 = arith.truncf %836 : vector<8x32xf32> to vector<8x32xbf16>
    %cst_134 = arith.constant dense<0.000000e+00> : vector<8x128xf32>
    %838 = tpu.matmul %837, %529, %cst_134 {dimension_numbers = #tpu.dot_dimension_numbers<[1], [0], [0], [1], [0, 0, 1, 1], [], []>} : vector<8x32xbf16>, vector<32x128xbf16>, vector<8x128xf32> -> vector<8x128xf32>
    %c5_135 = arith.constant 5 : index
    %c0_136 = arith.constant 0 : index
    %c0_137 = arith.constant 0 : index
    %839 = vector.load %arg13[%c5_135, %c0_136, %c0_137] : memref<8x8x128xbf16, #tpu.memory_space<vmem>>, vector<1x8x64xbf16>
    %840 = vector.shape_cast %839 : vector<1x8x64xbf16> to vector<8x64xbf16>
    %841 = vector.extract_strided_slice %838 {offsets = [0, 0], sizes = [8, 64], strides = [1, 1]} : vector<8x128xf32> to vector<8x64xf32>
    %842 = arith.extf %840 : vector<8x64xbf16> to vector<8x64xf32>
    %843 = arith.addf %842, %841 : vector<8x64xf32>
    %c2_138 = arith.constant 2 : index
    %c0_139 = arith.constant 0 : index
    %c64_140 = arith.constant 64 : index
    %844 = vector.load %arg13[%c2_138, %c0_139, %c64_140] : memref<8x8x128xbf16, #tpu.memory_space<vmem>>, vector<1x8x64xbf16>
    %845 = vector.shape_cast %844 : vector<1x8x64xbf16> to vector<8x64xbf16>
    %846 = vector.extract_strided_slice %838 {offsets = [0, 64], sizes = [8, 64], strides = [1, 1]} : vector<8x128xf32> to vector<8x64xf32>
    %847 = arith.extf %845 : vector<8x64xbf16> to vector<8x64xf32>
    %848 = arith.addf %847, %846 : vector<8x64xf32>
    %849 = vector.extract_strided_slice %843 {offsets = [0, 0], sizes = [8, 48], strides = [1, 1]} : vector<8x64xf32> to vector<8x48xf32>
    %850 = arith.negf %849 : vector<8x48xf32>
    %851 = math.exp %850 : vector<8x48xf32>
    %cst_141 = arith.constant 1.000000e+00 : f32
    %852 = vector.broadcast %cst_141 : f32 to vector<8x48xf32>
    %853 = arith.addf %852, %851 : vector<8x48xf32>
    %854 = arith.divf %852, %853 : vector<8x48xf32>
    %855 = vector.extract_strided_slice %843 {offsets = [0, 48], sizes = [8, 16], strides = [1, 1]} : vector<8x64xf32> to vector<8x16xf32>
    %856 = math.tanh %855 : vector<8x16xf32>
    %857 = vector.extract_strided_slice %854 {offsets = [0, 16], sizes = [8, 16], strides = [1, 1]} : vector<8x48xf32> to vector<8x16xf32>
    %858 = arith.mulf %857, %829 : vector<8x16xf32>
    %859 = vector.extract_strided_slice %854 {offsets = [0, 0], sizes = [8, 16], strides = [1, 1]} : vector<8x48xf32> to vector<8x16xf32>
    %860 = arith.mulf %859, %856 : vector<8x16xf32>
    %861 = arith.addf %858, %860 : vector<8x16xf32>
    %862 = vector.extract_strided_slice %854 {offsets = [0, 32], sizes = [8, 16], strides = [1, 1]} : vector<8x48xf32> to vector<8x16xf32>
    %863 = math.tanh %861 : vector<8x16xf32>
    %864 = arith.mulf %862, %863 : vector<8x16xf32>
    %865 = vector.extract_strided_slice %848 {offsets = [0, 0], sizes = [8, 48], strides = [1, 1]} : vector<8x64xf32> to vector<8x48xf32>
    %866 = arith.negf %865 : vector<8x48xf32>
    %867 = math.exp %866 : vector<8x48xf32>
    %cst_142 = arith.constant 1.000000e+00 : f32
    %868 = vector.broadcast %cst_142 : f32 to vector<8x48xf32>
    %869 = arith.addf %868, %867 : vector<8x48xf32>
    %870 = arith.divf %868, %869 : vector<8x48xf32>
    %871 = vector.extract_strided_slice %848 {offsets = [0, 48], sizes = [8, 16], strides = [1, 1]} : vector<8x64xf32> to vector<8x16xf32>
    %872 = math.tanh %871 : vector<8x16xf32>
    %873 = vector.extract_strided_slice %870 {offsets = [0, 16], sizes = [8, 16], strides = [1, 1]} : vector<8x48xf32> to vector<8x16xf32>
    %874 = arith.mulf %873, %835 : vector<8x16xf32>
    %875 = vector.extract_strided_slice %870 {offsets = [0, 0], sizes = [8, 16], strides = [1, 1]} : vector<8x48xf32> to vector<8x16xf32>
    %876 = arith.mulf %875, %872 : vector<8x16xf32>
    %877 = arith.addf %874, %876 : vector<8x16xf32>
    %878 = vector.extract_strided_slice %870 {offsets = [0, 32], sizes = [8, 16], strides = [1, 1]} : vector<8x48xf32> to vector<8x16xf32>
    %879 = math.tanh %877 : vector<8x16xf32>
    %880 = arith.mulf %878, %879 : vector<8x16xf32>
    %881 = vector.extract_strided_slice %4 {offsets = [5, 0, 0], sizes = [1, 8, 1], strides = [1, 1, 1]} : vector<8x8x1xi1> to vector<1x8x1xi1>
    %882 = vector.shape_cast %881 : vector<1x8x1xi1> to vector<8x1xi1>
    %883 = vector.extract_strided_slice %4 {offsets = [2, 0, 0], sizes = [1, 8, 1], strides = [1, 1, 1]} : vector<8x8x1xi1> to vector<1x8x1xi1>
    %884 = vector.shape_cast %883 : vector<1x8x1xi1> to vector<8x1xi1>
    %885 = vector.shape_cast %882 : vector<8x1xi1> to vector<8x1xi1>
    %886 = vector.broadcast %885 : vector<8x1xi1> to vector<8x16xi1>
    %887 = arith.select %886, %864, %826 : vector<8x16xi1>, vector<8x16xf32>
    %888 = vector.shape_cast %882 : vector<8x1xi1> to vector<8x1xi1>
    %889 = vector.broadcast %888 : vector<8x1xi1> to vector<8x16xi1>
    %890 = arith.select %889, %861, %829 : vector<8x16xi1>, vector<8x16xf32>
    %891 = vector.shape_cast %884 : vector<8x1xi1> to vector<8x1xi1>
    %892 = vector.broadcast %891 : vector<8x1xi1> to vector<8x16xi1>
    %893 = arith.select %892, %880, %832 : vector<8x16xi1>, vector<8x16xf32>
    %894 = vector.shape_cast %884 : vector<8x1xi1> to vector<8x1xi1>
    %895 = vector.broadcast %894 : vector<8x1xi1> to vector<8x16xi1>
    %896 = arith.select %895, %877, %835 : vector<8x16xi1>, vector<8x16xf32>
    %897 = tpu.concatenate %887, %893 in 1 : vector<8x16xf32>, vector<8x16xf32> -> vector<8x32xf32>
    %898 = arith.truncf %897 : vector<8x32xf32> to vector<8x32xbf16>
    %cst_143 = arith.constant dense<0.000000e+00> : vector<8x128xf32>
    %899 = tpu.matmul %898, %529, %cst_143 {dimension_numbers = #tpu.dot_dimension_numbers<[1], [0], [0], [1], [0, 0, 1, 1], [], []>} : vector<8x32xbf16>, vector<32x128xbf16>, vector<8x128xf32> -> vector<8x128xf32>
    %c6_144 = arith.constant 6 : index
    %c0_145 = arith.constant 0 : index
    %c0_146 = arith.constant 0 : index
    %900 = vector.load %arg13[%c6_144, %c0_145, %c0_146] : memref<8x8x128xbf16, #tpu.memory_space<vmem>>, vector<1x8x64xbf16>
    %901 = vector.shape_cast %900 : vector<1x8x64xbf16> to vector<8x64xbf16>
    %902 = vector.extract_strided_slice %899 {offsets = [0, 0], sizes = [8, 64], strides = [1, 1]} : vector<8x128xf32> to vector<8x64xf32>
    %903 = arith.extf %901 : vector<8x64xbf16> to vector<8x64xf32>
    %904 = arith.addf %903, %902 : vector<8x64xf32>
    %c1_147 = arith.constant 1 : index
    %c0_148 = arith.constant 0 : index
    %c64_149 = arith.constant 64 : index
    %905 = vector.load %arg13[%c1_147, %c0_148, %c64_149] : memref<8x8x128xbf16, #tpu.memory_space<vmem>>, vector<1x8x64xbf16>
    %906 = vector.shape_cast %905 : vector<1x8x64xbf16> to vector<8x64xbf16>
    %907 = vector.extract_strided_slice %899 {offsets = [0, 64], sizes = [8, 64], strides = [1, 1]} : vector<8x128xf32> to vector<8x64xf32>
    %908 = arith.extf %906 : vector<8x64xbf16> to vector<8x64xf32>
    %909 = arith.addf %908, %907 : vector<8x64xf32>
    %910 = vector.extract_strided_slice %904 {offsets = [0, 0], sizes = [8, 48], strides = [1, 1]} : vector<8x64xf32> to vector<8x48xf32>
    %911 = arith.negf %910 : vector<8x48xf32>
    %912 = math.exp %911 : vector<8x48xf32>
    %cst_150 = arith.constant 1.000000e+00 : f32
    %913 = vector.broadcast %cst_150 : f32 to vector<8x48xf32>
    %914 = arith.addf %913, %912 : vector<8x48xf32>
    %915 = arith.divf %913, %914 : vector<8x48xf32>
    %916 = vector.extract_strided_slice %904 {offsets = [0, 48], sizes = [8, 16], strides = [1, 1]} : vector<8x64xf32> to vector<8x16xf32>
    %917 = math.tanh %916 : vector<8x16xf32>
    %918 = vector.extract_strided_slice %915 {offsets = [0, 16], sizes = [8, 16], strides = [1, 1]} : vector<8x48xf32> to vector<8x16xf32>
    %919 = arith.mulf %918, %890 : vector<8x16xf32>
    %920 = vector.extract_strided_slice %915 {offsets = [0, 0], sizes = [8, 16], strides = [1, 1]} : vector<8x48xf32> to vector<8x16xf32>
    %921 = arith.mulf %920, %917 : vector<8x16xf32>
    %922 = arith.addf %919, %921 : vector<8x16xf32>
    %923 = vector.extract_strided_slice %915 {offsets = [0, 32], sizes = [8, 16], strides = [1, 1]} : vector<8x48xf32> to vector<8x16xf32>
    %924 = math.tanh %922 : vector<8x16xf32>
    %925 = arith.mulf %923, %924 : vector<8x16xf32>
    %926 = vector.extract_strided_slice %909 {offsets = [0, 0], sizes = [8, 48], strides = [1, 1]} : vector<8x64xf32> to vector<8x48xf32>
    %927 = arith.negf %926 : vector<8x48xf32>
    %928 = math.exp %927 : vector<8x48xf32>
    %cst_151 = arith.constant 1.000000e+00 : f32
    %929 = vector.broadcast %cst_151 : f32 to vector<8x48xf32>
    %930 = arith.addf %929, %928 : vector<8x48xf32>
    %931 = arith.divf %929, %930 : vector<8x48xf32>
    %932 = vector.extract_strided_slice %909 {offsets = [0, 48], sizes = [8, 16], strides = [1, 1]} : vector<8x64xf32> to vector<8x16xf32>
    %933 = math.tanh %932 : vector<8x16xf32>
    %934 = vector.extract_strided_slice %931 {offsets = [0, 16], sizes = [8, 16], strides = [1, 1]} : vector<8x48xf32> to vector<8x16xf32>
    %935 = arith.mulf %934, %896 : vector<8x16xf32>
    %936 = vector.extract_strided_slice %931 {offsets = [0, 0], sizes = [8, 16], strides = [1, 1]} : vector<8x48xf32> to vector<8x16xf32>
    %937 = arith.mulf %936, %933 : vector<8x16xf32>
    %938 = arith.addf %935, %937 : vector<8x16xf32>
    %939 = vector.extract_strided_slice %931 {offsets = [0, 32], sizes = [8, 16], strides = [1, 1]} : vector<8x48xf32> to vector<8x16xf32>
    %940 = math.tanh %938 : vector<8x16xf32>
    %941 = arith.mulf %939, %940 : vector<8x16xf32>
    %942 = vector.extract_strided_slice %4 {offsets = [6, 0, 0], sizes = [1, 8, 1], strides = [1, 1, 1]} : vector<8x8x1xi1> to vector<1x8x1xi1>
    %943 = vector.shape_cast %942 : vector<1x8x1xi1> to vector<8x1xi1>
    %944 = vector.extract_strided_slice %4 {offsets = [1, 0, 0], sizes = [1, 8, 1], strides = [1, 1, 1]} : vector<8x8x1xi1> to vector<1x8x1xi1>
    %945 = vector.shape_cast %944 : vector<1x8x1xi1> to vector<8x1xi1>
    %946 = vector.shape_cast %943 : vector<8x1xi1> to vector<8x1xi1>
    %947 = vector.broadcast %946 : vector<8x1xi1> to vector<8x16xi1>
    %948 = arith.select %947, %925, %887 : vector<8x16xi1>, vector<8x16xf32>
    %949 = vector.shape_cast %943 : vector<8x1xi1> to vector<8x1xi1>
    %950 = vector.broadcast %949 : vector<8x1xi1> to vector<8x16xi1>
    %951 = arith.select %950, %922, %890 : vector<8x16xi1>, vector<8x16xf32>
    %952 = vector.shape_cast %945 : vector<8x1xi1> to vector<8x1xi1>
    %953 = vector.broadcast %952 : vector<8x1xi1> to vector<8x16xi1>
    %954 = arith.select %953, %941, %893 : vector<8x16xi1>, vector<8x16xf32>
    %955 = vector.shape_cast %945 : vector<8x1xi1> to vector<8x1xi1>
    %956 = vector.broadcast %955 : vector<8x1xi1> to vector<8x16xi1>
    %957 = arith.select %956, %938, %896 : vector<8x16xi1>, vector<8x16xf32>
    %958 = tpu.concatenate %948, %954 in 1 : vector<8x16xf32>, vector<8x16xf32> -> vector<8x32xf32>
    %959 = arith.truncf %958 : vector<8x32xf32> to vector<8x32xbf16>
    %cst_152 = arith.constant dense<0.000000e+00> : vector<8x128xf32>
    %960 = tpu.matmul %959, %529, %cst_152 {dimension_numbers = #tpu.dot_dimension_numbers<[1], [0], [0], [1], [0, 0, 1, 1], [], []>} : vector<8x32xbf16>, vector<32x128xbf16>, vector<8x128xf32> -> vector<8x128xf32>
    %c7_153 = arith.constant 7 : index
    %c0_154 = arith.constant 0 : index
    %c0_155 = arith.constant 0 : index
    %961 = vector.load %arg13[%c7_153, %c0_154, %c0_155] : memref<8x8x128xbf16, #tpu.memory_space<vmem>>, vector<1x8x64xbf16>
    %962 = vector.shape_cast %961 : vector<1x8x64xbf16> to vector<8x64xbf16>
    %963 = vector.extract_strided_slice %960 {offsets = [0, 0], sizes = [8, 64], strides = [1, 1]} : vector<8x128xf32> to vector<8x64xf32>
    %964 = arith.extf %962 : vector<8x64xbf16> to vector<8x64xf32>
    %965 = arith.addf %964, %963 : vector<8x64xf32>
    %c0_156 = arith.constant 0 : index
    %c0_157 = arith.constant 0 : index
    %c64_158 = arith.constant 64 : index
    %966 = vector.load %arg13[%c0_156, %c0_157, %c64_158] : memref<8x8x128xbf16, #tpu.memory_space<vmem>>, vector<1x8x64xbf16>
    %967 = vector.shape_cast %966 : vector<1x8x64xbf16> to vector<8x64xbf16>
    %968 = vector.extract_strided_slice %960 {offsets = [0, 64], sizes = [8, 64], strides = [1, 1]} : vector<8x128xf32> to vector<8x64xf32>
    %969 = arith.extf %967 : vector<8x64xbf16> to vector<8x64xf32>
    %970 = arith.addf %969, %968 : vector<8x64xf32>
    %971 = vector.extract_strided_slice %965 {offsets = [0, 0], sizes = [8, 48], strides = [1, 1]} : vector<8x64xf32> to vector<8x48xf32>
    %972 = arith.negf %971 : vector<8x48xf32>
    %973 = math.exp %972 : vector<8x48xf32>
    %cst_159 = arith.constant 1.000000e+00 : f32
    %974 = vector.broadcast %cst_159 : f32 to vector<8x48xf32>
    %975 = arith.addf %974, %973 : vector<8x48xf32>
    %976 = arith.divf %974, %975 : vector<8x48xf32>
    %977 = vector.extract_strided_slice %965 {offsets = [0, 48], sizes = [8, 16], strides = [1, 1]} : vector<8x64xf32> to vector<8x16xf32>
    %978 = math.tanh %977 : vector<8x16xf32>
    %979 = vector.extract_strided_slice %976 {offsets = [0, 16], sizes = [8, 16], strides = [1, 1]} : vector<8x48xf32> to vector<8x16xf32>
    %980 = arith.mulf %979, %951 : vector<8x16xf32>
    %981 = vector.extract_strided_slice %976 {offsets = [0, 0], sizes = [8, 16], strides = [1, 1]} : vector<8x48xf32> to vector<8x16xf32>
    %982 = arith.mulf %981, %978 : vector<8x16xf32>
    %983 = arith.addf %980, %982 : vector<8x16xf32>
    %984 = vector.extract_strided_slice %976 {offsets = [0, 32], sizes = [8, 16], strides = [1, 1]} : vector<8x48xf32> to vector<8x16xf32>
    %985 = math.tanh %983 : vector<8x16xf32>
    %986 = arith.mulf %984, %985 : vector<8x16xf32>
    %987 = vector.extract_strided_slice %970 {offsets = [0, 0], sizes = [8, 48], strides = [1, 1]} : vector<8x64xf32> to vector<8x48xf32>
    %988 = arith.negf %987 : vector<8x48xf32>
    %989 = math.exp %988 : vector<8x48xf32>
    %cst_160 = arith.constant 1.000000e+00 : f32
    %990 = vector.broadcast %cst_160 : f32 to vector<8x48xf32>
    %991 = arith.addf %990, %989 : vector<8x48xf32>
    %992 = arith.divf %990, %991 : vector<8x48xf32>
    %993 = vector.extract_strided_slice %970 {offsets = [0, 48], sizes = [8, 16], strides = [1, 1]} : vector<8x64xf32> to vector<8x16xf32>
    %994 = math.tanh %993 : vector<8x16xf32>
    %995 = vector.extract_strided_slice %992 {offsets = [0, 16], sizes = [8, 16], strides = [1, 1]} : vector<8x48xf32> to vector<8x16xf32>
    %996 = arith.mulf %995, %957 : vector<8x16xf32>
    %997 = vector.extract_strided_slice %992 {offsets = [0, 0], sizes = [8, 16], strides = [1, 1]} : vector<8x48xf32> to vector<8x16xf32>
    %998 = arith.mulf %997, %994 : vector<8x16xf32>
    %999 = arith.addf %996, %998 : vector<8x16xf32>
    %1000 = vector.extract_strided_slice %992 {offsets = [0, 32], sizes = [8, 16], strides = [1, 1]} : vector<8x48xf32> to vector<8x16xf32>
    %1001 = math.tanh %999 : vector<8x16xf32>
    %1002 = arith.mulf %1000, %1001 : vector<8x16xf32>
    %1003 = vector.extract_strided_slice %4 {offsets = [7, 0, 0], sizes = [1, 8, 1], strides = [1, 1, 1]} : vector<8x8x1xi1> to vector<1x8x1xi1>
    %1004 = vector.shape_cast %1003 : vector<1x8x1xi1> to vector<8x1xi1>
    %1005 = vector.extract_strided_slice %4 {offsets = [0, 0, 0], sizes = [1, 8, 1], strides = [1, 1, 1]} : vector<8x8x1xi1> to vector<1x8x1xi1>
    %1006 = vector.shape_cast %1005 : vector<1x8x1xi1> to vector<8x1xi1>
    %1007 = vector.shape_cast %1004 : vector<8x1xi1> to vector<8x1xi1>
    %1008 = vector.broadcast %1007 : vector<8x1xi1> to vector<8x16xi1>
    %1009 = arith.select %1008, %986, %948 : vector<8x16xi1>, vector<8x16xf32>
    %1010 = vector.shape_cast %1006 : vector<8x1xi1> to vector<8x1xi1>
    %1011 = vector.broadcast %1010 : vector<8x1xi1> to vector<8x16xi1>
    %1012 = arith.select %1011, %1002, %954 : vector<8x16xi1>, vector<8x16xf32>
    %1013 = vector.shape_cast %582 : vector<8x16xf32> to vector<1x8x16xf32>
    %1014 = vector.shape_cast %643 : vector<8x16xf32> to vector<1x8x16xf32>
    %1015 = vector.shape_cast %704 : vector<8x16xf32> to vector<1x8x16xf32>
    %1016 = vector.shape_cast %765 : vector<8x16xf32> to vector<1x8x16xf32>
    %1017 = vector.shape_cast %826 : vector<8x16xf32> to vector<1x8x16xf32>
    %1018 = vector.shape_cast %887 : vector<8x16xf32> to vector<1x8x16xf32>
    %1019 = vector.shape_cast %948 : vector<8x16xf32> to vector<1x8x16xf32>
    %1020 = vector.shape_cast %1009 : vector<8x16xf32> to vector<1x8x16xf32>
    %1021 = tpu.concatenate %1013, %1014, %1015, %1016, %1017, %1018, %1019, %1020 in 0 : vector<1x8x16xf32>, vector<1x8x16xf32>, vector<1x8x16xf32>, vector<1x8x16xf32>, vector<1x8x16xf32>, vector<1x8x16xf32>, vector<1x8x16xf32>, vector<1x8x16xf32> -> vector<8x8x16xf32>
    %1022 = vector.shape_cast %1012 : vector<8x16xf32> to vector<1x8x16xf32>
    %1023 = vector.shape_cast %954 : vector<8x16xf32> to vector<1x8x16xf32>
    %1024 = vector.shape_cast %893 : vector<8x16xf32> to vector<1x8x16xf32>
    %1025 = vector.shape_cast %832 : vector<8x16xf32> to vector<1x8x16xf32>
    %1026 = vector.shape_cast %771 : vector<8x16xf32> to vector<1x8x16xf32>
    %1027 = vector.shape_cast %710 : vector<8x16xf32> to vector<1x8x16xf32>
    %1028 = vector.shape_cast %649 : vector<8x16xf32> to vector<1x8x16xf32>
    %1029 = vector.shape_cast %588 : vector<8x16xf32> to vector<1x8x16xf32>
    %1030 = tpu.concatenate %1022, %1023, %1024, %1025, %1026, %1027, %1028, %1029 in 0 : vector<1x8x16xf32>, vector<1x8x16xf32>, vector<1x8x16xf32>, vector<1x8x16xf32>, vector<1x8x16xf32>, vector<1x8x16xf32>, vector<1x8x16xf32>, vector<1x8x16xf32> -> vector<8x8x16xf32>
    %1031 = tpu.concatenate %1021, %1030 in 2 : vector<8x8x16xf32>, vector<8x8x16xf32> -> vector<8x8x32xf32>
    %1032 = arith.extui %4 : vector<8x8x1xi1> to vector<8x8x1xi32>
    %1033 = arith.sitofp %1032 : vector<8x8x1xi32> to vector<8x8x1xf32>
    %1034 = vector.broadcast %1033 : vector<8x8x1xf32> to vector<8x8x32xf32>
    %1035 = arith.mulf %1031, %1034 : vector<8x8x32xf32>
    %1036 = vector.shape_cast %1035 : vector<8x8x32xf32> to vector<64x32xf32>
    %1037 = arith.truncf %1036 : vector<64x32xf32> to vector<64x32xbf16>
    %c0_161 = arith.constant 0 : index
    %c0_162 = arith.constant 0 : index
    %1038 = vector.load %arg10[%c0_161, %c0_162] : memref<32x32xbf16, #tpu.memory_space<vmem>>, vector<32x32xbf16>
    %cst_163 = arith.constant dense<0.000000e+00> : vector<64x32xf32>
    %1039 = tpu.matmul %1037, %1038, %cst_163 {dimension_numbers = #tpu.dot_dimension_numbers<[1], [0], [0], [1], [0, 0, 1, 1], [], []>} : vector<64x32xbf16>, vector<32x32xbf16>, vector<64x32xf32> -> vector<64x32xf32>
    %c0_164 = arith.constant 0 : index
    %c0_165 = arith.constant 0 : index
    %1040 = vector.load %arg11[%c0_164, %c0_165] : memref<1x32xf32, #tpu.memory_space<vmem>>, vector<1x32xf32>
    %1041 = vector.broadcast %1040 : vector<1x32xf32> to vector<64x32xf32>
    %1042 = arith.addf %1039, %1041 : vector<64x32xf32>
    %1043 = vector.shape_cast %1042 : vector<64x32xf32> to vector<8x8x32xf32>
    %c0_166 = arith.constant 0 : index
    %c0_167 = arith.constant 0 : index
    %c0_168 = arith.constant 0 : index
    %1044 = vector.load %arg2[%c0_166, %c0_167, %c0_168] : memref<8x8x1xi32, #tpu.memory_space<vmem>>, vector<8x8x1xi32>
    %c0_i32 = arith.constant 0 : i32
    %1045 = vector.broadcast %c0_i32 : i32 to vector<8x8x1xi32>
    %1046 = arith.cmpi ne, %1044, %1045 : vector<8x8x1xi32>
    %c0_169 = arith.constant 0 : index
    %c0_170 = arith.constant 0 : index
    %c0_171 = arith.constant 0 : index
    %1047 = vector.load %arg3[%c0_169, %c0_170, %c0_171] : memref<8x8x32xf32, #tpu.memory_space<vmem>>, vector<8x8x32xf32>
    %1048 = vector.shape_cast %1046 : vector<8x8x1xi1> to vector<8x8x1xi1>
    %1049 = vector.broadcast %1048 : vector<8x8x1xi1> to vector<8x8x32xi1>
    %1050 = arith.select %1049, %1047, %1043 : vector<8x8x32xi1>, vector<8x8x32xf32>
    %c0_172 = arith.constant 0 : index
    %c0_173 = arith.constant 0 : index
    %c0_174 = arith.constant 0 : index
    %1051 = vector.load %arg12[%c0_172, %c0_173, %c0_174] : memref<8x8x32xf32, #tpu.memory_space<vmem>>, vector<8x8x32xf32>
    tpu.vector_store %arg12[%c0_172, %c0_173, %c0_174], %1050 {strides = array<i32>} : memref<8x8x32xf32, #tpu.memory_space<vmem>>, vector<8x8x32xf32>,
    return
  }
  func.func @transform_0(%arg0: i32) -> (i32, i32) {
    %c0_i32 = arith.constant 0 : i32
    %c0_i32_0 = arith.constant 0 : i32
    return %arg0, %c0_i32 : i32, i32
  }
  func.func @transform_1(%arg0: i32) -> (i32, i32, i32) {
    %c0_i32 = arith.constant 0 : i32
    %c0_i32_0 = arith.constant 0 : i32
    %c0_i32_1 = arith.constant 0 : i32
    return %c0_i32, %arg0, %c0_i32_0 : i32, i32, i32
  }
  func.func @transform_2(%arg0: i32) -> (i32, i32, i32) {
    %c0_i32 = arith.constant 0 : i32
    %c0_i32_0 = arith.constant 0 : i32
    %c0_i32_1 = arith.constant 0 : i32
    return %c0_i32, %arg0, %c0_i32_0 : i32, i32, i32
  }
  func.func @transform_3(%arg0: i32) -> (i32, i32) {
    %c0_i32 = arith.constant 0 : i32
    %c0_i32_0 = arith.constant 0 : i32
    %c0_i32_1 = arith.constant 0 : i32
    return %c0_i32, %c0_i32_0 : i32, i32
  }
  func.func @transform_4(%arg0: i32) -> (i32, i32) {
    %c0_i32 = arith.constant 0 : i32
    %c0_i32_0 = arith.constant 0 : i32
    %c0_i32_1 = arith.constant 0 : i32
    return %c0_i32, %c0_i32_0 : i32, i32
  }
  func.func @transform_5(%arg0: i32) -> (i32, i32) {
    %c0_i32 = arith.constant 0 : i32
    %c0_i32_0 = arith.constant 0 : i32
    %c0_i32_1 = arith.constant 0 : i32
    return %c0_i32, %c0_i32_0 : i32, i32
  }
  func.func @transform_6(%arg0: i32) -> (i32, i32) {
    %c0_i32 = arith.constant 0 : i32
    %c0_i32_0 = arith.constant 0 : i32
    %c0_i32_1 = arith.constant 0 : i32
    return %c0_i32, %c0_i32_0 : i32, i32
  }
  func.func @transform_7(%arg0: i32) -> (i32, i32) {
    %c0_i32 = arith.constant 0 : i32
    %c0_i32_0 = arith.constant 0 : i32
    %c0_i32_1 = arith.constant 0 : i32
    return %c0_i32, %c0_i32_0 : i32, i32
  }
  func.func @transform_8(%arg0: i32) -> (i32, i32) {
    %c0_i32 = arith.constant 0 : i32
    %c0_i32_0 = arith.constant 0 : i32
    %c0_i32_1 = arith.constant 0 : i32
    return %c0_i32, %c0_i32_0 : i32, i32
  }
  func.func @transform_9(%arg0: i32) -> (i32, i32) {
    %c0_i32 = arith.constant 0 : i32
    %c0_i32_0 = arith.constant 0 : i32
    %c0_i32_1 = arith.constant 0 : i32
    return %c0_i32, %c0_i32_0 : i32, i32
  }
  func.func @transform_10(%arg0: i32) -> (i32, i32) {
    %c0_i32 = arith.constant 0 : i32
    %c0_i32_0 = arith.constant 0 : i32
    %c0_i32_1 = arith.constant 0 : i32
    return %c0_i32, %c0_i32_0 : i32, i32
  }
  func.func @transform_11(%arg0: i32) -> (i32, i32, i32) {
    %c0_i32 = arith.constant 0 : i32
    %c0_i32_0 = arith.constant 0 : i32
    %c0_i32_1 = arith.constant 0 : i32
    return %c0_i32, %arg0, %c0_i32_0 : i32, i32, i32
  }
}

</mosaic_0001>

<bundles_post_ra>
// kernel: tpu_custom_call.1
= control target key start
LH: loop header
LB: loop body
LE: loop exit
PB: predicated region body
PF: predicated region fallthrough
CT: control target
= control target key end

     0   :  { %16 = vsyncpa [#allocation4], 0  ;;  %s4309_s0 = inlined_call_operand.vmem [shape: s32[8,1], index: 0, kind: input, shape index: {}]   ;;  %s4310_s1 = inlined_call_operand.vmem [shape: s32[8,8,1], index: 1, kind: input, shape index: {}]   ;;  %s4311_s2 = inlined_call_operand.vmem [shape: f32[8,8,32], index: 2, kind: input, shape index: {}]   ;;  %s4312_s3 = inlined_call_operand.vmem [shape: bf16[32,128], index: 3, kind: input, shape index: {}]   ;;  %s4313_s4 = inlined_call_operand.hbm [shape: f32[1,128], index: 4, kind: input, shape index: {}]   ;;  %s4314_s5 = inlined_call_operand.vmem [shape: bf16[32,128], index: 5, kind: input, shape index: {}]   ;;  %s4315_s6 = inlined_call_operand.hbm [shape: bf16[32,128], index: 6, kind: input, shape index: {}]   ;;  %s4316_s7 = inlined_call_operand.vmem [shape: f32[1,128], index: 7, kind: input, shape index: {}]   ;;  %s4317_s8 = inlined_call_operand.hbm [shape: bf16[32,128], index: 8, kind: input, shape index: {}]   ;;  %s4318_s9 = inlined_call_operand.vmem [shape: bf16[32,32], index: 9, kind: input, shape index: {}]   ;;  %s4319_s10 = inlined_call_operand.vmem [shape: f32[1,32], index: 10, kind: input, shape index: {}]   ;;  %s4320_s11 = inlined_call_operand.hbm [shape: f32[8,8,32], index: 11, kind: output, shape index: {}]  }
   0x1   :  { %17 = vsyncpa [#allocation7], 0 }
   0x2   :  { %18 = vsyncpa [#allocation5], 0  ;;  %s3182_s17 = smov [#allocation6]   ;;  %s3088_s21 = scalar_lea.hbm %s4315_s6, 256 }
   0x3   :  { %s44_s18 = sshll.u32 %s3182_s17, 4  ;;  %p3089_p0 = scmp.ne.s32.totalorder %s4315_s6, %s3088_s21  ;;  %s45_s18 = int_to_ptr.vmem [resolvable:$true] %s44_s18 }
   0x4   :  { %p3092_p1 = scmp.lt.u32.totalorder %s3088_s21, %s4315_s6 }
   0x6   :  { %p3094_p2 = pnand %p3092_p1, %p3089_p0 }
   0x8   :  { %3097 = shalt.err (!%p3094_p2)
}
   0x9   :  { %s3098_s26 = scalar_lea.vmem %s45_s18, 256  ;;  %p3103_p4 = scmp.lt.s32.totalorder %s45_s18, %s45_s18 }
   0xa   :  { %p3099_p3 = scmp.ne.s32.totalorder %s45_s18, %s3098_s26  ;;  %p3104_p5 = scmp.lt.s32.totalorder %s3098_s26, %s3098_s26 }
   0xc   :  { %p3105_p6 = por %p3104_p5, %p3103_p4 }
   0xe   :  { %p3106_p7 = pnand %p3105_p6, %p3099_p3 }
  0x10   :  { %3109 = shalt.err (!%p3106_p7)
}
  0x11   :  { %s3183_s27 = smov 64   ;;  %s3184_s28 = smov 4  }
  0x12   :  { %50 = dma.hbm_to_vmem [thread:$0]  %s4315_s6, 256, %s45_s18, [#allocation7], %s3183_s27, %s3183_s27, %s3184_s28  }
  0x13   :  { %s3185_s12 = smov [#allocation3]   ;;  %s3186_s14 = smov [#allocation8]  }
  0x14   :  { %s33_s13 = sshll.u32 %s3185_s12, 4  ;;  %s58_s15 = sshll.u32 %s3186_s14, 4  ;;  %s34_s13 = int_to_ptr.vmem [resolvable:$true] %s33_s13  ;;  %s59_s15 = int_to_ptr.vmem [resolvable:$true] %s58_s15 }
  0x15   :  { %s3110_s19 = scalar_lea.hbm %s4313_s4, 16 }
  0x16   :  { %p3111_p8 = scmp.ne.s32.totalorder %s4313_s4, %s3110_s19  ;;  %p3114_p9 = scmp.lt.u32.totalorder %s3110_s19, %s4313_s4 }
  0x18   :  { %p3116_p10 = pnand %p3114_p9, %p3111_p8 }
  0x1a   :  { %3119 = shalt.err (!%p3116_p10)
}
  0x1b   :  { %s3120_s6 = scalar_lea.vmem %s34_s13, 16  ;;  %s3124_s18 = scalar_lea.vmem %s34_s13, 32 }
  0x1c   :  { %p3121_p11 = scmp.ne.s32.totalorder %s34_s13, %s3120_s6  ;;  %p3125_p12 = scmp.lt.s32.totalorder %s34_s13, %s34_s13 }
  0x1d   :  { %p3126_p13 = scmp.lt.s32.totalorder %s3124_s18, %s3120_s6 }
  0x1f   :  { %p3127_p0 = por %p3126_p13, %p3125_p12 }
  0x21   :  { %p3128_p1 = pnand %p3127_p0, %p3121_p11 }
  0x23   :  { %3131 = shalt.err (!%p3128_p1)
}
  0x24   :  { %36 = dma.hbm_to_vmem [thread:$0]  %s4313_s4, 16, %s34_s13, [#allocation4]  }
  0x25   :  { %s3132_s30 = scalar_lea.hbm %s4317_s8, 256 }
  0x26   :  { %p3133_p2 = scmp.ne.s32.totalorder %s4317_s8, %s3132_s30  ;;  %p3136_p3 = scmp.lt.u32.totalorder %s3132_s30, %s4317_s8 }
  0x28   :  { %p3138_p4 = pnand %p3136_p3, %p3133_p2 }
  0x2a   :  { %3141 = shalt.err (!%p3138_p4)
}
  0x2b   :  { %s3142_s19 = scalar_lea.vmem %s59_s15, 256  ;;  %p3147_p6 = scmp.lt.s32.totalorder %s59_s15, %s59_s15 }
  0x2c   :  { %p3143_p5 = scmp.ne.s32.totalorder %s59_s15, %s3142_s19  ;;  %p3148_p7 = scmp.lt.s32.totalorder %s3142_s19, %s3142_s19 }
  0x2e   :  { %p3149_p8 = por %p3148_p7, %p3147_p6 }
  0x30   :  { %p3150_p9 = pnand %p3149_p8, %p3143_p5 }
  0x32   :  { %3153 = shalt.err (!%p3150_p9)
}
  0x33   :  { %64 = dma.hbm_to_vmem [thread:$0]  %s4317_s8, 256, %s59_s15, [#allocation7], %s3183_s27, %s3183_s27, %s3184_s28  }
  0x34   :  { %3176 = dma.done.wait [#allocation4], 16  }
  0x35   :  { %3177 = vsyncadd [#allocation4], 4294967280 }
  0x36   :  { %3178 = dma.done.wait [#allocation7], 512  }
  0x37   :  { %3179 = vsyncadd [#allocation7], 4294966784  ;;  %v2822_v0 = vld [vmem:[%s4312_s3] sm:$0xff]   ;;  %v2823_v1 = vld [vmem:[%s4312_s3 + $0x8] sm:$0xff]   ;;  %vm123_vm0 = vcmask 261120   ;;  %v3187_v15 = vmov 0.0  }
  0x38   :  { %2616 = vmatprep.subr.bf16.mxu0 %v2822_v0  ;;  %2780 = vmatprep.subr.bf16.mxu1 %v2822_v0  ;;  %v88_v2 = vld [vmem:[%s4311_s2] sm:$0xff]  ;;  %v89_v3 = vld [vmem:[%s4311_s2 + $0x8] sm:$0xff]  ;;  %v90_v4 = vld [vmem:[%s4311_s2 + $0x10] sm:$0xff]  ;;  %vm3188_vm1 = vmmov 0   ;;  %v3189_v17 = vmov 0.0|0.0   ;;  %v3190_v18 = vmov 0  }
  0x39   :  { %2617 = vmatpush3.bf16.msra.mxu0 %v2822_v0  ;;  %2782 = vmatpush3.bf16.msra.mxu1 %v2822_v0  ;;  %v96_v5 = vpack.c.bf16 %v89_v3, %v88_v2  ;;  %v91_v6 = vld [vmem:[%s4311_s2 + $0x18] sm:$0xff]  ;;  %v92_v7 = vld [vmem:[%s4311_s2 + $0x20] sm:$0xff]  ;;  %v93_v8 = vld [vmem:[%s4311_s2 + $0x28] sm:$0xff]  ;;  %s3191_s22 = smov 80   ;;  %s3193_s23 = smov 96   ;;  %vm354_vm6 = vcmask 130048  }
  0x3a   :  { %2618 = vmatprep.subr.bf16.mxu0 %v2823_v1  ;;  %2781 = vmatprep.subr.bf16.mxu1 %v2823_v1  ;;  %v98_v9 = vpack.c.bf16 %v93_v8, %v92_v7  ;;  %v94_v10 = vld [vmem:[%s4311_s2 + $0x30] sm:$0xff]  ;;  %v95_v11 = vld [vmem:[%s4311_s2 + $0x38] sm:$0xff]  ;;  %v97_v12 = vpack.c.bf16 %v91_v6, %v90_v4  ;;  %v3335_v14 = vld [vmem:[%s4314_s5] sm:$0xff]   ;;  %s3194_s6 = smov 48   ;;  %s3195_s3 = smov [#allocation9]  }
  0x3b   :  { %2620 = vmatprep.mubr.msk.bf16.mxu0 %vm123_vm0, %v96_v5  ;;  %v99_v13 = vpack.c.bf16 %v95_v11, %v94_v10  ;;  %v3345_v16 = vld [vmem:[%s4314_s5 + $0x8] sm:$0xff]   ;;  %2800 = vset.pattern.permute.xlu0 %v3190_v18  ;;  %v2425_v20 = vld [vmem:[#allocation3] ss:$0 sm:$0xff]  ;;  %v3380_v51 = vld [vmem:[%s4309_s0] sm:$0xff]  ;;  %s3192_s0 = smov 16   ;;  %s2412_s25 = sshll.u32 %s3195_s3, 4  ;;  %s2413_s25 = int_to_ptr.vmem [resolvable:$true] %s2412_s25 }
  0x3c   :  { %2624 = vmatprep.mubr.msk.bf16.mxu1 %vm123_vm0, %v98_v9  ;;  %2801 = vset.pattern.permute.xlu1 %v3190_v18  ;;  %vm80_vm2 = vcmp.gt.s32.totalorder %v3380_v51, 0  ;;  %vm87_vm3 = vcmp.gt.s32.totalorder %v3380_v51, 7  ;;  %vm86_vm7 = vcmp.gt.s32.totalorder %v3380_v51, 6  ;;  %vm81_vm8 = vcmp.gt.s32.totalorder %v3380_v51, 1  ;;  %s3154_s12 = scalar_lea.vmem %s2413_s25, 1024  ;;  %p3159_p11 = scmp.lt.s32.totalorder %s2413_s25, %s2413_s25 }
  0x3d   :  { %2619 = vmatpush3.bf16.msra.mxu0 %v2823_v1  ;;  %2783 = vmatpush3.bf16.msra.mxu1 %v2823_v1  ;;  %v332_v53 = vsel %vm80_vm2, 1, %v3190_v18  ;;  %v339_v2 = vsel %vm87_vm3, 1, %v3190_v18  ;;  %vm82_vm11 = vcmp.gt.s32.totalorder %v3380_v51, 2  ;;  %vm85_vm12 = vcmp.gt.s32.totalorder %v3380_v51, 5  ;;  %p3155_p10 = scmp.ne.s32.totalorder %s2413_s25, %s3154_s12  ;;  %p3160_p12 = scmp.lt.s32.totalorder %s3154_s12, %s3154_s12 }
  0x3e   :  { %2628 = vmatprep.subr.bf16.mxu1 %v3187_v15  ;;  %2644 = vmatprep.subr.bf16.mxu0 %v3187_v15  ;;  %vm84_vm15 = vcmp.gt.s32.totalorder %v3380_v51, 4 }
  0x3f   :  { %p3161_p13 = por %p3160_p12, %p3159_p11 }
  0x40   :  { %2621 = vmatmul.mubr.msk.bf16.vlgmr.msra.gmra.mrb[0].mxu0 %vm123_vm0, %v97_v12  ;;  %2625 = vmatmul.mubr.msk.bf16.vlgmr.msra.gmra.mrb[0].mxu1 %vm123_vm0, %v99_v13 }
  0x41   :  { %2629 = vmatpush3.bf16.msra.mxu1 %v3335_v14  ;;  %2632 = vmatprep.mubr.msk.bf16.mxu1 %vm3188_vm1, %v3187_v15  ;;  %p3162_p0 = pnand %p3161_p13, %p3155_p10 }
  0x42   :  { %2630 = vmatprep.subr.bf16.mxu1 %v3187_v15  ;;  %2645 = vmatpush3.bf16.msra.mxu0 %v3335_v14 }
  0x43   :  { %2646 = vmatprep.subr.bf16.mxu0 %v3187_v15  ;;  %2648 = vmatprep.mubr.msk.bf16.mxu0 %vm3188_vm1, %v3187_v15 }
  0x45   :  { %2631 = vmatpush3.bf16.msra.mxu1 %v3345_v16 }
  0x46   :  { %2636 = vmatprep.subr.bf16.mxu1 %v3187_v15  ;;  %2647 = vmatpush3.bf16.msra.mxu0 %v3345_v16 }
  0x47   :  { %2660 = vmatprep.subr.bf16.mxu0 %v3187_v15 }
  0x48   :  { %2633 = vmatmul.mubr.bf16.vlgmr.msra.gmra.mrb[4].mxu1 %v3189_v17 }
  0x49   :  { %2637 = vmatpush3.bf16.msra.mxu1 %v3335_v14  ;;  %2640 = vmatprep.mubr.msk.bf16.mxu1 %vm3188_vm1, %v3187_v15 }
  0x4a   :  { %2638 = vmatprep.subr.bf16.mxu1 %v3187_v15 }
  0x4d   :  { %2639 = vmatpush3.bf16.msra.mxu1 %v3345_v16 }
  0x4e   :  { %2652 = vmatprep.subr.bf16.mxu1 %v3187_v15 }
 0x113   :  { %v2622_v19 = vpop.f32.mrb[0].mxu0  ;;  %v2626_v21 = vpop.f32.mrb[0].mxu1 }
 0x114   :  { %v170_v22 = vpop.f32.mrb[1].mxu0  ;;  %v195_v23 = vadd.f32 %v2626_v21, %v2425_v20  ;;  %v186_v24 = vpop.f32.mrb[1].mxu1  ;;  %v179_v28 = vadd.f32 %v2622_v19, %v2425_v20 }
 0x115   :  { %v2623_v25 = vpop.f32.mrb[2].mxu0  ;;  %v187_v26 = vadd.f32 %v2425_v20, %v186_v24  ;;  %v2627_v27 = vpop.f32.mrb[2].mxu1  ;;  %v171_v33 = vadd.f32 %v2425_v20, %v170_v22 }
 0x116   :  { %v182_v29 = vadd.f32 %v2623_v25, %v2425_v20  ;;  %v173_v30 = vpop.f32.mrb[3].mxu0  ;;  %v198_v31 = vadd.f32 %v2627_v27, %v2425_v20  ;;  %v189_v32 = vpop.f32.mrb[3].mxu1 }
 0x117   :  { %v174_v34 = vadd.f32 %v2425_v20, %v173_v30  ;;  %v190_v35 = vadd.f32 %v2425_v20, %v189_v32 }
 0x118   :  { %v2512_v36 = vpack.c.bf16 %v182_v29, %v179_v28  ;;  %v2522_v37 = vpack.c.bf16 %v198_v31, %v195_v23 }
 0x119   :  { %v2507_v38 = vpack.c.bf16 %v174_v34, %v171_v33  ;;  %v2517_v39 = vpack.c.bf16 %v190_v35, %v187_v26  ;;  %v3443_v35 = vsel %vm87_vm3, 1.0, %v3187_v15 }
 0x11a   :  { %2544 = vst [vmem:[#allocation2 + $0x8] sm:$0xff] %v2512_v36   ;;  %2546 = vst [vmem:[#allocation2 + $0x18] sm:$0xff] %v2522_v37   ;;  %v3449_v37 = vsel %vm86_vm7, 1.0, %v3187_v15 }
 0x11b   :  { %2508 = vst [vmem:[#allocation2] sm:$0xff] %v2507_v38   ;;  %2545 = vst [vmem:[#allocation2 + $0x10] sm:$0xff] %v2517_v39   ;;  %v271_v40 = vpop.f32.mrb[4].mxu1  ;;  %v3454_v38 = vsel %vm80_vm2, 1.0, %v3187_v15  ;;  %vm83_vm2 = vcmp.gt.s32.totalorder %v3380_v51, 3 }
 0x11c   :  { %v2634_v41 = vpop.f32.mrb[5].mxu1 }
 0x11d   :  { %v274_v42 = vpop.f32.mrb[6].mxu1 }
 0x11e   :  { %v2635_v43 = vpop.f32.mrb[7].mxu1 }
 0x121   :  { %v3367_v44 = vld [vmem:[#allocation2 + $0x18] sm:$0xff]  }
 0x122   :  { %v3369_v45 = vld [vmem:[#allocation2] sm:$0xff]   ;;  %v282_v47 = vunpack.c.h.bf16 %v3367_v44  ;;  %v406_v29 = vunpack.c.l.bf16 %v3367_v44 }
 0x123   :  { %v278_v46 = vunpack.c.l.bf16 %v3369_v45  ;;  %v402_v28 = vunpack.c.h.bf16 %v3369_v45 }
 0x124   :  { %v283_v49 = vadd.f32 %v282_v47, %v271_v40 }
 0x125   :  { %v279_v48 = vadd.f32 %v278_v46, %v271_v40  ;;  %v3462_v40 = vsel %vm81_vm8, 1.0, %v3187_v15 }
 0x126   :  { %v2435_v55 = vmul.f32 -1.442695, %v283_v49  ;;  %v2802_v41 = vpack.i.bf16 %v3462_v40, %v3454_v38  ;;  %v2328_v38 = vld [vmem:[%s4310_s1 + $0x8] sm:$0xff] }
 0x127   :  { %2832 = vtanh.f32 %v279_v48  ;;  %v2434_v54 = vmul.f32 -1.442695, %v279_v48 }
 0x128   :  { %2834 = vtanh.f32 %v283_v49 }
 0x129   :  { %2836 = vpow2.f32 %v2434_v54 }
 0x12a   :  { %2838 = vpow2.f32 %v2435_v55 }
 0x131   :  { %v2833_v50 = vpop.eup %2832 }
 0x132   :  { %293 = vrot.lane.b32.xlu0 %v2833_v50, %s3191_s22  ;;  %v2835_v52 = vpop.eup %2834 }
 0x133   :  { %v2837_v56 = vpop.eup %2836 }
 0x134   :  { %v287_v57 = vadd.f32 1.0, %v2837_v56  ;;  %v2839_v58 = vpop.eup %2838 }
 0x135   :  { %v311_v59 = vadd.f32 1.0, %v2839_v58 }
 0x136   :  { %317 = vrot.lane.b32.xlu0 %v2835_v52, %s3191_s22  ;;  %2840 = vrcp.f32 %v287_v57 }
 0x137   :  { %2842 = vrcp.f32 %v311_v59 }
 0x13a   :  { %334 = vperm.xlu0 %2800, %v332_v53  }
 0x140   :  { %v2841_v60 = vpop.eup %2840 }
 0x141   :  { %v2843_v63 = vpop.eup %2842  ;;  %v291_v3 = vmul.f32 0.0, %v2841_v60 }
 0x142   :  { %v315_v6 = vmul.f32 0.0, %v2843_v63 }
 0x1a4   :  { %v294_v61 = vpop.permute.xlu0 %293 }
 0x1a5   :  { %v296_v62 = vmul.f32 %v2841_v60, %v294_v61  ;;  %v456_v61 = vsel %vm81_vm8, 1, %v3190_v18 }
 0x1a7   :  { %298 = vrot.lane.b32.xlu1 %v296_v62, %s3192_s0  ;;  %v463_v62 = vsel %vm86_vm7, 1, %v3190_v18 }
 0x1a8   :  { %v318_v0 = vpop.permute.xlu0 %317 }
 0x1a9   :  { %v320_v1 = vmul.f32 %v2843_v63, %v318_v0 }
 0x1ab   :  { %322 = vrot.lane.b32.xlu1 %v320_v1, %s3192_s0 }
 0x1af   :  { %341 = vperm.xlu1 %2801, %v339_v2  }
 0x1b9   :  { %v3404_v12 = vpop.permute.xlu0 %334 }
 0x1ba   :  { %vm336_vm4 = vcmp.eq.s32.totalorder %v3404_v12, 1  ;;  %v2329_v12 = vld [vmem:[%s4310_s1 + $0x10] sm:$0xff] }
 0x219   :  { %v299_v4 = vpop.permute.xlu1 %298 }
 0x21a   :  { %v3394_v5 = vadd.f32 %v299_v4, %v291_v3 }
 0x21c   :  { %2844 = vtanh.f32 %v3394_v5 }
 0x21d   :  { %v323_v7 = vpop.permute.xlu1 %322 }
 0x21e   :  { %v3397_v8 = vadd.f32 %v323_v7, %v315_v6 }
 0x220   :  { %2846 = vtanh.f32 %v3397_v8 }
 0x226   :  { %v2845_v9 = vpop.eup %2844 }
 0x227   :  { %304 = vrot.lane.b32.xlu1 %v2845_v9, %s3192_s0 }
 0x22a   :  { %v2847_v10 = vpop.eup %2846 }
 0x22b   :  { %328 = vrot.lane.b32.xlu0 %v2847_v10, %s3192_s0 }
 0x22e   :  { %v3402_v11 = vpop.permute.xlu1 %341 }
 0x22f   :  { %vm343_vm5 = vcmp.eq.s32.totalorder %v3402_v11, 1  ;;  %v2332_v11 = vld [vmem:[%s4310_s1 + $0x28] sm:$0xff] }
 0x230   :  { %v3484_v0 = vsel %vm343_vm5, %v3397_v8, 0.0 }
 0x299   :  { %v305_v13 = vpop.permute.xlu1 %304 }
 0x29a   :  { %v307_v19 = vmul.f32 %v2841_v60, %v305_v13 }
 0x29c   :  { %v3409_v20 = vsel %vm336_vm4, %v307_v19, 0.0 }
 0x29d   :  { %347 = vrot.lane.b32.xlu1 %v3409_v20, %s3193_s23  ;;  %v329_v21 = vpop.permute.xlu0 %328 }
 0x29e   :  { %v331_v22 = vmul.f32 %v2843_v63, %v329_v21  ;;  %v3479_v63 = vsel %vm336_vm4, %v3394_v5, 0.0 }
 0x2a0   :  { %v3416_v23 = vsel %vm343_vm5, %v331_v22, 0.0 }
 0x2a1   :  { %351 = vrot.lane.b32.xlu0 %v3416_v23, %s3194_s6 }
 0x30f   :  { %v3420_v24 = vpop.permute.xlu1 %347 }
 0x313   :  { %v3422_v25 = vpop.permute.xlu0 %351 }
 0x314   :  { %v355_v26 = vsel %vm354_vm6, %v3420_v24, %v3422_v25 }
 0x315   :  { %v356_v27 = vpack.c.bf16 %v355_v26, %v355_v26 }
 0x317   :  { %2641 = vmatmul.mubr.msk.bf16.vlgmr.msra.gmra.mrb[8].mxu1 %vm123_vm0, %v356_v27 }
 0x318   :  { %2653 = vmatpush3.bf16.msra.mxu1 %v3335_v14  ;;  %2656 = vmatprep.mubr.msk.bf16.mxu1 %vm3188_vm1, %v3187_v15 }
 0x319   :  { %2654 = vmatprep.subr.bf16.mxu1 %v3187_v15 }
 0x31c   :  { %2655 = vmatpush3.bf16.msra.mxu1 %v3345_v16 }
 0x31d   :  { %2668 = vmatprep.subr.bf16.mxu1 %v3187_v15 }
 0x3ea   :  { %v394_v30 = vpop.f32.mrb[8].mxu1 }
 0x3eb   :  { %v403_v31 = vadd.f32 %v402_v28, %v394_v30  ;;  %v407_v32 = vadd.f32 %v406_v29, %v394_v30  ;;  %v2642_v33 = vpop.f32.mrb[9].mxu1 }
 0x3ec   :  { %v397_v34 = vpop.f32.mrb[10].mxu1  ;;  %v3532_v33 = vld [vmem:[#allocation2 + $0x10] sm:$0xff]  }
 0x3ed   :  { %2848 = vtanh.f32 %v403_v31  ;;  %v2643_v36 = vpop.f32.mrb[11].mxu1  ;;  %v2437_v48 = vmul.f32 -1.442695, %v403_v31  ;;  %v2438_v49 = vmul.f32 -1.442695, %v407_v32 }
 0x3ee   :  { %2850 = vtanh.f32 %v407_v32  ;;  %v529_v36 = vunpack.c.h.bf16 %v3532_v33 }
 0x3ef   :  { %2852 = vpow2.f32 %v2437_v48 }
 0x3f0   :  { %2854 = vpow2.f32 %v2438_v49 }
 0x3f7   :  { %v2849_v42 = vpop.eup %2848 }
 0x3f8   :  { %v2851_v43 = vpop.eup %2850  ;;  %417 = vrot.lane.b32.xlu1 %v2849_v42, %s3191_s22 }
 0x3f9   :  { %441 = vrot.lane.b32.xlu0 %v2851_v43, %s3191_s22  ;;  %v2853_v50 = vpop.eup %2852 }
 0x3fa   :  { %v2855_v52 = vpop.eup %2854  ;;  %v411_v53 = vadd.f32 1.0, %v2853_v50 }
 0x3fb   :  { %v435_v54 = vadd.f32 1.0, %v2855_v52 }
 0x3fc   :  { %2856 = vrcp.f32 %v411_v53 }
 0x3fd   :  { %2858 = vrcp.f32 %v435_v54 }
 0x406   :  { %v2857_v55 = vpop.eup %2856 }
 0x407   :  { %v2859_v57 = vpop.eup %2858  ;;  %v415_v1 = vmul.f32 %v2857_v55, %v3479_v63 }
 0x408   :  { %v439_v2 = vmul.f32 %v2859_v57, %v3484_v0 }
 0x46a   :  { %v418_v56 = vpop.permute.xlu1 %417 }
 0x46b   :  { %v442_v58 = vpop.permute.xlu0 %441  ;;  %v420_v59 = vmul.f32 %v2857_v55, %v418_v56 }
 0x46c   :  { %v444_v60 = vmul.f32 %v2859_v57, %v442_v58 }
 0x46d   :  { %422 = vrot.lane.b32.xlu1 %v420_v59, %s3192_s0 }
 0x46e   :  { %446 = vrot.lane.b32.xlu0 %v444_v60, %s3192_s0 }
 0x471   :  { %458 = vperm.xlu1 %2801, %v456_v61  }
 0x472   :  { %465 = vperm.xlu0 %2800, %v463_v62  }
 0x4df   :  { %v423_v3 = vpop.permute.xlu1 %422 }
 0x4e0   :  { %v447_v4 = vpop.permute.xlu0 %446  ;;  %v3488_v6 = vadd.f32 %v423_v3, %v415_v1 }
 0x4e1   :  { %v3490_v7 = vadd.f32 %v447_v4, %v439_v2 }
 0x4e2   :  { %2860 = vtanh.f32 %v3488_v6 }
 0x4e3   :  { %2862 = vtanh.f32 %v3490_v7 }
 0x4ec   :  { %v2861_v5 = vpop.eup %2860 }
 0x4ed   :  { %v2863_v9 = vpop.eup %2862  ;;  %428 = vrot.lane.b32.xlu1 %v2861_v5, %s3192_s0  ;;  %v579_v5 = vsel %vm82_vm11, 1, %v3190_v18 }
 0x4ee   :  { %452 = vrot.lane.b32.xlu0 %v2863_v9, %s3192_s0  ;;  %v586_v9 = vsel %vm85_vm12, 1, %v3190_v18 }
 0x4f0   :  { %v3496_v8 = vpop.permute.xlu1 %458 }
 0x4f1   :  { %v3498_v10 = vpop.permute.xlu0 %465  ;;  %vm460_vm9 = vcmp.eq.s32.totalorder %v3496_v8, 1  ;;  %v2830_v8 = vld [vmem:[%s4318_s9] sm:$0xff]  }
 0x4f2   :  { %vm467_vm10 = vcmp.eq.s32.totalorder %v3498_v10, 1  ;;  %v2831_v10 = vld [vmem:[%s4318_s9 + $0x8] sm:$0xff]  }
 0x55f   :  { %v429_v13 = vpop.permute.xlu1 %428 }
 0x560   :  { %v453_v19 = vpop.permute.xlu0 %452  ;;  %v431_v21 = vmul.f32 %v2857_v55, %v429_v13  ;;  %v3556_v13 = vsel %vm460_vm9, %v3488_v6, %v3479_v63 }
 0x561   :  { %v455_v22 = vmul.f32 %v2859_v57, %v453_v19  ;;  %v3562_v19 = vsel %vm467_vm10, %v3490_v7, %v3484_v0 }
 0x562   :  { %v3505_v26 = vsel %vm460_vm9, %v431_v21, %v3409_v20 }
 0x563   :  { %v3510_v27 = vsel %vm467_vm10, %v455_v22, %v3416_v23  ;;  %471 = vrot.lane.b32.xlu1 %v3505_v26, %s3193_s23  ;;  %v3530_v23 = vld [vmem:[#allocation2 + $0x8] sm:$0xff]  }
 0x564   :  { %475 = vrot.lane.b32.xlu0 %v3510_v27, %s3194_s6  ;;  %v525_v34 = vunpack.c.l.bf16 %v3530_v23 }
 0x5d5   :  { %v3516_v30 = vpop.permute.xlu1 %471 }
 0x5d6   :  { %v3518_v31 = vpop.permute.xlu0 %475 }
 0x5d7   :  { %v478_v20 = vsel %vm354_vm6, %v3516_v30, %v3518_v31 }
 0x5d8   :  { %v479_v32 = vpack.c.bf16 %v478_v20, %v478_v20 }
 0x5da   :  { %2649 = vmatmul.mubr.msk.bf16.vlgmr.msra.gmra.mrb[4].mxu0 %vm123_vm0, %v479_v32 }
 0x5db   :  { %2661 = vmatpush3.bf16.msra.mxu0 %v3335_v14  ;;  %2664 = vmatprep.mubr.msk.bf16.mxu0 %vm3188_vm1, %v3187_v15 }
 0x5dc   :  { %2662 = vmatprep.subr.bf16.mxu0 %v3187_v15 }
 0x5df   :  { %2663 = vmatpush3.bf16.msra.mxu0 %v3345_v16 }
 0x5e0   :  { %2676 = vmatprep.subr.bf16.mxu0 %v3187_v15 }
 0x6ad   :  { %v517_v42 = vpop.f32.mrb[4].mxu0 }
 0x6ae   :  { %v526_v43 = vadd.f32 %v525_v34, %v517_v42  ;;  %v530_v48 = vadd.f32 %v529_v36, %v517_v42  ;;  %v2650_v49 = vpop.f32.mrb[5].mxu0 }
 0x6af   :  { %v520_v50 = vpop.f32.mrb[6].mxu0 }
 0x6b0   :  { %2864 = vtanh.f32 %v526_v43  ;;  %v2651_v52 = vpop.f32.mrb[7].mxu0  ;;  %v2440_v55 = vmul.f32 -1.442695, %v526_v43  ;;  %v2441_v56 = vmul.f32 -1.442695, %v530_v48 }
 0x6b1   :  { %2866 = vtanh.f32 %v530_v48 }
 0x6b2   :  { %2868 = vpow2.f32 %v2440_v55 }
 0x6b3   :  { %2870 = vpow2.f32 %v2441_v56 }
 0x6ba   :  { %v2865_v53 = vpop.eup %2864 }
 0x6bb   :  { %v2867_v54 = vpop.eup %2866  ;;  %540 = vrot.lane.b32.xlu1 %v2865_v53, %s3191_s22 }
 0x6bc   :  { %564 = vrot.lane.b32.xlu0 %v2867_v54, %s3191_s22  ;;  %v2869_v57 = vpop.eup %2868 }
 0x6bd   :  { %v2871_v58 = vpop.eup %2870  ;;  %v534_v59 = vadd.f32 1.0, %v2869_v57 }
 0x6be   :  { %v558_v60 = vadd.f32 1.0, %v2871_v58  ;;  %v652_v58 = vunpack.c.l.bf16 %v3532_v33 }
 0x6bf   :  { %2872 = vrcp.f32 %v534_v59 }
 0x6c0   :  { %2874 = vrcp.f32 %v558_v60 }
 0x6c9   :  { %v2873_v61 = vpop.eup %2872 }
 0x6ca   :  { %v2875_v1 = vpop.eup %2874  ;;  %v538_v21 = vmul.f32 %v2873_v61, %v3556_v13 }
 0x6cb   :  { %v562_v22 = vmul.f32 %v2875_v1, %v3562_v19 }
 0x72d   :  { %v541_v62 = vpop.permute.xlu1 %540 }
 0x72e   :  { %v565_v2 = vpop.permute.xlu0 %564  ;;  %v543_v3 = vmul.f32 %v2873_v61, %v541_v62 }
 0x72f   :  { %v567_v4 = vmul.f32 %v2875_v1, %v565_v2  ;;  %v3617_v2 = vsel %vm85_vm12, 1.0, %v3187_v15 }
 0x730   :  { %545 = vrot.lane.b32.xlu1 %v543_v3, %s3192_s0 }
 0x731   :  { %569 = vrot.lane.b32.xlu0 %v567_v4, %s3192_s0  ;;  %v3623_v4 = vsel %vm84_vm15, 1.0, %v3187_v15 }
 0x734   :  { %581 = vperm.xlu1 %2801, %v579_v5   ;;  %v3628_v5 = vsel %vm82_vm11, 1.0, %v3187_v15 }
 0x735   :  { %588 = vperm.xlu0 %2800, %v586_v9   ;;  %v2812_v9 = vpack.i.bf16 %v3617_v2, %v3623_v4 }
 0x7a2   :  { %v546_v20 = vpop.permute.xlu1 %545 }
 0x7a3   :  { %v570_v32 = vpop.permute.xlu0 %569  ;;  %v3566_v42 = vadd.f32 %v546_v20, %v538_v21  ;;  %v3636_v21 = vsel %vm83_vm2, 1.0, %v3187_v15 }
 0x7a4   :  { %v3568_v43 = vadd.f32 %v570_v32, %v562_v22  ;;  %v2807_v22 = vpack.i.bf16 %v3636_v21, %v3628_v5 }
 0x7a5   :  { %2876 = vtanh.f32 %v3566_v42 }
 0x7a6   :  { %2878 = vtanh.f32 %v3568_v43 }
 0x7af   :  { %v2877_v63 = vpop.eup %2876 }
 0x7b0   :  { %v2879_v6 = vpop.eup %2878  ;;  %551 = vrot.lane.b32.xlu1 %v2877_v63, %s3192_s0 }
 0x7b1   :  { %575 = vrot.lane.b32.xlu0 %v2879_v6, %s3192_s0 }
 0x7b3   :  { %v3574_v0 = vpop.permute.xlu1 %581 }
 0x7b4   :  { %v3576_v7 = vpop.permute.xlu0 %588  ;;  %vm583_vm13 = vcmp.eq.s32.totalorder %v3574_v0, 1 }
 0x7b5   :  { %vm590_vm14 = vcmp.eq.s32.totalorder %v3576_v7, 1 }
 0x822   :  { %v552_v48 = vpop.permute.xlu1 %551 }
 0x823   :  { %v576_v49 = vpop.permute.xlu0 %575  ;;  %v554_v50 = vmul.f32 %v2873_v61, %v552_v48 }
 0x824   :  { %v578_v52 = vmul.f32 %v2875_v1, %v576_v49 }
 0x825   :  { %v3583_v53 = vsel %vm583_vm13, %v554_v50, %v3505_v26 }
 0x826   :  { %v3588_v54 = vsel %vm590_vm14, %v578_v52, %v3510_v27  ;;  %594 = vrot.lane.b32.xlu1 %v3583_v53, %s3193_s23  ;;  %v648_v27 = vunpack.c.h.bf16 %v3530_v23 }
 0x827   :  { %598 = vrot.lane.b32.xlu0 %v3588_v54, %s3194_s6 }
 0x898   :  { %v3594_v55 = vpop.permute.xlu1 %594 }
 0x899   :  { %v3596_v56 = vpop.permute.xlu0 %598 }
 0x89a   :  { %v601_v26 = vsel %vm354_vm6, %v3594_v55, %v3596_v56 }
 0x89b   :  { %v602_v57 = vpack.c.bf16 %v601_v26, %v601_v26 }
 0x89d   :  { %2657 = vmatmul.mubr.msk.bf16.vlgmr.msra.gmra.mrb[12].mxu1 %vm123_vm0, %v602_v57 }
 0x89e   :  { %2669 = vmatpush3.bf16.msra.mxu1 %v3335_v14  ;;  %2672 = vmatprep.mubr.msk.bf16.mxu1 %vm3188_vm1, %v3187_v15 }
 0x89f   :  { %2670 = vmatprep.subr.bf16.mxu1 %v3187_v15 }
 0x8a2   :  { %2671 = vmatpush3.bf16.msra.mxu1 %v3345_v16 }
 0x8a3   :  { %2684 = vmatprep.subr.bf16.mxu1 %v3187_v15 }
 0x970   :  { %v640_v59 = vpop.f32.mrb[12].mxu1 }
 0x971   :  { %v649_v60 = vadd.f32 %v648_v27, %v640_v59  ;;  %v653_v61 = vadd.f32 %v652_v58, %v640_v59  ;;  %v2658_v62 = vpop.f32.mrb[13].mxu1 }
 0x972   :  { %v643_v1 = vpop.f32.mrb[14].mxu1 }
 0x973   :  { %2880 = vtanh.f32 %v649_v60  ;;  %v2659_v3 = vpop.f32.mrb[15].mxu1  ;;  %v2443_v63 = vmul.f32 -1.442695, %v649_v60  ;;  %v2444_v6 = vmul.f32 -1.442695, %v653_v61  ;;  %v702_v60 = vsel %vm83_vm2, 1, %v3190_v18 }
 0x974   :  { %2882 = vtanh.f32 %v653_v61  ;;  %v709_v61 = vsel %vm84_vm15, 1, %v3190_v18 }
 0x975   :  { %2884 = vpow2.f32 %v2443_v63 }
 0x976   :  { %2886 = vpow2.f32 %v2444_v6 }
 0x97d   :  { %v2881_v20 = vpop.eup %2880 }
 0x97e   :  { %v2883_v32 = vpop.eup %2882  ;;  %663 = vrot.lane.b32.xlu1 %v2881_v20, %s3191_s22  ;;  %v3654_v20 = vsel %vm583_vm13, %v3566_v42, %v3556_v13 }
 0x97f   :  { %687 = vrot.lane.b32.xlu0 %v2883_v32, %s3191_s22  ;;  %v2885_v48 = vpop.eup %2884  ;;  %v3660_v32 = vsel %vm590_vm14, %v3568_v43, %v3562_v19 }
 0x980   :  { %v2887_v49 = vpop.eup %2886  ;;  %v657_v50 = vadd.f32 1.0, %v2885_v48 }
 0x981   :  { %v681_v52 = vadd.f32 1.0, %v2887_v49 }
 0x982   :  { %2888 = vrcp.f32 %v657_v50 }
 0x983   :  { %2890 = vrcp.f32 %v681_v52 }
 0x98c   :  { %v2889_v26 = vpop.eup %2888 }
 0x98d   :  { %v2891_v59 = vpop.eup %2890  ;;  %v661_v63 = vmul.f32 %v2889_v26, %v3654_v20 }
 0x98e   :  { %v685_v6 = vmul.f32 %v2891_v59, %v3660_v32 }
 0x9f0   :  { %v664_v57 = vpop.permute.xlu1 %663 }
 0x9f1   :  { %v688_v62 = vpop.permute.xlu0 %687  ;;  %v666_v1 = vmul.f32 %v2889_v26, %v664_v57 }
 0x9f2   :  { %v690_v3 = vmul.f32 %v2891_v59, %v688_v62 }
 0x9f3   :  { %668 = vrot.lane.b32.xlu1 %v666_v1, %s3192_s0 }
 0x9f4   :  { %692 = vrot.lane.b32.xlu0 %v690_v3, %s3192_s0 }
 0x9f7   :  { %704 = vperm.xlu1 %2801, %v702_v60  }
 0x9f8   :  { %711 = vperm.xlu0 %2800, %v709_v61  }
 0xa65   :  { %v669_v51 = vpop.permute.xlu1 %668 }
 0xa66   :  { %v693_v48 = vpop.permute.xlu0 %692  ;;  %v671_v49 = vadd.f32 %v669_v51, %v661_v63 }
 0xa67   :  { %v695_v50 = vadd.f32 %v693_v48, %v685_v6 }
 0xa68   :  { %2892 = vtanh.f32 %v671_v49 }
 0xa69   :  { %2894 = vtanh.f32 %v695_v50 }
 0xa72   :  { %v2893_v52 = vpop.eup %2892 }
 0xa73   :  { %v2895_v57 = vpop.eup %2894  ;;  %674 = vrot.lane.b32.xlu1 %v2893_v52, %s3192_s0 }
 0xa74   :  { %698 = vrot.lane.b32.xlu0 %v2895_v57, %s3192_s0 }
 0xa76   :  { %v3666_v13 = vpop.permute.xlu1 %704 }
 0xa77   :  { %v3668_v19 = vpop.permute.xlu0 %711  ;;  %vm706_vm3 = vcmp.eq.s32.totalorder %v3666_v13, 1 }
 0xa78   :  { %vm713_vm7 = vcmp.eq.s32.totalorder %v3668_v19, 1 }
 0xae5   :  { %v675_v42 = vpop.permute.xlu1 %674 }
 0xae6   :  { %v699_v43 = vpop.permute.xlu0 %698  ;;  %v677_v62 = vmul.f32 %v2889_v26, %v675_v42 }
 0xae7   :  { %v701_v1 = vmul.f32 %v2891_v59, %v699_v43 }
 0xae8   :  { %v707_v3 = vsel %vm706_vm3, %v677_v62, %v3583_v53 }
 0xae9   :  { %v714_v60 = vsel %vm713_vm7, %v701_v1, %v3588_v54  ;;  %717 = vrot.lane.b32.xlu1 %v707_v3, %s3193_s23 }
 0xaea   :  { %721 = vrot.lane.b32.xlu0 %v714_v60, %s3194_s6 }
 0xb5b   :  { %v3680_v61 = vpop.permute.xlu1 %717 }
 0xb5c   :  { %v3682_v26 = vpop.permute.xlu0 %721 }
 0xb5d   :  { %v724_v59 = vsel %vm354_vm6, %v3680_v61, %v3682_v26 }
 0xb5e   :  { %v725_v63 = vpack.c.bf16 %v724_v59, %v724_v59 }
 0xb60   :  { %2665 = vmatmul.mubr.msk.bf16.vlgmr.msra.gmra.mrb[8].mxu0 %vm123_vm0, %v725_v63 }
 0xb61   :  { %2677 = vmatpush3.bf16.msra.mxu0 %v3335_v14  ;;  %2680 = vmatprep.mubr.msk.bf16.mxu0 %vm3188_vm1, %v3187_v15 }
 0xb62   :  { %2678 = vmatprep.subr.bf16.mxu0 %v3187_v15 }
 0xb65   :  { %2679 = vmatpush3.bf16.msra.mxu0 %v3345_v16 }
 0xc33   :  { %v763_v53 = vpop.f32.mrb[8].mxu0 }
 0xc34   :  { %v769_v54 = vadd.f32 %v763_v53, %v652_v58  ;;  %v770_v6 = vadd.f32 %v763_v53, %v648_v27  ;;  %v2666_v51 = vpop.f32.mrb[9].mxu0 }
 0xc35   :  { %v766_v48 = vpop.f32.mrb[10].mxu0 }
 0xc36   :  { %2896 = vtanh.f32 %v769_v54  ;;  %v2667_v52 = vpop.f32.mrb[11].mxu0  ;;  %v2446_v43 = vmul.f32 -1.442695, %v769_v54  ;;  %v2447_v62 = vmul.f32 -1.442695, %v770_v6  ;;  %v3704_v54 = vsel %vm706_vm3, %v671_v49, %v3654_v20 }
 0xc37   :  { %2898 = vtanh.f32 %v770_v6  ;;  %v3709_v6 = vsel %vm713_vm7, %v695_v50, %v3660_v32 }
 0xc38   :  { %2900 = vpow2.f32 %v2446_v43 }
 0xc39   :  { %2902 = vpow2.f32 %v2447_v62 }
 0xc40   :  { %v2897_v57 = vpop.eup %2896 }
 0xc41   :  { %v2899_v42 = vpop.eup %2898  ;;  %780 = vrot.lane.b32.xlu1 %v2897_v57, %s3191_s22 }
 0xc42   :  { %804 = vrot.lane.b32.xlu0 %v2899_v42, %s3191_s22  ;;  %v2901_v1 = vpop.eup %2900 }
 0xc43   :  { %v2903_v58 = vpop.eup %2902  ;;  %v774_v59 = vadd.f32 1.0, %v2901_v1 }
 0xc44   :  { %v798_v63 = vadd.f32 1.0, %v2903_v58 }
 0xc45   :  { %2904 = vrcp.f32 %v774_v59 }
 0xc46   :  { %2906 = vrcp.f32 %v798_v63 }
 0xc4f   :  { %v2905_v27 = vpop.eup %2904 }
 0xc50   :  { %v2907_v51 = vpop.eup %2906  ;;  %v778_v57 = vmul.f32 %v2905_v27, %v3704_v54 }
 0xc51   :  { %v802_v42 = vmul.f32 %v2907_v51, %v3709_v6 }
 0xcb3   :  { %v781_v53 = vpop.permute.xlu1 %780 }
 0xcb4   :  { %v805_v48 = vpop.permute.xlu0 %804  ;;  %v783_v52 = vmul.f32 %v2905_v27, %v781_v53 }
 0xcb5   :  { %v807_v39 = vmul.f32 %v2907_v51, %v805_v48 }
 0xcb6   :  { %785 = vrot.lane.b32.xlu1 %v783_v52, %s3192_s0 }
 0xcb7   :  { %809 = vrot.lane.b32.xlu0 %v807_v39, %s3192_s0 }
 0xd28   :  { %v786_v43 = vpop.permute.xlu1 %785 }
 0xd29   :  { %v810_v62 = vpop.permute.xlu0 %809  ;;  %v788_v1 = vadd.f32 %v786_v43, %v778_v57 }
 0xd2a   :  { %v812_v58 = vadd.f32 %v810_v62, %v802_v42 }
 0xd2b   :  { %2908 = vtanh.f32 %v788_v1 }
 0xd2c   :  { %2910 = vtanh.f32 %v812_v58 }
 0xd35   :  { %v2909_v39 = vpop.eup %2908 }
 0xd36   :  { %v2911_v59 = vpop.eup %2910  ;;  %791 = vrot.lane.b32.xlu1 %v2909_v39, %s3192_s0 }
 0xd37   :  { %815 = vrot.lane.b32.xlu0 %v2911_v59, %s3192_s0 }
 0xda8   :  { %v792_v20 = vpop.permute.xlu1 %791 }
 0xda9   :  { %v816_v49 = vpop.permute.xlu0 %815  ;;  %v794_v32 = vmul.f32 %v2905_v27, %v792_v20 }
 0xdaa   :  { %v818_v50 = vmul.f32 %v2907_v51, %v816_v49 }
 0xdab   :  { %v3717_v63 = vsel %vm713_vm7, %v794_v32, %v707_v3 }
 0xdac   :  { %v3721_v53 = vsel %vm706_vm3, %v818_v50, %v714_v60  ;;  %824 = vrot.lane.b32.xlu1 %v3717_v63, %s3193_s23 }
 0xdad   :  { %828 = vrot.lane.b32.xlu0 %v3721_v53, %s3194_s6 }
 0xe1e   :  { %v3727_v48 = vpop.permute.xlu1 %824 }
 0xe1f   :  { %v3729_v52 = vpop.permute.xlu0 %828 }
 0xe20   :  { %v831_v27 = vsel %vm354_vm6, %v3727_v48, %v3729_v52 }
 0xe21   :  { %v832_v3 = vpack.c.bf16 %v831_v27, %v831_v27 }
 0xe23   :  { %2673 = vmatmul.mubr.msk.bf16.vlgmr.msra.gmra.mrb[16].mxu1 %vm123_vm0, %v832_v3 }
 0xe24   :  { %2685 = vmatpush3.bf16.msra.mxu1 %v3335_v14  ;;  %2688 = vmatprep.mubr.msk.bf16.mxu1 %vm3188_vm1, %v3187_v15 }
 0xe25   :  { %2686 = vmatprep.subr.bf16.mxu1 %v3187_v15 }
 0xe28   :  { %2687 = vmatpush3.bf16.msra.mxu1 %v3345_v16 }
 0xe29   :  { %2704 = vmatprep.subr.bf16.mxu1 %v3187_v15 }
 0xef6   :  { %v870_v60 = vpop.f32.mrb[16].mxu1 }
 0xef7   :  { %v876_v51 = vadd.f32 %v870_v60, %v529_v36  ;;  %v877_v57 = vadd.f32 %v870_v60, %v525_v34  ;;  %v2674_v42 = vpop.f32.mrb[17].mxu1  ;;  %v820_v60 = vsel %vm713_vm7, %v788_v1, %v3704_v54 }
 0xef8   :  { %v873_v43 = vpop.f32.mrb[18].mxu1 }
 0xef9   :  { %2912 = vtanh.f32 %v876_v51  ;;  %v2675_v14 = vpop.f32.mrb[19].mxu1  ;;  %v2449_v16 = vmul.f32 -1.442695, %v876_v51  ;;  %v2450_v59 = vmul.f32 -1.442695, %v877_v57  ;;  %v822_v51 = vsel %vm706_vm3, %v812_v58, %v3709_v6 }
 0xefa   :  { %2914 = vtanh.f32 %v877_v57 }
 0xefb   :  { %2916 = vpow2.f32 %v2449_v16 }
 0xefc   :  { %2918 = vpow2.f32 %v2450_v59 }
 0xf03   :  { %v2913_v62 = vpop.eup %2912 }
 0xf04   :  { %v2915_v39 = vpop.eup %2914  ;;  %887 = vrot.lane.b32.xlu1 %v2913_v62, %s3191_s22 }
 0xf05   :  { %911 = vrot.lane.b32.xlu0 %v2915_v39, %s3191_s22  ;;  %v2917_v33 = vpop.eup %2916 }
 0xf06   :  { %v2919_v36 = vpop.eup %2918  ;;  %v881_v20 = vadd.f32 1.0, %v2917_v33 }
 0xf07   :  { %v905_v23 = vadd.f32 1.0, %v2919_v36 }
 0xf08   :  { %2920 = vrcp.f32 %v881_v20 }
 0xf09   :  { %2922 = vrcp.f32 %v905_v23 }
 0xf12   :  { %v2921_v34 = vpop.eup %2920 }
 0xf13   :  { %v2923_v32 = vpop.eup %2922  ;;  %v885_v57 = vmul.f32 %v2921_v34, %v820_v60 }
 0xf14   :  { %v909_v42 = vmul.f32 %v2923_v32, %v822_v51 }
 0xf76   :  { %v888_v49 = vpop.permute.xlu1 %887 }
 0xf77   :  { %v912_v50 = vpop.permute.xlu0 %911  ;;  %v890_v27 = vmul.f32 %v2921_v34, %v888_v49 }
 0xf78   :  { %v914_v3 = vmul.f32 %v2923_v32, %v912_v50 }
 0xf79   :  { %892 = vrot.lane.b32.xlu1 %v890_v27, %s3192_s0 }
 0xf7a   :  { %916 = vrot.lane.b32.xlu0 %v914_v3, %s3192_s0 }
 0xfeb   :  { %v893_v43 = vpop.permute.xlu1 %892 }
 0xfec   :  { %v917_v14 = vpop.permute.xlu0 %916  ;;  %v895_v62 = vadd.f32 %v893_v43, %v885_v57 }
 0xfed   :  { %v919_v39 = vadd.f32 %v917_v14, %v909_v42 }
 0xfee   :  { %2924 = vtanh.f32 %v895_v62 }
 0xfef   :  { %2926 = vtanh.f32 %v919_v39 }
 0xff8   :  { %v2925_v16 = vpop.eup %2924 }
 0xff9   :  { %v2927_v59 = vpop.eup %2926  ;;  %898 = vrot.lane.b32.xlu1 %v2925_v16, %s3192_s0 }
 0xffa   :  { %922 = vrot.lane.b32.xlu0 %v2927_v59, %s3192_s0 }
0x106b   :  { %v899_v33 = vpop.permute.xlu1 %898 }
0x106c   :  { %v923_v54 = vpop.permute.xlu0 %922  ;;  %v901_v1 = vmul.f32 %v2921_v34, %v899_v33 }
0x106d   :  { %v925_v36 = vmul.f32 %v2923_v32, %v923_v54 }
0x106e   :  { %v926_v6 = vsel %vm590_vm14, %v901_v1, %v3717_v63 }
0x106f   :  { %v928_v58 = vsel %vm583_vm13, %v925_v36, %v3721_v53  ;;  %931 = vrot.lane.b32.xlu1 %v926_v6, %s3193_s23 }
0x1070   :  { %935 = vrot.lane.b32.xlu0 %v928_v58, %s3194_s6 }
0x10e1   :  { %v3765_v20 = vpop.permute.xlu1 %931 }
0x10e2   :  { %v3767_v23 = vpop.permute.xlu0 %935 }
0x10e3   :  { %v938_v34 = vsel %vm354_vm6, %v3765_v20, %v3767_v23 }
0x10e4   :  { %v939_v49 = vpack.c.bf16 %v938_v34, %v938_v34 }
0x10e6   :  { %2681 = vmatmul.mubr.msk.bf16.vlgmr.msra.gmra.mrb[12].mxu0 %vm123_vm0, %v939_v49 }
0x11b9   :  { %v977_v63 = vpop.f32.mrb[12].mxu0 }
0x11ba   :  { %v983_v32 = vadd.f32 %v977_v63, %v406_v29  ;;  %v984_v53 = vadd.f32 %v977_v63, %v402_v28  ;;  %v2682_v50 = vpop.f32.mrb[13].mxu0  ;;  %v927_v63 = vsel %vm590_vm14, %v895_v62, %v820_v60 }
0x11bb   :  { %v980_v27 = vpop.f32.mrb[14].mxu0 }
0x11bc   :  { %2928 = vtanh.f32 %v983_v32  ;;  %v2683_v3 = vpop.f32.mrb[15].mxu0  ;;  %v2452_v43 = vmul.f32 -1.442695, %v983_v32  ;;  %v2453_v14 = vmul.f32 -1.442695, %v984_v53  ;;  %v929_v32 = vsel %vm583_vm13, %v919_v39, %v822_v51 }
0x11bd   :  { %2930 = vtanh.f32 %v984_v53 }
0x11be   :  { %2932 = vpow2.f32 %v2452_v43 }
0x11bf   :  { %2934 = vpow2.f32 %v2453_v14 }
0x11c6   :  { %v2929_v57 = vpop.eup %2928 }
0x11c7   :  { %v2931_v42 = vpop.eup %2930  ;;  %994 = vrot.lane.b32.xlu1 %v2929_v57, %s3191_s22 }
0x11c8   :  { %1018 = vrot.lane.b32.xlu0 %v2931_v42, %s3191_s22  ;;  %v2933_v16 = vpop.eup %2932 }
0x11c9   :  { %v2935_v29 = vpop.eup %2934  ;;  %v988_v59 = vadd.f32 1.0, %v2933_v16 }
0x11ca   :  { %v1012_v33 = vadd.f32 1.0, %v2935_v29 }
0x11cb   :  { %2936 = vrcp.f32 %v988_v59 }
0x11cc   :  { %2938 = vrcp.f32 %v1012_v33 }
0x11d5   :  { %v2937_v28 = vpop.eup %2936 }
0x11d6   :  { %v2939_v1 = vpop.eup %2938  ;;  %v992_v53 = vmul.f32 %v2937_v28, %v927_v63 }
0x11d7   :  { %v1016_v50 = vmul.f32 %v2939_v1, %v929_v32 }
0x1239   :  { %v995_v54 = vpop.permute.xlu1 %994 }
0x123a   :  { %v1019_v36 = vpop.permute.xlu0 %1018  ;;  %v997_v34 = vmul.f32 %v2937_v28, %v995_v54 }
0x123b   :  { %v1021_v49 = vmul.f32 %v2939_v1, %v1019_v36 }
0x123c   :  { %999 = vrot.lane.b32.xlu1 %v997_v34, %s3192_s0 }
0x123d   :  { %1023 = vrot.lane.b32.xlu0 %v1021_v49, %s3192_s0 }
0x12ae   :  { %v1000_v27 = vpop.permute.xlu1 %999 }
0x12af   :  { %v1024_v3 = vpop.permute.xlu0 %1023  ;;  %v1002_v57 = vadd.f32 %v1000_v27, %v992_v53 }
0x12b0   :  { %v1026_v42 = vadd.f32 %v1024_v3, %v1016_v50 }
0x12b1   :  { %2940 = vtanh.f32 %v1002_v57 }
0x12b2   :  { %2942 = vtanh.f32 %v1026_v42 }
0x12bb   :  { %v2941_v43 = vpop.eup %2940 }
0x12bc   :  { %v2943_v14 = vpop.eup %2942  ;;  %1005 = vrot.lane.b32.xlu1 %v2941_v43, %s3192_s0 }
0x12bd   :  { %1029 = vrot.lane.b32.xlu0 %v2943_v14, %s3192_s0 }
0x132e   :  { %v1006_v16 = vpop.permute.xlu1 %1005 }
0x132f   :  { %v1030_v29 = vpop.permute.xlu0 %1029  ;;  %v1008_v60 = vmul.f32 %v2937_v28, %v1006_v16 }
0x1330   :  { %v1032_v62 = vmul.f32 %v2939_v1, %v1030_v29 }
0x1331   :  { %v3789_v51 = vsel %vm467_vm10, %v1008_v60, %v926_v6 }
0x1332   :  { %v3793_v39 = vsel %vm460_vm9, %v1032_v62, %v928_v58  ;;  %1038 = vrot.lane.b32.xlu1 %v3789_v51, %s3193_s23 }
0x1333   :  { %1042 = vrot.lane.b32.xlu0 %v3793_v39, %s3194_s6 }
0x13a4   :  { %v3799_v59 = vpop.permute.xlu1 %1038 }
0x13a5   :  { %v3801_v33 = vpop.permute.xlu0 %1042 }
0x13a6   :  { %v1045_v28 = vsel %vm354_vm6, %v3799_v59, %v3801_v33 }
0x13a7   :  { %v1046_v6 = vpack.c.bf16 %v1045_v28, %v1045_v28  ;;  %v1034_v28 = vsel %vm467_vm10, %v1002_v57, %v927_v63 }
0x13a9   :  { %2689 = vmatmul.mubr.msk.bf16.vlgmr.msra.gmra.mrb[20].mxu1 %vm123_vm0, %v1046_v6  ;;  %v1036_v6 = vsel %vm460_vm9, %v1026_v42, %v929_v32 }
0x13aa   :  { %2708 = vmatprep.mubr.msk.bf16.mxu1 %vm3188_vm1, %v3187_v15 }
0x147c   :  { %v1084_v58 = vpop.f32.mrb[20].mxu1 }
0x147d   :  { %v1090_v54 = vadd.f32 %v1084_v58, %v282_v47  ;;  %v1091_v1 = vadd.f32 %v1084_v58, %v278_v46  ;;  %v2690_v36 = vpop.f32.mrb[21].mxu1 }
0x147e   :  { %v1087_v34 = vpop.f32.mrb[22].mxu1 }
0x147f   :  { %2944 = vtanh.f32 %v1090_v54  ;;  %v2691_v49 = vpop.f32.mrb[23].mxu1  ;;  %v2455_v27 = vmul.f32 -1.442695, %v1090_v54  ;;  %v2456_v3 = vmul.f32 -1.442695, %v1091_v1 }
0x1480   :  { %2946 = vtanh.f32 %v1091_v1 }
0x1481   :  { %2948 = vpow2.f32 %v2455_v27 }
0x1482   :  { %2950 = vpow2.f32 %v2456_v3 }
0x1489   :  { %v2945_v53 = vpop.eup %2944 }
0x148a   :  { %v2947_v50 = vpop.eup %2946  ;;  %1101 = vrot.lane.b32.xlu0 %v2945_v53, %s3191_s22  ;;  %v2826_v53 = vld [vmem:[#allocation6] sm:$0xff]  }
0x148b   :  { %1125 = vrot.lane.b32.xlu1 %v2947_v50, %s3191_s22  ;;  %v2949_v44 = vpop.eup %2948  ;;  %v2827_v50 = vld [vmem:[#allocation6 + $0x8] sm:$0xff]   ;;  %2692 = vmatprep.subr.bf16.mxu0 %v2826_v53 }
0x148c   :  { %v2951_v47 = vpop.eup %2950  ;;  %v1095_v43 = vadd.f32 1.0, %v2949_v44  ;;  %2693 = vmatpush3.bf16.msra.mxu0 %v2826_v53 }
0x148d   :  { %v1119_v45 = vadd.f32 1.0, %v2951_v47  ;;  %2694 = vmatprep.subr.bf16.mxu0 %v2827_v50 }
0x148e   :  { %2952 = vrcp.f32 %v1095_v43  ;;  %v3831_v43 = vld [vmem:[#allocation8] sm:$0xff]  }
0x148f   :  { %2954 = vrcp.f32 %v1119_v45  ;;  %2705 = vmatpush3.bf16.msra.mxu1 %v3831_v43  ;;  %v3835_v45 = vld [vmem:[#allocation8 + $0x8] sm:$0xff]  }
0x1490   :  { %2695 = vmatpush3.bf16.msra.mxu0 %v2827_v50  ;;  %2706 = vmatprep.subr.bf16.mxu1 %v3187_v15 }
0x1491   :  { %2720 = vmatprep.subr.bf16.mxu0 %v3187_v15 }
0x1493   :  { %2707 = vmatpush3.bf16.msra.mxu1 %v3835_v45 }
0x1494   :  { %2712 = vmatprep.subr.bf16.mxu1 %v3187_v15 }
0x1496   :  { %2709 = vmatmul.mubr.bf16.vlgmr.msra.gmra.mrb[24].mxu1 %v3189_v17  ;;  %v1155_v17 = vsel %vm354_vm6, %v3765_v20, %v3596_v56 }
0x1497   :  { %2713 = vmatpush3.bf16.msra.mxu1 %v3831_v43  ;;  %2716 = vmatprep.mubr.msk.bf16.mxu1 %vm3188_vm1, %v3187_v15 }
0x1498   :  { %v2953_v46 = vpop.eup %2952  ;;  %2714 = vmatprep.subr.bf16.mxu1 %v3187_v15 }
0x1499   :  { %v2955_v16 = vpop.eup %2954  ;;  %v1099_v58 = vmul.f32 %v2953_v46, %v1034_v28 }
0x149a   :  { %v1123_v54 = vmul.f32 %v2955_v16, %v1036_v6 }
0x149b   :  { %2715 = vmatpush3.bf16.msra.mxu1 %v3835_v45 }
0x149c   :  { %2728 = vmatprep.subr.bf16.mxu1 %v3187_v15 }
0x14fc   :  { %v1102_v14 = vpop.permute.xlu0 %1101 }
0x14fd   :  { %v1126_v29 = vpop.permute.xlu1 %1125  ;;  %v1104_v60 = vmul.f32 %v2953_v46, %v1102_v14 }
0x14fe   :  { %v1128_v62 = vmul.f32 %v2955_v16, %v1126_v29 }
0x14ff   :  { %1106 = vrot.lane.b32.xlu0 %v1104_v60, %s3192_s0 }
0x1500   :  { %1130 = vrot.lane.b32.xlu1 %v1128_v62, %s3192_s0 }
0x1571   :  { %v1107_v1 = vpop.permute.xlu0 %1106 }
0x1572   :  { %v1131_v36 = vpop.permute.xlu1 %1130  ;;  %v1109_v34 = vadd.f32 %v1107_v1, %v1099_v58 }
0x1573   :  { %v1133_v49 = vadd.f32 %v1131_v36, %v1123_v54 }
0x1574   :  { %2956 = vtanh.f32 %v1109_v34 }
0x1575   :  { %2958 = vtanh.f32 %v1133_v49 }
0x157e   :  { %v2957_v27 = vpop.eup %2956 }
0x157f   :  { %v2959_v63 = vpop.eup %2958  ;;  %1112 = vrot.lane.b32.xlu0 %v2957_v27, %s3192_s0 }
0x1580   :  { %1136 = vrot.lane.b32.xlu1 %v2959_v63, %s3192_s0 }
0x15f1   :  { %v1113_v32 = vpop.permute.xlu0 %1112 }
0x15f2   :  { %v1137_v57 = vpop.permute.xlu1 %1136  ;;  %v1115_v42 = vmul.f32 %v2953_v46, %v1113_v32  ;;  %v1151_v46 = vsel %vm354_vm6, %v3516_v30, %v3801_v33  ;;  %v1156_v30 = vsel %vm354_vm6, %v3799_v59, %v3518_v31 }
0x15f3   :  { %v1139_v3 = vmul.f32 %v2955_v16, %v1137_v57  ;;  %v1153_v16 = vsel %vm354_vm6, %v3680_v61, %v3729_v52 }
0x15f4   :  { %v1140_v44 = vsel %vm343_vm5, %v1115_v42, %v3789_v51  ;;  %v1152_v51 = vsel %vm354_vm6, %v3594_v55, %v3767_v23  ;;  %v1154_v55 = vsel %vm354_vm6, %v3727_v48, %v3682_v26  ;;  %v1328_v26 = vpop.f32.mrb[24].mxu1 }
0x15f5   :  { %v1141_v47 = vsel %vm336_vm4, %v1139_v3, %v3793_v39  ;;  %1143 = vrot.lane.b32.xlu0 %v1140_v44, %s3193_s23  ;;  %v1159_v23 = vpack.c.bf16 %v1153_v16, %v1152_v51  ;;  %v1160_v60 = vpack.c.bf16 %v1155_v17, %v1154_v55  ;;  %v2710_v48 = vpop.f32.mrb[25].mxu1 }
0x15f6   :  { %1147 = vrot.lane.b32.xlu1 %v1141_v47, %s3194_s6  ;;  %v1331_v52 = vpop.f32.mrb[26].mxu1 }
0x15f7   :  { %v2711_v20 = vpop.f32.mrb[27].mxu1 }
0x1667   :  { %v1144_v56 = vpop.permute.xlu0 %1143 }
0x1668   :  { %v1148_v39 = vpop.permute.xlu1 %1147 }
0x1669   :  { %v1150_v14 = vsel %vm354_vm6, %v3420_v24, %v1148_v39  ;;  %v1157_v24 = vsel %vm354_vm6, %v1144_v56, %v3422_v25  ;;  %v2457_v25 = vld [vmem:[%s4316_s7] ss:$0 sm:$0xff] }
0x166a   :  { %v1158_v29 = vpack.c.bf16 %v1151_v46, %v1150_v14  ;;  %v1161_v61 = vpack.c.bf16 %v1157_v24, %v1156_v30 }
0x166c   :  { %2696 = vmatprep.mubr.msk.bf16.mxu0 %vm123_vm0, %v1158_v29 }
0x166d   :  { %2697 = vmatmul.mubr.msk.bf16.vlgmr.msra.gmra.mrb[16].mxu0 %vm123_vm0, %v1159_v23 }
0x166e   :  { %2700 = vmatprep.mubr.msk.bf16.mxu0 %vm123_vm0, %v1160_v60  ;;  %2721 = vmatpush3.bf16.msra.mxu0 %v3831_v43 }
0x166f   :  { %2722 = vmatprep.subr.bf16.mxu0 %v3187_v15 }
0x1672   :  { %2723 = vmatpush3.bf16.msra.mxu0 %v3835_v45 }
0x1673   :  { %2736 = vmatprep.subr.bf16.mxu0 %v3187_v15 }
0x1675   :  { %2701 = vmatmul.mubr.msk.bf16.gmra.mrb[20].mxu0 %vm123_vm0, %v1161_v61 }
0x1676   :  { %2724 = vmatprep.mubr.msk.bf16.mxu0 %vm3188_vm1, %v3187_v15 }
0x1740   :  { %v2698_v33 = vpop.f32.mrb[16].mxu0 }
0x1741   :  { %v1231_v31 = vpop.f32.mrb[17].mxu0  ;;  %v1240_v62 = vadd.f32 %v2698_v33, %v2457_v25 }
0x1742   :  { %v2699_v59 = vpop.f32.mrb[18].mxu0  ;;  %v1232_v58 = vadd.f32 %v2457_v25, %v1231_v31 }
0x1743   :  { %v1243_v28 = vadd.f32 %v2699_v59, %v2457_v25  ;;  %v1234_v6 = vpop.f32.mrb[19].mxu0 }
0x1744   :  { %v1235_v54 = vadd.f32 %v2457_v25, %v1234_v6 }
0x1745   :  { %v2532_v1 = vpack.c.bf16 %v1243_v28, %v1240_v62 }
0x1746   :  { %v2527_v36 = vpack.c.bf16 %v1235_v54, %v1232_v58 }
0x1747   :  { %2547 = vst [vmem:[#allocation2 + $0x8] sm:$0xff] %v2532_v1  }
0x1748   :  { %2528 = vst [vmem:[#allocation2] sm:$0xff] %v2527_v36   ;;  %v2702_v34 = vpop.f32.mrb[20].mxu0 }
0x1749   :  { %v1247_v49 = vpop.f32.mrb[21].mxu0  ;;  %v1256_v50 = vadd.f32 %v2702_v34, %v2457_v25 }
0x174a   :  { %v2703_v53 = vpop.f32.mrb[22].mxu0  ;;  %v1248_v32 = vadd.f32 %v2457_v25, %v1247_v49 }
0x174b   :  { %v1259_v27 = vadd.f32 %v2703_v53, %v2457_v25  ;;  %v1250_v63 = vpop.f32.mrb[23].mxu0 }
0x174c   :  { %v1251_v57 = vadd.f32 %v2457_v25, %v1250_v63 }
0x174d   :  { %v2542_v42 = vpack.c.bf16 %v1259_v27, %v1256_v50 }
0x174e   :  { %v2537_v3 = vpack.c.bf16 %v1251_v57, %v1248_v32 }
0x174f   :  { %2549 = vst [vmem:[#allocation2 + $0x18] sm:$0xff] %v2542_v42   ;;  %v3882_v44 = vld [vmem:[#allocation2] sm:$0xff]  }
0x1750   :  { %2548 = vst [vmem:[#allocation2 + $0x10] sm:$0xff] %v2537_v3   ;;  %v1335_v47 = vunpack.c.l.bf16 %v3882_v44  ;;  %v1446_v57 = vunpack.c.h.bf16 %v3882_v44 }
0x1752   :  { %v1336_v51 = vadd.f32 %v1335_v47, %v1328_v26 }
0x1754   :  { %2960 = vtanh.f32 %v1336_v51  ;;  %v2466_v29 = vmul.f32 -1.442695, %v1336_v51 }
0x1756   :  { %v3887_v39 = vld [vmem:[#allocation2 + $0x18] sm:$0xff]  }
0x1757   :  { %v1338_v17 = vunpack.c.h.bf16 %v3887_v39  ;;  %v1449_v42 = vunpack.c.l.bf16 %v3887_v39 }
0x1759   :  { %v1339_v46 = vadd.f32 %v1338_v17, %v1328_v26 }
0x175b   :  { %2962 = vtanh.f32 %v1339_v46  ;;  %v2467_v55 = vmul.f32 -1.442695, %v1339_v46 }
0x175c   :  { %2964 = vpow2.f32 %v2466_v29 }
0x175d   :  { %2966 = vpow2.f32 %v2467_v55 }
0x175e   :  { %v2961_v14 = vpop.eup %2960 }
0x175f   :  { %1349 = vrot.lane.b32.xlu1 %v2961_v14, %s3191_s22 }
0x1765   :  { %v2963_v16 = vpop.eup %2962 }
0x1766   :  { %1373 = vrot.lane.b32.xlu0 %v2963_v16, %s3191_s22  ;;  %v2965_v23 = vpop.eup %2964 }
0x1767   :  { %v1343_v60 = vadd.f32 1.0, %v2965_v23  ;;  %v2967_v56 = vpop.eup %2966 }
0x1768   :  { %v1367_v24 = vadd.f32 1.0, %v2967_v56 }
0x1769   :  { %2968 = vrcp.f32 %v1343_v60 }
0x176a   :  { %2970 = vrcp.f32 %v1367_v24 }
0x1773   :  { %v2969_v30 = vpop.eup %2968 }
0x1774   :  { %v2971_v48 = vpop.eup %2970  ;;  %v1347_v33 = vmul.f32 0.0, %v2969_v30 }
0x1775   :  { %v1371_v59 = vmul.f32 0.0, %v2971_v48 }
0x17d1   :  { %v1350_v61 = vpop.permute.xlu1 %1349 }
0x17d2   :  { %v1352_v26 = vmul.f32 %v2969_v30, %v1350_v61 }
0x17d4   :  { %1354 = vrot.lane.b32.xlu1 %v1352_v26, %s3192_s0 }
0x17d8   :  { %v1374_v52 = vpop.permute.xlu0 %1373 }
0x17d9   :  { %v1376_v20 = vmul.f32 %v2971_v48, %v1374_v52 }
0x17db   :  { %1378 = vrot.lane.b32.xlu0 %v1376_v20, %s3192_s0 }
0x1846   :  { %v1355_v25 = vpop.permute.xlu1 %1354 }
0x1847   :  { %v1357_v31 = vadd.f32 %v1355_v25, %v1347_v33 }
0x1849   :  { %2972 = vtanh.f32 %v1357_v31 }
0x184d   :  { %v1379_v62 = vpop.permute.xlu0 %1378 }
0x184e   :  { %v1381_v28 = vadd.f32 %v1379_v62, %v1371_v59  ;;  %v3936_v62 = vsel %vm336_vm4, %v1357_v31, 0.0 }
0x1850   :  { %2974 = vtanh.f32 %v1381_v28 }
0x1853   :  { %v2973_v6 = vpop.eup %2972 }
0x1854   :  { %1360 = vrot.lane.b32.xlu1 %v2973_v6, %s3192_s0  ;;  %v3940_v6 = vsel %vm343_vm5, %v1381_v28, 0.0 }
0x185a   :  { %v2975_v58 = vpop.eup %2974 }
0x185b   :  { %1384 = vrot.lane.b32.xlu0 %v2975_v58, %s3192_s0 }
0x18c6   :  { %v1361_v54 = vpop.permute.xlu1 %1360 }
0x18c7   :  { %v1363_v1 = vmul.f32 %v2969_v30, %v1361_v54 }
0x18c9   :  { %v3900_v36 = vsel %vm336_vm4, %v1363_v1, 0.0 }
0x18ca   :  { %1393 = vrot.lane.b32.xlu1 %v3900_v36, %s3193_s23 }
0x18cd   :  { %v1385_v34 = vpop.permute.xlu0 %1384 }
0x18ce   :  { %v1387_v49 = vmul.f32 %v2971_v48, %v1385_v34 }
0x18d0   :  { %v3906_v53 = vsel %vm343_vm5, %v1387_v49, 0.0 }
0x18d1   :  { %1397 = vrot.lane.b32.xlu0 %v3906_v53, %s3194_s6 }
0x193c   :  { %v3910_v50 = vpop.permute.xlu1 %1393 }
0x1943   :  { %v3912_v27 = vpop.permute.xlu0 %1397 }
0x1944   :  { %v1400_v63 = vsel %vm354_vm6, %v3910_v50, %v3912_v27 }
0x1945   :  { %v1401_v32 = vpack.c.bf16 %v1400_v63, %v1400_v63 }
0x1947   :  { %2717 = vmatmul.mubr.msk.bf16.vlgmr.msra.gmra.mrb[28].mxu1 %vm123_vm0, %v1401_v32 }
0x1948   :  { %2729 = vmatpush3.bf16.msra.mxu1 %v3831_v43  ;;  %2732 = vmatprep.mubr.msk.bf16.mxu1 %vm3188_vm1, %v3187_v15 }
0x1949   :  { %2730 = vmatprep.subr.bf16.mxu1 %v3187_v15 }
0x194c   :  { %2731 = vmatpush3.bf16.msra.mxu1 %v3835_v45 }
0x194d   :  { %2744 = vmatprep.subr.bf16.mxu1 %v3187_v15 }
0x1a1a   :  { %v1439_v3 = vpop.f32.mrb[28].mxu1 }
0x1a1b   :  { %v1447_v51 = vadd.f32 %v1446_v57, %v1439_v3  ;;  %v1450_v46 = vadd.f32 %v1449_v42, %v1439_v3  ;;  %v2718_v14 = vpop.f32.mrb[29].mxu1 }
0x1a1c   :  { %v1442_v16 = vpop.f32.mrb[30].mxu1 }
0x1a1d   :  { %2976 = vtanh.f32 %v1447_v51  ;;  %v2719_v29 = vpop.f32.mrb[31].mxu1  ;;  %v2469_v60 = vmul.f32 -1.442695, %v1447_v51  ;;  %v2470_v56 = vmul.f32 -1.442695, %v1450_v46 }
0x1a1e   :  { %2978 = vtanh.f32 %v1450_v46 }
0x1a1f   :  { %2980 = vpow2.f32 %v2469_v60  ;;  %v3976_v60 = vld [vmem:[#allocation2 + $0x10] sm:$0xff]  }
0x1a20   :  { %2982 = vpow2.f32 %v2470_v56 }
0x1a27   :  { %v2977_v55 = vpop.eup %2976 }
0x1a28   :  { %v2979_v23 = vpop.eup %2978  ;;  %1460 = vrot.lane.b32.xlu1 %v2977_v55, %s3191_s22 }
0x1a29   :  { %1484 = vrot.lane.b32.xlu0 %v2979_v23, %s3191_s22  ;;  %v2981_v24 = vpop.eup %2980 }
0x1a2a   :  { %v2983_v30 = vpop.eup %2982  ;;  %v1454_v61 = vadd.f32 1.0, %v2981_v24  ;;  %v1560_v24 = vunpack.c.h.bf16 %v3976_v60 }
0x1a2b   :  { %v1478_v26 = vadd.f32 1.0, %v2983_v30 }
0x1a2c   :  { %2984 = vrcp.f32 %v1454_v61 }
0x1a2d   :  { %2986 = vrcp.f32 %v1478_v26 }
0x1a36   :  { %v2985_v48 = vpop.eup %2984 }
0x1a37   :  { %v2987_v20 = vpop.eup %2986  ;;  %v1458_v58 = vmul.f32 %v2985_v48, %v3936_v62 }
0x1a38   :  { %v1482_v54 = vmul.f32 %v2987_v20, %v3940_v6 }
0x1a9a   :  { %v1461_v52 = vpop.permute.xlu1 %1460 }
0x1a9b   :  { %v1485_v33 = vpop.permute.xlu0 %1484  ;;  %v1463_v25 = vmul.f32 %v2985_v48, %v1461_v52 }
0x1a9c   :  { %v1487_v59 = vmul.f32 %v2987_v20, %v1485_v33 }
0x1a9d   :  { %1465 = vrot.lane.b32.xlu1 %v1463_v25, %s3192_s0 }
0x1a9e   :  { %1489 = vrot.lane.b32.xlu0 %v1487_v59, %s3192_s0 }
0x1b0f   :  { %v1466_v1 = vpop.permute.xlu1 %1465 }
0x1b10   :  { %v1490_v34 = vpop.permute.xlu0 %1489  ;;  %v1468_v49 = vadd.f32 %v1466_v1, %v1458_v58 }
0x1b11   :  { %v1492_v63 = vadd.f32 %v1490_v34, %v1482_v54 }
0x1b12   :  { %2988 = vtanh.f32 %v1468_v49 }
0x1b13   :  { %2990 = vtanh.f32 %v1492_v63 }
0x1b1c   :  { %v2989_v32 = vpop.eup %2988 }
0x1b1d   :  { %v2991_v3 = vpop.eup %2990  ;;  %1471 = vrot.lane.b32.xlu1 %v2989_v32, %s3192_s0 }
0x1b1e   :  { %1495 = vrot.lane.b32.xlu0 %v2991_v3, %s3192_s0 }
0x1b8f   :  { %v1472_v31 = vpop.permute.xlu1 %1471 }
0x1b90   :  { %v1496_v51 = vpop.permute.xlu0 %1495  ;;  %v1474_v28 = vmul.f32 %v2985_v48, %v1472_v31 }
0x1b91   :  { %v1498_v46 = vmul.f32 %v2987_v20, %v1496_v51 }
0x1b92   :  { %v3949_v14 = vsel %vm460_vm9, %v1474_v28, %v3900_v36 }
0x1b93   :  { %v3954_v16 = vsel %vm467_vm10, %v1498_v46, %v3906_v53  ;;  %1504 = vrot.lane.b32.xlu1 %v3949_v14, %s3193_s23  ;;  %v3974_v53 = vld [vmem:[#allocation2 + $0x8] sm:$0xff]  }
0x1b94   :  { %1508 = vrot.lane.b32.xlu0 %v3954_v16, %s3194_s6  ;;  %v1557_v56 = vunpack.c.l.bf16 %v3974_v53 }
0x1c05   :  { %v3960_v29 = vpop.permute.xlu1 %1504 }
0x1c06   :  { %v3962_v55 = vpop.permute.xlu0 %1508 }
0x1c07   :  { %v1511_v36 = vsel %vm354_vm6, %v3960_v29, %v3962_v55 }
0x1c08   :  { %v1512_v23 = vpack.c.bf16 %v1511_v36, %v1511_v36 }
0x1c0a   :  { %2725 = vmatmul.mubr.msk.bf16.vlgmr.msra.gmra.mrb[24].mxu0 %vm123_vm0, %v1512_v23  ;;  %v3991_v23 = vsel %vm460_vm9, %v1468_v49, %v3936_v62 }
0x1c0b   :  { %2737 = vmatpush3.bf16.msra.mxu0 %v3831_v43  ;;  %2740 = vmatprep.mubr.msk.bf16.mxu0 %vm3188_vm1, %v3187_v15 }
0x1c0c   :  { %2738 = vmatprep.subr.bf16.mxu0 %v3187_v15 }
0x1c0f   :  { %2739 = vmatpush3.bf16.msra.mxu0 %v3835_v45 }
0x1c10   :  { %2752 = vmatprep.subr.bf16.mxu0 %v3187_v15 }
0x1cdd   :  { %v1550_v30 = vpop.f32.mrb[24].mxu0 }
0x1cde   :  { %v1558_v61 = vadd.f32 %v1557_v56, %v1550_v30  ;;  %v1561_v26 = vadd.f32 %v1560_v24, %v1550_v30  ;;  %v2726_v48 = vpop.f32.mrb[25].mxu0  ;;  %v3996_v30 = vsel %vm467_vm10, %v1492_v63, %v3940_v6 }
0x1cdf   :  { %v1553_v52 = vpop.f32.mrb[26].mxu0 }
0x1ce0   :  { %2992 = vtanh.f32 %v1558_v61  ;;  %v2727_v20 = vpop.f32.mrb[27].mxu0  ;;  %v2472_v59 = vmul.f32 -1.442695, %v1558_v61  ;;  %v2473_v58 = vmul.f32 -1.442695, %v1561_v26 }
0x1ce1   :  { %2994 = vtanh.f32 %v1561_v26 }
0x1ce2   :  { %2996 = vpow2.f32 %v2472_v59 }
0x1ce3   :  { %2998 = vpow2.f32 %v2473_v58 }
0x1cea   :  { %v2993_v33 = vpop.eup %2992 }
0x1ceb   :  { %v2995_v25 = vpop.eup %2994  ;;  %1571 = vrot.lane.b32.xlu1 %v2993_v33, %s3191_s22 }
0x1cec   :  { %1595 = vrot.lane.b32.xlu0 %v2995_v25, %s3191_s22  ;;  %v2997_v54 = vpop.eup %2996 }
0x1ced   :  { %v2999_v1 = vpop.eup %2998  ;;  %v1565_v34 = vadd.f32 1.0, %v2997_v54 }
0x1cee   :  { %v1589_v32 = vadd.f32 1.0, %v2999_v1 }
0x1cef   :  { %3000 = vrcp.f32 %v1565_v34 }
0x1cf0   :  { %3002 = vrcp.f32 %v1589_v32 }
0x1cf9   :  { %v3001_v3 = vpop.eup %3000 }
0x1cfa   :  { %v3003_v51 = vpop.eup %3002  ;;  %v1569_v61 = vmul.f32 %v3001_v3, %v3991_v23 }
0x1cfb   :  { %v1593_v26 = vmul.f32 %v3003_v51, %v3996_v30 }
0x1d5d   :  { %v1572_v31 = vpop.permute.xlu1 %1571 }
0x1d5e   :  { %v1596_v28 = vpop.permute.xlu0 %1595  ;;  %v1574_v46 = vmul.f32 %v3001_v3, %v1572_v31 }
0x1d5f   :  { %v1598_v36 = vmul.f32 %v3003_v51, %v1596_v28 }
0x1d60   :  { %1576 = vrot.lane.b32.xlu1 %v1574_v46, %s3192_s0 }
0x1d61   :  { %1600 = vrot.lane.b32.xlu0 %v1598_v36, %s3192_s0 }
0x1dd2   :  { %v1577_v48 = vpop.permute.xlu1 %1576 }
0x1dd3   :  { %v1601_v52 = vpop.permute.xlu0 %1600  ;;  %v1579_v20 = vadd.f32 %v1577_v48, %v1569_v61 }
0x1dd4   :  { %v1603_v33 = vadd.f32 %v1601_v52, %v1593_v26 }
0x1dd5   :  { %3004 = vtanh.f32 %v1579_v20 }
0x1dd6   :  { %3006 = vtanh.f32 %v1603_v33 }
0x1ddf   :  { %v3005_v25 = vpop.eup %3004 }
0x1de0   :  { %v3007_v59 = vpop.eup %3006  ;;  %1582 = vrot.lane.b32.xlu1 %v3005_v25, %s3192_s0 }
0x1de1   :  { %1606 = vrot.lane.b32.xlu0 %v3007_v59, %s3192_s0 }
0x1e52   :  { %v1583_v62 = vpop.permute.xlu1 %1582 }
0x1e53   :  { %v1607_v49 = vpop.permute.xlu0 %1606  ;;  %v1585_v6 = vmul.f32 %v3001_v3, %v1583_v62  ;;  %v1671_v3 = vunpack.c.l.bf16 %v3976_v60 }
0x1e54   :  { %v1609_v63 = vmul.f32 %v3003_v51, %v1607_v49 }
0x1e55   :  { %v4005_v58 = vsel %vm583_vm13, %v1585_v6, %v3949_v14 }
0x1e56   :  { %v4010_v54 = vsel %vm590_vm14, %v1609_v63, %v3954_v16  ;;  %1615 = vrot.lane.b32.xlu1 %v4005_v58, %s3193_s23  ;;  %v1668_v16 = vunpack.c.h.bf16 %v3974_v53 }
0x1e57   :  { %1619 = vrot.lane.b32.xlu0 %v4010_v54, %s3194_s6 }
0x1ec8   :  { %v4016_v1 = vpop.permute.xlu1 %1615 }
0x1ec9   :  { %v4018_v34 = vpop.permute.xlu0 %1619 }
0x1eca   :  { %v1622_v14 = vsel %vm354_vm6, %v4016_v1, %v4018_v34 }
0x1ecb   :  { %v1623_v32 = vpack.c.bf16 %v1622_v14, %v1622_v14 }
0x1ecd   :  { %2733 = vmatmul.mubr.msk.bf16.vlgmr.msra.gmra.mrb[32].mxu1 %vm123_vm0, %v1623_v32 }
0x1ece   :  { %2745 = vmatpush3.bf16.msra.mxu1 %v3831_v43  ;;  %2748 = vmatprep.mubr.msk.bf16.mxu1 %vm3188_vm1, %v3187_v15 }
0x1ecf   :  { %2746 = vmatprep.subr.bf16.mxu1 %v3187_v15 }
0x1ed2   :  { %2747 = vmatpush3.bf16.msra.mxu1 %v3835_v45 }
0x1ed3   :  { %2760 = vmatprep.subr.bf16.mxu1 %v3187_v15 }
0x1fa0   :  { %v1661_v31 = vpop.f32.mrb[32].mxu1 }
0x1fa1   :  { %v1669_v51 = vadd.f32 %v1668_v16, %v1661_v31  ;;  %v1672_v28 = vadd.f32 %v1671_v3, %v1661_v31  ;;  %v2734_v46 = vpop.f32.mrb[33].mxu1 }
0x1fa2   :  { %v1664_v36 = vpop.f32.mrb[34].mxu1 }
0x1fa3   :  { %3008 = vtanh.f32 %v1669_v51  ;;  %v2735_v61 = vpop.f32.mrb[35].mxu1  ;;  %v2475_v52 = vmul.f32 -1.442695, %v1669_v51  ;;  %v2476_v25 = vmul.f32 -1.442695, %v1672_v28  ;;  %v1611_v51 = vsel %vm583_vm13, %v1579_v20, %v3991_v23 }
0x1fa4   :  { %3010 = vtanh.f32 %v1672_v28  ;;  %v1613_v28 = vsel %vm590_vm14, %v1603_v33, %v3996_v30 }
0x1fa5   :  { %3012 = vpow2.f32 %v2475_v52 }
0x1fa6   :  { %3014 = vpow2.f32 %v2476_v25 }
0x1fad   :  { %v3009_v26 = vpop.eup %3008 }
0x1fae   :  { %v3011_v48 = vpop.eup %3010  ;;  %1682 = vrot.lane.b32.xlu1 %v3009_v26, %s3191_s22 }
0x1faf   :  { %1706 = vrot.lane.b32.xlu0 %v3011_v48, %s3191_s22  ;;  %v3013_v59 = vpop.eup %3012 }
0x1fb0   :  { %v3015_v62 = vpop.eup %3014  ;;  %v1676_v49 = vadd.f32 1.0, %v3013_v59 }
0x1fb1   :  { %v1700_v6 = vadd.f32 1.0, %v3015_v62 }
0x1fb2   :  { %3016 = vrcp.f32 %v1676_v49 }
0x1fb3   :  { %3018 = vrcp.f32 %v1700_v6 }
0x1fbc   :  { %v3017_v63 = vpop.eup %3016 }
0x1fbd   :  { %v3019_v32 = vpop.eup %3018  ;;  %v1680_v61 = vmul.f32 %v3017_v63, %v1611_v51 }
0x1fbe   :  { %v1704_v26 = vmul.f32 %v3019_v32, %v1613_v28 }
0x2020   :  { %v1683_v14 = vpop.permute.xlu1 %1682 }
0x2021   :  { %v1707_v31 = vpop.permute.xlu0 %1706  ;;  %v1685_v46 = vmul.f32 %v3017_v63, %v1683_v14 }
0x2022   :  { %v1709_v36 = vmul.f32 %v3019_v32, %v1707_v31 }
0x2023   :  { %1687 = vrot.lane.b32.xlu1 %v1685_v46, %s3192_s0 }
0x2024   :  { %1711 = vrot.lane.b32.xlu0 %v1709_v36, %s3192_s0 }
0x2095   :  { %v1688_v48 = vpop.permute.xlu1 %1687 }
0x2096   :  { %v1712_v52 = vpop.permute.xlu0 %1711  ;;  %v1690_v25 = vadd.f32 %v1688_v48, %v1680_v61 }
0x2097   :  { %v1714_v59 = vadd.f32 %v1712_v52, %v1704_v26 }
0x2098   :  { %3020 = vtanh.f32 %v1690_v25 }
0x2099   :  { %3022 = vtanh.f32 %v1714_v59 }
0x20a2   :  { %v3021_v62 = vpop.eup %3020 }
0x20a3   :  { %v3023_v49 = vpop.eup %3022  ;;  %1693 = vrot.lane.b32.xlu1 %v3021_v62, %s3192_s0 }
0x20a4   :  { %1717 = vrot.lane.b32.xlu0 %v3023_v49, %s3192_s0 }
0x2115   :  { %v1694_v6 = vpop.permute.xlu1 %1693 }
0x2116   :  { %v1718_v23 = vpop.permute.xlu0 %1717  ;;  %v1696_v20 = vmul.f32 %v3017_v63, %v1694_v6 }
0x2117   :  { %v1720_v14 = vmul.f32 %v3019_v32, %v1718_v23 }
0x2118   :  { %v1721_v30 = vsel %vm706_vm3, %v1696_v20, %v4005_v58 }
0x2119   :  { %v1723_v33 = vsel %vm713_vm7, %v1720_v14, %v4010_v54  ;;  %1726 = vrot.lane.b32.xlu1 %v1721_v30, %s3193_s23 }
0x211a   :  { %1730 = vrot.lane.b32.xlu0 %v1723_v33, %s3194_s6 }
0x218b   :  { %v4056_v31 = vpop.permute.xlu1 %1726 }
0x218c   :  { %v4058_v46 = vpop.permute.xlu0 %1730 }
0x218d   :  { %v1733_v63 = vsel %vm354_vm6, %v4056_v31, %v4058_v46 }
0x218e   :  { %v1734_v32 = vpack.c.bf16 %v1733_v63, %v1733_v63 }
0x2190   :  { %2741 = vmatmul.mubr.msk.bf16.vlgmr.msra.gmra.mrb[28].mxu0 %vm123_vm0, %v1734_v32 }
0x2191   :  { %2753 = vmatpush3.bf16.msra.mxu0 %v3831_v43  ;;  %2756 = vmatprep.mubr.msk.bf16.mxu0 %vm3188_vm1, %v3187_v15 }
0x2192   :  { %2754 = vmatprep.subr.bf16.mxu0 %v3187_v15 }
0x2195   :  { %2755 = vmatpush3.bf16.msra.mxu0 %v3835_v45 }
0x2196   :  { %2768 = vmatprep.subr.bf16.mxu0 %v2830_v8 }
0x2263   :  { %v1772_v58 = vpop.f32.mrb[28].mxu0 }
0x2264   :  { %v1778_v54 = vadd.f32 %v1772_v58, %v1671_v3  ;;  %v1779_v36 = vadd.f32 %v1772_v58, %v1668_v16  ;;  %v2742_v61 = vpop.f32.mrb[29].mxu0 }
0x2265   :  { %v1775_v26 = vpop.f32.mrb[30].mxu0 }
0x2266   :  { %3024 = vtanh.f32 %v1778_v54  ;;  %v2743_v48 = vpop.f32.mrb[31].mxu0  ;;  %v2478_v49 = vmul.f32 -1.442695, %v1778_v54  ;;  %v2479_v6 = vmul.f32 -1.442695, %v1779_v36  ;;  %v1722_v54 = vsel %vm706_vm3, %v1690_v25, %v1611_v51 }
0x2267   :  { %3026 = vtanh.f32 %v1779_v36  ;;  %v1724_v36 = vsel %vm713_vm7, %v1714_v59, %v1613_v28 }
0x2268   :  { %3028 = vpow2.f32 %v2478_v49 }
0x2269   :  { %3030 = vpow2.f32 %v2479_v6 }
0x2270   :  { %v3025_v52 = vpop.eup %3024 }
0x2271   :  { %v3027_v62 = vpop.eup %3026  ;;  %1789 = vrot.lane.b32.xlu1 %v3025_v52, %s3191_s22 }
0x2272   :  { %1813 = vrot.lane.b32.xlu0 %v3027_v62, %s3191_s22  ;;  %v3029_v23 = vpop.eup %3028 }
0x2273   :  { %v3031_v3 = vpop.eup %3030  ;;  %v1783_v20 = vadd.f32 1.0, %v3029_v23 }
0x2274   :  { %v1807_v14 = vadd.f32 1.0, %v3031_v3 }
0x2275   :  { %3032 = vrcp.f32 %v1783_v20 }
0x2276   :  { %3034 = vrcp.f32 %v1807_v14 }
0x227f   :  { %v3033_v16 = vpop.eup %3032 }
0x2280   :  { %v3035_v32 = vpop.eup %3034  ;;  %v1787_v48 = vmul.f32 %v3033_v16, %v1722_v54 }
0x2281   :  { %v1811_v52 = vmul.f32 %v3035_v32, %v1724_v36 }
0x22e3   :  { %v1790_v63 = vpop.permute.xlu1 %1789 }
0x22e4   :  { %v1814_v58 = vpop.permute.xlu0 %1813  ;;  %v1792_v61 = vmul.f32 %v3033_v16, %v1790_v63 }
0x22e5   :  { %v1816_v26 = vmul.f32 %v3035_v32, %v1814_v58 }
0x22e6   :  { %1794 = vrot.lane.b32.xlu1 %v1792_v61, %s3192_s0 }
0x22e7   :  { %1818 = vrot.lane.b32.xlu0 %v1816_v26, %s3192_s0 }
0x2358   :  { %v1795_v62 = vpop.permute.xlu1 %1794 }
0x2359   :  { %v1819_v49 = vpop.permute.xlu0 %1818  ;;  %v1797_v6 = vadd.f32 %v1795_v62, %v1787_v48 }
0x235a   :  { %v1821_v23 = vadd.f32 %v1819_v49, %v1811_v52 }
0x235b   :  { %3036 = vtanh.f32 %v1797_v6 }
0x235c   :  { %3038 = vtanh.f32 %v1821_v23 }
0x2365   :  { %v3037_v3 = vpop.eup %3036 }
0x2366   :  { %v3039_v20 = vpop.eup %3038  ;;  %1800 = vrot.lane.b32.xlu1 %v3037_v3, %s3192_s0 }
0x2367   :  { %1824 = vrot.lane.b32.xlu0 %v3039_v20, %s3192_s0 }
0x23d8   :  { %v1801_v14 = vpop.permute.xlu1 %1800 }
0x23d9   :  { %v1825_v63 = vpop.permute.xlu0 %1824  ;;  %v1803_v51 = vmul.f32 %v3033_v16, %v1801_v14 }
0x23da   :  { %v1827_v25 = vmul.f32 %v3035_v32, %v1825_v63 }
0x23db   :  { %v1828_v28 = vsel %vm713_vm7, %v1803_v51, %v1721_v30 }
0x23dc   :  { %v1830_v59 = vsel %vm706_vm3, %v1827_v25, %v1723_v33  ;;  %1833 = vrot.lane.b32.xlu1 %v1828_v28, %s3193_s23 }
0x23dd   :  { %1837 = vrot.lane.b32.xlu0 %v1830_v59, %s3194_s6 }
0x244e   :  { %v4089_v58 = vpop.permute.xlu1 %1833 }
0x244f   :  { %v4091_v61 = vpop.permute.xlu0 %1837 }
0x2450   :  { %v1840_v26 = vsel %vm354_vm6, %v4089_v58, %v4091_v61 }
0x2451   :  { %v1841_v16 = vpack.c.bf16 %v1840_v26, %v1840_v26  ;;  %v1829_v26 = vsel %vm713_vm7, %v1797_v6, %v1722_v54 }
0x2453   :  { %2749 = vmatmul.mubr.msk.bf16.vlgmr.msra.gmra.mrb[36].mxu1 %vm123_vm0, %v1841_v16  ;;  %v1831_v16 = vsel %vm706_vm3, %v1821_v23, %v1724_v36 }
0x2454   :  { %2761 = vmatpush3.bf16.msra.mxu1 %v3831_v43  ;;  %2764 = vmatprep.mubr.msk.bf16.mxu1 %vm3188_vm1, %v3187_v15  ;;  %vm2336_vm1 = vcmp.ne.s32.totalorder %v2328_v38, 0 }
0x2455   :  { %2762 = vmatprep.subr.bf16.mxu1 %v3187_v15 }
0x2458   :  { %2763 = vmatpush3.bf16.msra.mxu1 %v3835_v45 }
0x2526   :  { %v1879_v30 = vpop.f32.mrb[36].mxu1 }
0x2527   :  { %v1885_v33 = vadd.f32 %v1879_v30, %v1560_v24  ;;  %v1886_v32 = vadd.f32 %v1879_v30, %v1557_v56  ;;  %v2750_v48 = vpop.f32.mrb[37].mxu1 }
0x2528   :  { %v1882_v52 = vpop.f32.mrb[38].mxu1 }
0x2529   :  { %3040 = vtanh.f32 %v1885_v33  ;;  %v2751_v62 = vpop.f32.mrb[39].mxu1  ;;  %v2481_v15 = vmul.f32 -1.442695, %v1885_v33  ;;  %v2482_v45 = vmul.f32 -1.442695, %v1886_v32 }
0x252a   :  { %3042 = vtanh.f32 %v1886_v32 }
0x252b   :  { %3044 = vpow2.f32 %v2481_v15 }
0x252c   :  { %3046 = vpow2.f32 %v2482_v45 }
0x2533   :  { %v3041_v43 = vpop.eup %3040 }
0x2534   :  { %v3043_v49 = vpop.eup %3042  ;;  %1896 = vrot.lane.b32.xlu1 %v3041_v43, %s3191_s22 }
0x2535   :  { %1920 = vrot.lane.b32.xlu0 %v3043_v49, %s3191_s22  ;;  %v3045_v60 = vpop.eup %3044 }
0x2536   :  { %v3047_v24 = vpop.eup %3046  ;;  %v1890_v3 = vadd.f32 1.0, %v3045_v60 }
0x2537   :  { %v1914_v53 = vadd.f32 1.0, %v3047_v24 }
0x2538   :  { %3048 = vrcp.f32 %v1890_v3 }
0x2539   :  { %3050 = vrcp.f32 %v1914_v53 }
0x2542   :  { %v3049_v56 = vpop.eup %3048 }
0x2543   :  { %v3051_v14 = vpop.eup %3050  ;;  %v1894_v30 = vmul.f32 %v3049_v56, %v1829_v26 }
0x2544   :  { %v1918_v33 = vmul.f32 %v3051_v14, %v1831_v16 }
0x25a6   :  { %v1897_v20 = vpop.permute.xlu1 %1896 }
0x25a7   :  { %v1921_v63 = vpop.permute.xlu0 %1920  ;;  %v1899_v51 = vmul.f32 %v3049_v56, %v1897_v20 }
0x25a8   :  { %v1923_v25 = vmul.f32 %v3051_v14, %v1921_v63 }
0x25a9   :  { %1901 = vrot.lane.b32.xlu1 %v1899_v51, %s3192_s0 }
0x25aa   :  { %1925 = vrot.lane.b32.xlu0 %v1923_v25, %s3192_s0 }
0x261b   :  { %v1902_v32 = vpop.permute.xlu1 %1901 }
0x261c   :  { %v1926_v48 = vpop.permute.xlu0 %1925  ;;  %v1904_v52 = vadd.f32 %v1902_v32, %v1894_v30 }
0x261d   :  { %v1928_v62 = vadd.f32 %v1926_v48, %v1918_v33 }
0x261e   :  { %3052 = vtanh.f32 %v1904_v52 }
0x261f   :  { %3054 = vtanh.f32 %v1928_v62 }
0x2628   :  { %v3053_v43 = vpop.eup %3052 }
0x2629   :  { %v3055_v49 = vpop.eup %3054  ;;  %1907 = vrot.lane.b32.xlu1 %v3053_v43, %s3192_s0 }
0x262a   :  { %1931 = vrot.lane.b32.xlu0 %v3055_v49, %s3192_s0 }
0x269b   :  { %v1908_v15 = vpop.permute.xlu1 %1907 }
0x269c   :  { %v1932_v19 = vpop.permute.xlu0 %1931  ;;  %v1910_v54 = vmul.f32 %v3049_v56, %v1908_v15 }
0x269d   :  { %v1934_v6 = vmul.f32 %v3051_v14, %v1932_v19 }
0x269e   :  { %v1935_v13 = vsel %vm590_vm14, %v1910_v54, %v1828_v28  ;;  %v1936_v54 = vsel %vm590_vm14, %v1904_v52, %v1829_v26 }
0x269f   :  { %v1937_v36 = vsel %vm583_vm13, %v1934_v6, %v1830_v59  ;;  %1940 = vrot.lane.b32.xlu1 %v1935_v13, %s3193_s23  ;;  %v1938_v6 = vsel %vm583_vm13, %v1928_v62, %v1831_v16 }
0x26a0   :  { %1944 = vrot.lane.b32.xlu0 %v1937_v36, %s3194_s6 }
0x2711   :  { %v4122_v23 = vpop.permute.xlu1 %1940 }
0x2712   :  { %v4124_v45 = vpop.permute.xlu0 %1944 }
0x2713   :  { %v1947_v60 = vsel %vm354_vm6, %v4122_v23, %v4124_v45 }
0x2714   :  { %v1948_v24 = vpack.c.bf16 %v1947_v60, %v1947_v60 }
0x2716   :  { %2757 = vmatmul.mubr.msk.bf16.vlgmr.msra.gmra.mrb[32].mxu0 %vm123_vm0, %v1948_v24 }
0x2717   :  { %2769 = vmatpush3.bf16.msra.mxu0 %v2830_v8  ;;  %v2497_v8 = vld [vmem:[%s4319_s10] ss:$0 sm:$0xff] }
0x2718   :  { %2770 = vmatprep.subr.bf16.mxu0 %v2831_v10 }
0x271b   :  { %2771 = vmatpush3.bf16.msra.mxu0 %v2831_v10 }
0x27e9   :  { %v1986_v3 = vpop.f32.mrb[32].mxu0 }
0x27ea   :  { %v1992_v28 = vadd.f32 %v1986_v3, %v1449_v42  ;;  %v1993_v59 = vadd.f32 %v1986_v3, %v1446_v57  ;;  %v2758_v53 = vpop.f32.mrb[33].mxu0 }
0x27eb   :  { %v1989_v56 = vpop.f32.mrb[34].mxu0 }
0x27ec   :  { %3056 = vtanh.f32 %v1992_v28  ;;  %v2759_v20 = vpop.f32.mrb[35].mxu0  ;;  %v2484_v51 = vmul.f32 -1.442695, %v1992_v28  ;;  %v2485_v25 = vmul.f32 -1.442695, %v1993_v59 }
0x27ed   :  { %3058 = vtanh.f32 %v1993_v59 }
0x27ee   :  { %3060 = vpow2.f32 %v2484_v51 }
0x27ef   :  { %3062 = vpow2.f32 %v2485_v25 }
0x27f6   :  { %v3057_v14 = vpop.eup %3056 }
0x27f7   :  { %v3059_v63 = vpop.eup %3058  ;;  %2003 = vrot.lane.b32.xlu1 %v3057_v14, %s3191_s22 }
0x27f8   :  { %2027 = vrot.lane.b32.xlu0 %v3059_v63, %s3191_s22  ;;  %v3061_v30 = vpop.eup %3060 }
0x27f9   :  { %v3063_v42 = vpop.eup %3062  ;;  %v1997_v33 = vadd.f32 1.0, %v3061_v30 }
0x27fa   :  { %v2021_v32 = vadd.f32 1.0, %v3063_v42 }
0x27fb   :  { %3064 = vrcp.f32 %v1997_v33 }
0x27fc   :  { %3066 = vrcp.f32 %v2021_v32 }
0x2805   :  { %v3065_v57 = vpop.eup %3064 }
0x2806   :  { %v3067_v43 = vpop.eup %3066  ;;  %v2001_v60 = vmul.f32 %v3065_v57, %v1936_v54 }
0x2807   :  { %v2025_v24 = vmul.f32 %v3067_v43, %v1938_v6 }
0x2869   :  { %v2004_v48 = vpop.permute.xlu1 %2003 }
0x286a   :  { %v2028_v49 = vpop.permute.xlu0 %2027  ;;  %v2006_v15 = vmul.f32 %v3065_v57, %v2004_v48 }
0x286b   :  { %v2030_v19 = vmul.f32 %v3067_v43, %v2028_v49 }
0x286c   :  { %2008 = vrot.lane.b32.xlu1 %v2006_v15, %s3192_s0 }
0x286d   :  { %2032 = vrot.lane.b32.xlu0 %v2030_v19, %s3192_s0 }
0x28de   :  { %v2009_v3 = vpop.permute.xlu1 %2008 }
0x28df   :  { %v2033_v28 = vpop.permute.xlu0 %2032  ;;  %v2011_v59 = vadd.f32 %v2009_v3, %v2001_v60 }
0x28e0   :  { %v2035_v53 = vadd.f32 %v2033_v28, %v2025_v24 }
0x28e1   :  { %3068 = vtanh.f32 %v2011_v59 }
0x28e2   :  { %3070 = vtanh.f32 %v2035_v53 }
0x28eb   :  { %v3069_v56 = vpop.eup %3068 }
0x28ec   :  { %v3071_v20 = vpop.eup %3070  ;;  %2014 = vrot.lane.b32.xlu1 %v3069_v56, %s3192_s0  ;;  %v2043_v56 = vsel %vm467_vm10, %v2011_v59, %v1936_v54  ;;  %v2352_v54 = vsel %vm2336_vm1, 1, %v3190_v18 }
0x28ed   :  { %2038 = vrot.lane.b32.xlu0 %v3071_v20, %s3192_s0  ;;  %v2045_v20 = vsel %vm460_vm9, %v2035_v53, %v1938_v6  ;;  %v4321_v6 = vpack.i.bf16 %v3443_v35, %v3449_v37  ;;  %v2333_v37 = vld [vmem:[%s4310_s1 + $0x30] sm:$0xff] }
0x28ee   :  { %vm2341_vm12 = vcmp.ne.s32.totalorder %v2333_v37, 0 }
0x295e   :  { %v2015_v14 = vpop.permute.xlu1 %2014 }
0x295f   :  { %v2039_v7 = vpop.permute.xlu0 %2038  ;;  %v2017_v26 = vmul.f32 %v3065_v57, %v2015_v14 }
0x2960   :  { %v2041_v52 = vmul.f32 %v3067_v43, %v2039_v7 }
0x2961   :  { %v4146_v0 = vsel %vm467_vm10, %v2017_v26, %v1935_v13 }
0x2962   :  { %v4150_v16 = vsel %vm460_vm9, %v2041_v52, %v1937_v36  ;;  %2047 = vrot.lane.b32.xlu1 %v4146_v0, %s3193_s23  ;;  %vm2337_vm9 = vcmp.ne.s32.totalorder %v2329_v12, 0 }
0x2963   :  { %2051 = vrot.lane.b32.xlu0 %v4150_v16, %s3194_s6  ;;  %v2353_v35 = vsel %vm2337_vm9, 1, %v3190_v18 }
0x29d4   :  { %v4156_v62 = vpop.permute.xlu1 %2047 }
0x29d5   :  { %v4158_v63 = vpop.permute.xlu0 %2051 }
0x29d6   :  { %v2054_v51 = vsel %vm354_vm6, %v4156_v62, %v4158_v63 }
0x29d7   :  { %v2055_v13 = vpack.c.bf16 %v2054_v51, %v2054_v51 }
0x29d9   :  { %2765 = vmatmul.mubr.msk.bf16.vlgmr.msra.gmra.mrb[40].mxu1 %vm123_vm0, %v2055_v13 }
0x2aac   :  { %v2093_v25 = vpop.f32.mrb[40].mxu1 }
0x2aad   :  { %v2099_v36 = vadd.f32 %v2093_v25, %v1338_v17  ;;  %v2100_v30 = vadd.f32 %v2093_v25, %v1335_v47  ;;  %v2766_v42 = vpop.f32.mrb[41].mxu1 }
0x2aae   :  { %v2096_v33 = vpop.f32.mrb[42].mxu1 }
0x2aaf   :  { %3072 = vtanh.f32 %v2099_v36  ;;  %v2767_v32 = vpop.f32.mrb[43].mxu1  ;;  %v2487_v43 = vmul.f32 -1.442695, %v2099_v36  ;;  %v2488_v49 = vmul.f32 -1.442695, %v2100_v30 }
0x2ab0   :  { %3074 = vtanh.f32 %v2100_v30  ;;  %v2357_v32 = vsel %vm2341_vm12, 1, %v3190_v18 }
0x2ab1   :  { %3076 = vpow2.f32 %v2487_v43 }
0x2ab2   :  { %3078 = vpow2.f32 %v2488_v49 }
0x2ab9   :  { %v3073_v57 = vpop.eup %3072 }
0x2aba   :  { %v3075_v48 = vpop.eup %3074  ;;  %2110 = vrot.lane.b32.xlu0 %v3073_v57, %s3191_s22 }
0x2abb   :  { %2134 = vrot.lane.b32.xlu1 %v3075_v48, %s3191_s22  ;;  %v3077_v39 = vpop.eup %3076 }
0x2abc   :  { %v3079_v17 = vpop.eup %3078  ;;  %v2104_v15 = vadd.f32 1.0, %v3077_v39 }
0x2abd   :  { %v2128_v44 = vadd.f32 1.0, %v3079_v17 }
0x2abe   :  { %3080 = vrcp.f32 %v2104_v15 }
0x2abf   :  { %3082 = vrcp.f32 %v2128_v44 }
0x2ac8   :  { %v3081_v47 = vpop.eup %3080 }
0x2ac9   :  { %v3083_v60 = vpop.eup %3082  ;;  %v2108_v14 = vmul.f32 %v3081_v47, %v2043_v56 }
0x2aca   :  { %v2132_v7 = vmul.f32 %v3083_v60, %v2045_v20 }
0x2b2c   :  { %v2111_v19 = vpop.permute.xlu0 %2110 }
0x2b2d   :  { %v2135_v24 = vpop.permute.xlu1 %2134  ;;  %v2113_v3 = vmul.f32 %v3081_v47, %v2111_v19  ;;  %v2162_v19 = vsel %vm354_vm6, %v4056_v31, %v4091_v61 }
0x2b2e   :  { %v2137_v28 = vmul.f32 %v3083_v60, %v2135_v24 }
0x2b2f   :  { %2115 = vrot.lane.b32.xlu0 %v2113_v3, %s3192_s0 }
0x2b30   :  { %2139 = vrot.lane.b32.xlu1 %v2137_v28, %s3192_s0  ;;  %v2160_v28 = vsel %vm354_vm6, %v3960_v29, %v4158_v63 }
0x2ba1   :  { %v2116_v26 = vpop.permute.xlu0 %2115 }
0x2ba2   :  { %v2140_v52 = vpop.permute.xlu1 %2139  ;;  %v2118_v51 = vadd.f32 %v2116_v26, %v2108_v14 }
0x2ba3   :  { %v2142_v13 = vadd.f32 %v2140_v52, %v2132_v7 }
0x2ba4   :  { %3084 = vtanh.f32 %v2118_v51 }
0x2ba5   :  { %3086 = vtanh.f32 %v2142_v13 }
0x2bae   :  { %v3085_v25 = vpop.eup %3084 }
0x2baf   :  { %v3087_v36 = vpop.eup %3086  ;;  %2121 = vrot.lane.b32.xlu0 %v3085_v25, %s3192_s0 }
0x2bb0   :  { %2145 = vrot.lane.b32.xlu1 %v3087_v36, %s3192_s0 }
0x2bb3   :  { %2808 = vperm.xlu0 %2800, %v2807_v22   ;;  %v2327_v22 = vld [vmem:[%s4310_s1] sm:$0xff] }
0x2bb4   :  { %2803 = vperm.xlu1 %2801, %v2802_v41  }
0x2bb7   :  { %2813 = vperm.xlu0 %2800, %v2812_v9   ;;  %v2330_v9 = vld [vmem:[%s4310_s1 + $0x18] sm:$0xff] }
0x2bb8   :  { %vm2338_vm8 = vcmp.ne.s32.totalorder %v2330_v9, 0 }
0x2bb9   :  { %v2354_v59 = vsel %vm2338_vm8, 1, %v3190_v18 }
0x2c21   :  { %v2122_v40 = vpop.permute.xlu0 %2121 }
0x2c22   :  { %v2146_v41 = vpop.permute.xlu1 %2145  ;;  %v2124_v2 = vmul.f32 %v3081_v47, %v2122_v40  ;;  %v2163_v47 = vsel %vm354_vm6, %v4089_v58, %v4058_v46 }
0x2c23   :  { %v2148_v4 = vmul.f32 %v3083_v60, %v2146_v41  ;;  %v2164_v60 = vsel %vm354_vm6, %v4122_v23, %v4018_v34  ;;  %v2343_v41 = vld [vmem:[%s4311_s2] sm:$0xff] }
0x2c24   :  { %v2149_v5 = vsel %vm343_vm5, %v2124_v2, %v4146_v0  ;;  %vm2335_vm5 = vcmp.ne.s32.totalorder %v2327_v22, 0  ;;  %v2334_v0 = vld [vmem:[%s4310_s1 + $0x38] sm:$0xff] }
0x2c25   :  { %v2150_v21 = vsel %vm336_vm4, %v2148_v4, %v4150_v16  ;;  %2152 = vrot.lane.b32.xlu0 %v2149_v5, %s3193_s23  ;;  %v2351_v53 = vsel %vm2335_vm5, 1, %v3190_v18  ;;  %vm2340_vm4 = vcmp.ne.s32.totalorder %v2332_v11, 0  ;;  %v2331_v16 = vld [vmem:[%s4310_s1 + $0x20] sm:$0xff]  ;;  %vm2342_vm10 = vcmp.ne.s32.totalorder %v2334_v0, 0  ;;  %v2346_v5 = vld [vmem:[%s4311_s2 + $0x18] sm:$0xff] }
0x2c26   :  { %2156 = vrot.lane.b32.xlu1 %v2150_v21, %s3194_s6  ;;  %v2356_v30 = vsel %vm2340_vm4, 1, %v3190_v18  ;;  %vm2339_vm11 = vcmp.ne.s32.totalorder %v2331_v16, 0  ;;  %v2358_v42 = vsel %vm2342_vm10, 1, %v3190_v18 }
0x2c27   :  { %v2355_v33 = vsel %vm2339_vm11, 1, %v3190_v18  ;;  %v2161_v18 = vsel %vm354_vm6, %v4016_v1, %v4124_v45 }
0x2c29   :  { %2363 = vperm.xlu0 %2800, %v2352_v54   ;;  %v2344_v54 = vld [vmem:[%s4311_s2 + $0x8] sm:$0xff] }
0x2c2a   :  { %2818 = vperm.xlu1 %2801, %v4321_v6  }
0x2c2d   :  { %2369 = vperm.xlu0 %2800, %v2354_v59  }
0x2c2e   :  { %2360 = vperm.xlu1 %2801, %v2351_v53  }
0x2c31   :  { %2375 = vperm.xlu0 %2800, %v2356_v30  }
0x2c32   :  { %2366 = vperm.xlu1 %2801, %v2353_v35   ;;  %v2809_v57 = vpop.permute.xlu0 %2808  ;;  %v2349_v35 = vld [vmem:[%s4311_s2 + $0x30] sm:$0xff] }
0x2c33   :  { %v2804_v48 = vpop.permute.xlu1 %2803  ;;  %v2811_v49 = vunpack.i.h.bf16 %v2809_v57  ;;  %v2810_v39 = vunpack.i.l.bf16 %v2809_v57 }
0x2c34   :  { %v2806_v17 = vunpack.i.h.bf16 %v2804_v48  ;;  %v2805_v24 = vunpack.i.l.bf16 %v2804_v48 }
0x2c35   :  { %2381 = vperm.xlu0 %2800, %v2358_v42   ;;  %v2218_v56 = vmul.f32 %v2811_v49, %v2162_v19  ;;  %v2217_v46 = vmul.f32 %v2810_v39, %v2161_v18 }
0x2c36   :  { %2372 = vperm.xlu1 %2801, %v2355_v33   ;;  %v2814_v43 = vpop.permute.xlu0 %2813  ;;  %v2216_v31 = vmul.f32 %v2806_v17, %v2160_v28 }
0x2c37   :  { %v2816_v15 = vunpack.i.h.bf16 %v2814_v43  ;;  %v2815_v44 = vunpack.i.l.bf16 %v2814_v43  ;;  %v2224_v45 = vpack.c.bf16 %v2218_v56, %v2217_v46  ;;  %v2350_v43 = vld [vmem:[%s4311_s2 + $0x38] sm:$0xff] }
0x2c39   :  { %v2220_v61 = vmul.f32 %v2816_v15, %v2164_v60  ;;  %v2219_v20 = vmul.f32 %v2815_v44, %v2163_v47  ;;  %v2348_v15 = vld [vmem:[%s4311_s2 + $0x28] sm:$0xff] }
0x2c3a   :  { %2378 = vperm.xlu1 %2801, %v2357_v32   ;;  %v2347_v32 = vld [vmem:[%s4311_s2 + $0x20] sm:$0xff] }
0x2c3b   :  { %v2225_v7 = vpack.c.bf16 %v2220_v61, %v2219_v20 }
0x2c97   :  { %v2153_v34 = vpop.permute.xlu0 %2152 }
0x2c98   :  { %v2157_v3 = vpop.permute.xlu1 %2156  ;;  %v2166_v26 = vsel %vm354_vm6, %v2153_v34, %v3912_v27 }
0x2c99   :  { %v2159_v58 = vsel %vm354_vm6, %v3910_v50, %v2157_v3  ;;  %v2165_v50 = vsel %vm354_vm6, %v4156_v62, %v3962_v55  ;;  %v2345_v55 = vld [vmem:[%s4311_s2 + $0x10] sm:$0xff] }
0x2c9a   :  { %v2215_v14 = vmul.f32 %v2805_v24, %v2159_v58 }
0x2c9c   :  { %v2223_v1 = vpack.c.bf16 %v2216_v31, %v2215_v14 }
0x2c9e   :  { %2772 = vmatprep.mubr.msk.bf16.mxu0 %vm123_vm0, %v2223_v1 }
0x2c9f   :  { %2773 = vmatmul.mubr.msk.bf16.vlgmr.msra.gmra.mrb[36].mxu0 %vm123_vm0, %v2224_v45 }
0x2ca0   :  { %2776 = vmatprep.mubr.msk.bf16.mxu0 %vm123_vm0, %v2225_v7 }
0x2ca8   :  { %v2364_v36 = vpop.permute.xlu0 %2363 }
0x2ca9   :  { %v2819_v29 = vpop.permute.xlu1 %2818  ;;  %vm2384_vm15 = vcmp.eq.s32.totalorder %v2364_v36, 1 }
0x2caa   :  { %v2821_v23 = vunpack.i.h.bf16 %v2819_v29  ;;  %v2820_v63 = vunpack.i.l.bf16 %v2819_v29 }
0x2cac   :  { %v2221_v52 = vmul.f32 %v2820_v63, %v2165_v50  ;;  %v2222_v51 = vmul.f32 %v2821_v23, %v2166_v26  ;;  %v2370_v62 = vpop.permute.xlu0 %2369 }
0x2cad   :  { %v2361_v25 = vpop.permute.xlu1 %2360  ;;  %vm2386_vm14 = vcmp.eq.s32.totalorder %v2370_v62, 1 }
0x2cae   :  { %v2226_v13 = vpack.c.bf16 %v2222_v51, %v2221_v52  ;;  %vm2383_vm13 = vcmp.eq.s32.totalorder %v2361_v25, 1 }
0x2cb0   :  { %2777 = vmatmul.mubr.msk.bf16.gmra.mrb[40].mxu0 %vm123_vm0, %v2226_v13  ;;  %v2376_v0 = vpop.permute.xlu0 %2375 }
0x2cb1   :  { %v2367_v10 = vpop.permute.xlu1 %2366  ;;  %vm2388_vm1 = vcmp.eq.s32.totalorder %v2376_v0, 1 }
0x2cb2   :  { %vm2385_vm6 = vcmp.eq.s32.totalorder %v2367_v10, 1 }
0x2cb4   :  { %v2382_v37 = vpop.permute.xlu0 %2381 }
0x2cb5   :  { %v2373_v53 = vpop.permute.xlu1 %2372  ;;  %vm2390_vm7 = vcmp.eq.s32.totalorder %v2382_v37, 1 }
0x2cb6   :  { %vm2387_vm3 = vcmp.eq.s32.totalorder %v2373_v53, 1 }
0x2cb9   :  { %v2379_v16 = vpop.permute.xlu1 %2378 }
0x2cba   :  { %vm2389_vm2 = vcmp.eq.s32.totalorder %v2379_v16, 1 }
0x2d72   :  { %v2774_v38 = vpop.f32.mrb[36].mxu0 }
0x2d73   :  { %v2305_v40 = vadd.f32 %v2774_v38, %v2497_v8  ;;  %v2296_v27 = vpop.f32.mrb[37].mxu0 }
0x2d74   :  { %v2297_v2 = vadd.f32 %v2497_v8, %v2296_v27  ;;  %v2775_v4 = vpop.f32.mrb[38].mxu0 }
0x2d75   :  { %v2393_v9 = vsel %vm2385_vm6, %v2345_v55, %v2305_v40  ;;  %v2308_v21 = vadd.f32 %v2775_v4, %v2497_v8  ;;  %v2299_v22 = vpop.f32.mrb[39].mxu0 }
0x2d76   :  { %2401 = vst.msk [vmem:[#allocation9 + $0x10] sm:$0xff] %vm123_vm0, %v2393_v9  ;;  %v2391_v11 = vsel %vm2383_vm13, %v2343_v41, %v2297_v2  ;;  %v2300_v12 = vadd.f32 %v2497_v8, %v2299_v22 }
0x2d77   :  { %2399 = vst.msk [vmem:[#allocation9] sm:$0xff] %vm123_vm0, %v2391_v11  ;;  %v2394_v6 = vsel %vm2386_vm14, %v2346_v5, %v2308_v21 }
0x2d78   :  { %2402 = vst.msk [vmem:[#allocation9 + $0x18] sm:$0xff] %vm123_vm0, %v2394_v6  ;;  %v2392_v59 = vsel %vm2384_vm15, %v2344_v54, %v2300_v12 }
0x2d79   :  { %2400 = vst.msk [vmem:[#allocation9 + $0x8] sm:$0xff] %vm123_vm0, %v2392_v59 }
0x2d83   :  { %v2778_v30 = vpop.f32.mrb[40].mxu0 }
0x2d84   :  { %v2321_v42 = vadd.f32 %v2778_v30, %v2497_v8  ;;  %v2312_v33 = vpop.f32.mrb[41].mxu0 }
0x2d85   :  { %v2313_v57 = vadd.f32 %v2497_v8, %v2312_v33  ;;  %v2779_v48 = vpop.f32.mrb[42].mxu0 }
0x2d86   :  { %v2397_v49 = vsel %vm2389_vm2, %v2349_v35, %v2321_v42  ;;  %v2324_v39 = vadd.f32 %v2779_v48, %v2497_v8  ;;  %v2315_v17 = vpop.f32.mrb[43].mxu0 }
0x2d87   :  { %2405 = vst.msk [vmem:[#allocation9 + $0x30] sm:$0xff] %vm123_vm0, %v2397_v49  ;;  %v2395_v44 = vsel %vm2387_vm3, %v2347_v32, %v2313_v57  ;;  %v2316_v47 = vadd.f32 %v2497_v8, %v2315_v17 }
0x2d88   :  { %2403 = vst.msk [vmem:[#allocation9 + $0x20] sm:$0xff] %vm123_vm0, %v2395_v44  ;;  %v2398_v19 = vsel %vm2390_vm7, %v2350_v43, %v2324_v39 }
0x2d89   :  { %2406 = vst.msk [vmem:[#allocation9 + $0x38] sm:$0xff] %vm123_vm0, %v2398_v19  ;;  %v2396_v18 = vsel %vm2388_vm1, %v2348_v15, %v2316_v47 }
0x2d8a   :  { %2404 = vst.msk [vmem:[#allocation9 + $0x28] sm:$0xff] %vm123_vm0, %v2396_v18 }
0x2d8b   :  { %3165 = shalt.err (!%p3162_p0)
}
0x2d8c   :  { %s3166_s16 = scalar_lea.hbm %s4320_s11, 1024 }
0x2d8d   :  { %p3167_p1 = scmp.ne.s32.totalorder %s4320_s11, %s3166_s16  ;;  %p3170_p2 = scmp.lt.u32.totalorder %s3166_s16, %s4320_s11 }
0x2d8f   :  { %p3172_p3 = pnand %p3170_p2, %p3167_p1 }
0x2d91   :  { %3175 = shalt.err (!%p3172_p3)
}
0x2d92   :  { %s3196_s20 = smov 128   ;;  %s3197_s5 = smov 8  }
0x2d93   :  { %2418 = dma.vmem_to_hbm [thread:$0]  %s2413_s25, 1024, %s4320_s11, [#allocation5], %s3196_s20, %s3196_s20, %s3197_s5  }
0x2d94   :  { %3180 = dma.done.wait [#allocation5], 1024  }
0x2d95   :  { %3181 = vsyncadd [#allocation5], 4294966272 }
0x2d96   :  { %2422 = vsyncpa [#allocation4], 1 }
0x2d97   :  { %2423 = vsyncpa [#allocation7], 1 }
0x2d98   :  { %2424 = vsyncpa [#allocation5], 1 }

</bundles_post_ra>
